<compile_context>
chip_gen: v5e
topology: v5e:2x2
jax: 0.10.0
libtpu: 0.0.40
codegen_flags: <defaults>
</compile_context>

<pallas_src>
import functools

import jax
import jax.numpy as jnp
from jax import lax
from jax.experimental import pallas as pl
from jax.experimental.pallas import tpu as pltpu

_EPS = 1e-5

# Conservative VMEM residency budget for the fused single-call path.  Chosen
# to fit inside every generation's *default* scoped VMEM (v5e 16 MiB,
# v6e/v7x 32 MiB) with headroom for double-buffered input tiles.
_FUSED_VMEM_BUDGET = 12 * 1024 * 1024


def _pick_spatial_tile(p, max_tile=2048):
    """Largest multiple of 128 that divides p and is <= max_tile, else p.

    Keeps each per-input tile <= ~832 KiB (f32, 104 channels), well inside the
    default scoped VMEM on all generations even with double buffering.
    """
    best = None
    t = 128
    while t <= min(p, max_tile):
        if p % t == 0:
            best = t
        t += 128
    return best if best is not None else p


# ---------------------------------------------------------------------------
# Fused single-call path (y kept resident in VMEM for the whole grid).
# ---------------------------------------------------------------------------
def _fused_kernel(x1_ref, x2_ref, w_ref, gamma_ref, beta_ref, o_ref,
                  sum_ref, sumsq_ref, *, inv_count):
    # x1_ref, x2_ref : (1, Cin, P)  per-batch tiles (lane dim = spatial)
    # w_ref          : (Cout, Cin)
    # gamma/beta     : (Cout, 1)
    # o_ref          : (N, Cout, P) resident output block (constant index map)
    # sum/sumsq      : (Cout, 1) VMEM scratch accumulators
    i = pl.program_id(0)
    n = pl.num_programs(0)

    @pl.when(i == 0)
    def _():
        sum_ref[...] = jnp.zeros_like(sum_ref)
        sumsq_ref[...] = jnp.zeros_like(sumsq_ref)

    x = jnp.maximum(x1_ref[0] + x2_ref[0], 0.0)                      # add+relu (VPU)
    y = jnp.dot(w_ref[...], x, preferred_element_type=jnp.float32)   # 1x1 conv (MXU)
    o_ref[i] = y                                                     # stash y in VMEM

    # One-pass statistics (E[y^2]-E[y]^2; acceptable at 1e-3 tolerance here).
    sum_ref[...] += jnp.sum(y, axis=1, keepdims=True)
    sumsq_ref[...] += jnp.sum(y * y, axis=1, keepdims=True)

    @pl.when(i == n - 1)
    def _():
        mean = sum_ref[...] * inv_count                    # (Cout, 1)
        var = sumsq_ref[...] * inv_count - mean * mean     # biased (training BN)
        inv_std = lax.rsqrt(var + _EPS)
        scale = gamma_ref[...] * inv_std
        shift = beta_ref[...] - mean * scale
        # Normalize the whole resident y in place; written back to HBM once.
        o_ref[...] = o_ref[...] * scale[None] + shift[None]


# ---------------------------------------------------------------------------
# Fallback two-pass path (only when y does not fit the VMEM budget).
# ---------------------------------------------------------------------------
def _conv_stats_kernel(x1_ref, x2_ref, w_ref, y_ref, sum_ref, sumsq_ref):
    # Resident per-batch (Cout,1) stats across the spatial (reduction) axis.
    j = pl.program_id(1)

    x = jnp.maximum(x1_ref[0] + x2_ref[0], 0.0)
    y = jnp.dot(w_ref[...], x, preferred_element_type=jnp.float32)
    y_ref[0] = y

    @pl.when(j == 0)
    def _():
        sum_ref[...] = jnp.zeros_like(sum_ref)
        sumsq_ref[...] = jnp.zeros_like(sumsq_ref)

    sum_ref[0] += jnp.sum(y, axis=1, keepdims=True)
    sumsq_ref[0] += jnp.sum(y * y, axis=1, keepdims=True)


def _apply_kernel(psum_ref, psumsq_ref, gamma_ref, beta_ref, y_ref, o_ref,
                  *, inv_count):
    # In-kernel BN fold (replaces the old XLA micro-ops): the (N,Cout,1)
    # partials are tiny, so recomputing scale/shift per grid step is cheap and
    # stays correct under "parallel" megacore splitting.
    s = jnp.sum(psum_ref[...], axis=0)      # (Cout, 1)
    ss = jnp.sum(psumsq_ref[...], axis=0)   # (Cout, 1)
    mean = s * inv_count
    var = ss * inv_count - mean * mean
    inv_std = lax.rsqrt(var + _EPS)
    scale = gamma_ref[...] * inv_std
    shift = beta_ref[...] - mean * scale
    o_ref[0] = y_ref[0] * scale + shift


# ---------------------------------------------------------------------------
# Wrapper.
# ---------------------------------------------------------------------------
@functools.partial(jax.jit, static_argnames=("fused_vmem_budget",))
def fused_add_relu_conv1x1_bn(x23, x37, w, gamma, beta,
                              *, fused_vmem_budget=_FUSED_VMEM_BUDGET):
    """x23, x37: (N, C, H, W) f32; w: (Cout, Cin, 1, 1); gamma/beta: (C,)."""
    N, C, H, W = x23.shape
    Cout = w.shape[0]
    P = H * W

    # NCHW kept: just flatten spatial (no transposes, no HBM layout copies).
    x1 = x23.reshape(N, C, P)
    x2 = x37.reshape(N, C, P)
    w2d = w.reshape(Cout, C)
    gamma2 = gamma.reshape(Cout, 1)
    beta2 = beta.reshape(Cout, 1)
    inv_count = 1.0 / float(N * P)

    # VMEM residency estimate for the fused path: resident y + double-buffered
    # input tiles + weight.
    fused_bytes = (N * Cout * P + 2 * 2 * C * P + Cout * C) * 4

    if fused_bytes <= fused_vmem_budget:
        # ---- single fused call: conv + stats + fold + normalize ----
        out = pl.pallas_call(
            functools.partial(_fused_kernel, inv_count=inv_count),
            out_shape=jax.ShapeDtypeStruct((N, Cout, P), jnp.float32),
            grid=(N,),
            in_specs=[
                pl.BlockSpec((1, C, P), lambda i: (i, 0, 0)),
                pl.BlockSpec((1, C, P), lambda i: (i, 0, 0)),
                pl.BlockSpec((Cout, C), lambda i: (0, 0)),
                pl.BlockSpec((Cout, 1), lambda i: (0, 0)),
                pl.BlockSpec((Cout, 1), lambda i: (0, 0)),
            ],
            # Constant index map -> output stays resident in VMEM across the
            # whole grid; normalized in-kernel and written back once.
            out_specs=pl.BlockSpec((N, Cout, P), lambda i: (0, 0, 0)),
            scratch_shapes=[
                pltpu.VMEM((Cout, 1), jnp.float32),
                pltpu.VMEM((Cout, 1), jnp.float32),
            ],
            compiler_params=pltpu.CompilerParams(
                dimension_semantics=("arbitrary",)),
        )(x1, x2, w2d, gamma2, beta2)
        return out.reshape(N, Cout, H, W)

    # ---- fallback: two-pass path for large y residency ----
    TP = _pick_spatial_tile(P)
    nt = P // TP

    y, psum, psumsq = pl.pallas_call(
        _conv_stats_kernel,
        out_shape=(
            jax.ShapeDtypeStruct((N, Cout, P), jnp.float32),
            jax.ShapeDtypeStruct((N, Cout, 1), jnp.float32),
            jax.ShapeDtypeStruct((N, Cout, 1), jnp.float32),
        ),
        grid=(N, nt),
        in_specs=[
            pl.BlockSpec((1, C, TP), lambda i, j: (i, 0, j)),
            pl.BlockSpec((1, C, TP), lambda i, j: (i, 0, j)),
            pl.BlockSpec((Cout, C), lambda i, j: (0, 0)),
        ],
        out_specs=(
            pl.BlockSpec((1, Cout, TP), lambda i, j: (i, 0, j)),
            pl.BlockSpec((1, Cout, 1), lambda i, j: (i, 0, 0)),
            pl.BlockSpec((1, Cout, 1), lambda i, j: (i, 0, 0)),
        ),
        compiler_params=pltpu.CompilerParams(
            dimension_semantics=("parallel", "arbitrary")),
    )(x1, x2, w2d)

    out = pl.pallas_call(
        functools.partial(_apply_kernel, inv_count=inv_count),
        out_shape=jax.ShapeDtypeStruct((N, Cout, P), jnp.float32),
        grid=(N, nt),
        in_specs=[
            pl.BlockSpec((N, Cout, 1), lambda i, j: (0, 0, 0)),   # psum (full)
            pl.BlockSpec((N, Cout, 1), lambda i, j: (0, 0, 0)),   # psumsq (full)
            pl.BlockSpec((Cout, 1), lambda i, j: (0, 0)),         # gamma
            pl.BlockSpec((Cout, 1), lambda i, j: (0, 0)),         # beta
            pl.BlockSpec((1, Cout, TP), lambda i, j: (i, 0, j)),  # y
        ],
        out_specs=pl.BlockSpec((1, Cout, TP), lambda i, j: (i, 0, j)),
        input_output_aliases={4: 0},   # write result in place over y
        compiler_params=pltpu.CompilerParams(
            dimension_semantics=("parallel", "parallel")),
    )(psum, psumsq, gamma2, beta2, y)

    # TODO(synk): training-mode BatchNorm2d also updates running_mean /
    # running_var buffers (with unbiased var); those side-effect updates are
    # intentionally not emitted here.
    return out.reshape(N, Cout, H, W)


def _reference(x23, x37, w, gamma, beta):
    """Pure-JAX reference for correctness checking."""
    x = jnp.maximum(x23 + x37, 0.0)
    Cout, Cin = w.shape[0], w.shape[1]
    y = jnp.einsum("oc,nchw->nohw", w.reshape(Cout, Cin), x)
    mean = jnp.mean(y, axis=(0, 2, 3), keepdims=True)
    var = jnp.mean((y - mean) ** 2, axis=(0, 2, 3), keepdims=True)
    return ((y - mean) / jnp.sqrt(var + _EPS) * gamma[None, :, None, None]
            + beta[None, :, None, None])


if __name__ == "__main__":
    key = jax.random.PRNGKey(0)
    k1, k2, k3, k4, k5 = jax.random.split(key, 5)

    # Channels fixed at 104 by the module; use the module's own input shape.
    N, C, H, W = 1, 104, 28, 28

    x23 = jax.random.normal(k1, (N, C, H, W), dtype=jnp.float32)
    x37 = jax.random.normal(k2, (N, C, H, W), dtype=jnp.float32)

    # Deterministic parameter init (synthetic; not a checkpoint load).
    conv_w = jax.random.normal(k3, (C, C, 1, 1), dtype=jnp.float32) * 0.1
    gamma = 1.0 + 0.1 * jax.random.normal(k4, (C,), dtype=jnp.float32)
    beta = 0.1 * jax.random.normal(k5, (C,), dtype=jnp.float32)

    # --- fused single-call path on the module's shape ---
    out = jax.block_until_ready(
        fused_add_relu_conv1x1_bn(x23, x37, conv_w, gamma, beta))
    ref = _reference(x23, x37, conv_w, gamma, beta)
    assert out.shape == (N, C, H, W)
    assert jnp.allclose(out, ref, atol=1e-3, rtol=1e-3), "fused path mismatch"

    # --- fused path with batch > 1 (lane-dense spatial) ---
    N2, H2, W2 = 2, 104, 16
    a = jax.random.normal(k1, (N2, C, 16, 16), dtype=jnp.float32)
    b = jax.random.normal(k2, (N2, C, 16, 16), dtype=jnp.float32)
    out2 = jax.block_until_ready(
        fused_add_relu_conv1x1_bn(a, b, conv_w, gamma, beta))
    ref2 = _reference(a, b, conv_w, gamma, beta)
    assert jnp.allclose(out2, ref2, atol=1e-3, rtol=1e-3), "fused batch mismatch"

    # --- two-pass fallback path (forced with a zero fused budget) ---
    out3 = jax.block_until_ready(
        fused_add_relu_conv1x1_bn(a, b, conv_w, gamma, beta,
                                  fused_vmem_budget=0))
    assert jnp.allclose(out3, ref2, atol=1e-3, rtol=1e-3), "two-pass mismatch"

    print("KERNEL_OK")
</pallas_src>

<mosaic_0001>
module attributes {stable_mosaic.version = 11 : i64} {
  func.func @_fused_kernel(%arg0: i32, %arg1: memref<1x104x784xf32, #tpu.memory_space<vmem>>, %arg2: memref<1x104x784xf32, #tpu.memory_space<vmem>>, %arg3: memref<104x104xf32, #tpu.memory_space<vmem>>, %arg4: memref<104x1xf32, #tpu.memory_space<vmem>>, %arg5: memref<104x1xf32, #tpu.memory_space<vmem>>, %arg6: memref<1x104x784xf32, #tpu.memory_space<vmem>>, %arg7: memref<104x1xf32, #tpu.memory_space<vmem>>, %arg8: memref<104x1xf32, #tpu.memory_space<vmem>>) attributes {dimension_semantics = [#tpu.dimension_semantics<arbitrary>], iteration_bounds = array<i64: 1>, scalar_prefetch = 0 : i64, scratch_operands = 2 : i64, tpu.core_type = #tpu.core_type<tc>, window_params = [{transform_indices = @transform_0, window_bounds = array<i64: 1, 104, 784>}, {transform_indices = @transform_1, window_bounds = array<i64: 1, 104, 784>}, {pipeline_mode = #tpu.pipeline_mode<synchronous>, transform_indices = @transform_2, window_bounds = array<i64: 104, 104>}, {pipeline_mode = #tpu.pipeline_mode<synchronous>, transform_indices = @transform_3, window_bounds = array<i64: 104, 1>}, {pipeline_mode = #tpu.pipeline_mode<synchronous>, transform_indices = @transform_4, window_bounds = array<i64: 104, 1>}, {pipeline_mode = #tpu.pipeline_mode<synchronous>, transform_indices = @transform_5, window_bounds = array<i64: 1, 104, 784>}]} {
    %c0_i32 = arith.constant 0 : i32
    %0 = arith.cmpi eq, %arg0, %c0_i32 : i32
    %1 = arith.extui %0 : i1 to i32
    %c0_i32_0 = arith.constant 0 : i32
    %2 = arith.cmpi ne, %1, %c0_i32_0 : i32
    scf.if %2 {
      %cst_23 = arith.constant 0.000000e+00 : f32
      %30 = vector.broadcast %cst_23 : f32 to vector<104x1xf32>
      %c0_24 = arith.constant 0 : index
      %c0_25 = arith.constant 0 : index
      %31 = vector.load %arg7[%c0_24, %c0_25] : memref<104x1xf32, #tpu.memory_space<vmem>>, vector<104x1xf32>
      tpu.vector_store %arg7[%c0_24, %c0_25], %30 {strides = array<i32>} : memref<104x1xf32, #tpu.memory_space<vmem>>, vector<104x1xf32>,
      %cst_26 = arith.constant 0.000000e+00 : f32
      %32 = vector.broadcast %cst_26 : f32 to vector<104x1xf32>
      %c0_27 = arith.constant 0 : index
      %c0_28 = arith.constant 0 : index
      %33 = vector.load %arg8[%c0_27, %c0_28] : memref<104x1xf32, #tpu.memory_space<vmem>>, vector<104x1xf32>
      tpu.vector_store %arg8[%c0_27, %c0_28], %32 {strides = array<i32>} : memref<104x1xf32, #tpu.memory_space<vmem>>, vector<104x1xf32>,
    } else {
    }
    %c0 = arith.constant 0 : index
    %c0_1 = arith.constant 0 : index
    %c0_2 = arith.constant 0 : index
    %3 = vector.load %arg1[%c0, %c0_1, %c0_2] : memref<1x104x784xf32, #tpu.memory_space<vmem>>, vector<1x104x784xf32>
    %4 = vector.shape_cast %3 : vector<1x104x784xf32> to vector<104x784xf32>
    %c0_3 = arith.constant 0 : index
    %c0_4 = arith.constant 0 : index
    %c0_5 = arith.constant 0 : index
    %5 = vector.load %arg2[%c0_3, %c0_4, %c0_5] : memref<1x104x784xf32, #tpu.memory_space<vmem>>, vector<1x104x784xf32>
    %6 = vector.shape_cast %5 : vector<1x104x784xf32> to vector<104x784xf32>
    %7 = arith.addf %4, %6 : vector<104x784xf32>
    %cst = arith.constant 0.000000e+00 : f32
    %8 = vector.broadcast %cst : f32 to vector<104x784xf32>
    %9 = arith.maximumf %7, %8 : vector<104x784xf32>
    %c0_6 = arith.constant 0 : index
    %c0_7 = arith.constant 0 : index
    %10 = vector.load %arg3[%c0_6, %c0_7] : memref<104x104xf32, #tpu.memory_space<vmem>>, vector<104x104xf32>
    %cst_8 = arith.constant dense<0.000000e+00> : vector<104x784xf32>
    %11 = tpu.matmul %10, %9, %cst_8 {dimension_numbers = #tpu.dot_dimension_numbers<[1], [0], [0], [1], [0, 0, 1, 1], [], []>} : vector<104x104xf32>, vector<104x784xf32>, vector<104x784xf32> -> vector<104x784xf32>
    %12 = arith.index_cast %arg0 : i32 to index
    %c0_9 = arith.constant 0 : index
    %c0_10 = arith.constant 0 : index
    %13 = vector.load %arg6[%12, %c0_9, %c0_10] : memref<1x104x784xf32, #tpu.memory_space<vmem>>, vector<1x104x784xf32>
    %14 = vector.shape_cast %13 : vector<1x104x784xf32> to vector<104x784xf32>
    %15 = vector.shape_cast %11 : vector<104x784xf32> to vector<1x104x784xf32>
    tpu.vector_store %arg6[%12, %c0_9, %c0_10], %15 {strides = array<i32>} : memref<1x104x784xf32, #tpu.memory_space<vmem>>, vector<1x104x784xf32>,
    %c0_11 = arith.constant 0 : index
    %c0_12 = arith.constant 0 : index
    %16 = vector.load %arg7[%c0_11, %c0_12] : memref<104x1xf32, #tpu.memory_space<vmem>>, vector<104x1xf32>
    %cst_13 = arith.constant dense<0.000000e+00> : vector<104xf32>
    %17 = vector.multi_reduction <add>, %11, %cst_13 [1] : vector<104x784xf32> to vector<104xf32>
    %18 = vector.shape_cast %17 : vector<104xf32> to vector<104x1xf32>
    %19 = arith.addf %16, %18 : vector<104x1xf32>
    %c0_14 = arith.constant 0 : index
    %c0_15 = arith.constant 0 : index
    %20 = vector.load %arg7[%c0_14, %c0_15] : memref<104x1xf32, #tpu.memory_space<vmem>>, vector<104x1xf32>
    tpu.vector_store %arg7[%c0_14, %c0_15], %19 {strides = array<i32>} : memref<104x1xf32, #tpu.memory_space<vmem>>, vector<104x1xf32>,
    %c0_16 = arith.constant 0 : index
    %c0_17 = arith.constant 0 : index
    %21 = vector.load %arg8[%c0_16, %c0_17] : memref<104x1xf32, #tpu.memory_space<vmem>>, vector<104x1xf32>
    %22 = arith.mulf %11, %11 : vector<104x784xf32>
    %cst_18 = arith.constant dense<0.000000e+00> : vector<104xf32>
    %23 = vector.multi_reduction <add>, %22, %cst_18 [1] : vector<104x784xf32> to vector<104xf32>
    %24 = vector.shape_cast %23 : vector<104xf32> to vector<104x1xf32>
    %25 = arith.addf %21, %24 : vector<104x1xf32>
    %c0_19 = arith.constant 0 : index
    %c0_20 = arith.constant 0 : index
    %26 = vector.load %arg8[%c0_19, %c0_20] : memref<104x1xf32, #tpu.memory_space<vmem>>, vector<104x1xf32>
    tpu.vector_store %arg8[%c0_19, %c0_20], %25 {strides = array<i32>} : memref<104x1xf32, #tpu.memory_space<vmem>>, vector<104x1xf32>,
    %c0_i32_21 = arith.constant 0 : i32
    %27 = arith.cmpi eq, %arg0, %c0_i32_21 : i32
    %28 = arith.extui %27 : i1 to i32
    %c0_i32_22 = arith.constant 0 : i32
    %29 = arith.cmpi ne, %28, %c0_i32_22 : i32
    scf.if %29 {
      %c0_23 = arith.constant 0 : index
      %c0_24 = arith.constant 0 : index
      %30 = vector.load %arg7[%c0_23, %c0_24] : memref<104x1xf32, #tpu.memory_space<vmem>>, vector<104x1xf32>
      %cst_25 = arith.constant 0.00127551018 : f32
      %31 = vector.broadcast %cst_25 : f32 to vector<104x1xf32>
      %32 = arith.mulf %30, %31 : vector<104x1xf32>
      %c0_26 = arith.constant 0 : index
      %c0_27 = arith.constant 0 : index
      %33 = vector.load %arg8[%c0_26, %c0_27] : memref<104x1xf32, #tpu.memory_space<vmem>>, vector<104x1xf32>
      %cst_28 = arith.constant 0.00127551018 : f32
      %34 = vector.broadcast %cst_28 : f32 to vector<104x1xf32>
      %35 = arith.mulf %33, %34 : vector<104x1xf32>
      %36 = arith.mulf %32, %32 : vector<104x1xf32>
      %37 = arith.subf %35, %36 : vector<104x1xf32>
      %cst_29 = arith.constant 9.99999974E-6 : f32
      %38 = vector.broadcast %cst_29 : f32 to vector<104x1xf32>
      %39 = arith.addf %37, %38 : vector<104x1xf32>
      %40 = math.rsqrt %39 : vector<104x1xf32>
      %c0_30 = arith.constant 0 : index
      %c0_31 = arith.constant 0 : index
      %41 = vector.load %arg4[%c0_30, %c0_31] : memref<104x1xf32, #tpu.memory_space<vmem>>, vector<104x1xf32>
      %42 = arith.mulf %41, %40 : vector<104x1xf32>
      %c0_32 = arith.constant 0 : index
      %c0_33 = arith.constant 0 : index
      %43 = vector.load %arg5[%c0_32, %c0_33] : memref<104x1xf32, #tpu.memory_space<vmem>>, vector<104x1xf32>
      %44 = arith.mulf %32, %42 : vector<104x1xf32>
      %45 = arith.subf %43, %44 : vector<104x1xf32>
      %c0_34 = arith.constant 0 : index
      %c0_35 = arith.constant 0 : index
      %c0_36 = arith.constant 0 : index
      %46 = vector.load %arg6[%c0_34, %c0_35, %c0_36] : memref<1x104x784xf32, #tpu.memory_space<vmem>>, vector<1x104x784xf32>
      %47 = vector.shape_cast %42 : vector<104x1xf32> to vector<1x104x1xf32>
      %48 = vector.broadcast %47 : vector<1x104x1xf32> to vector<1x104x784xf32>
      %49 = arith.mulf %46, %48 : vector<1x104x784xf32>
      %50 = vector.shape_cast %45 : vector<104x1xf32> to vector<1x104x1xf32>
      %51 = vector.broadcast %50 : vector<1x104x1xf32> to vector<1x104x784xf32>
      %52 = arith.addf %49, %51 : vector<1x104x784xf32>
      %c0_37 = arith.constant 0 : index
      %c0_38 = arith.constant 0 : index
      %c0_39 = arith.constant 0 : index
      %53 = vector.load %arg6[%c0_37, %c0_38, %c0_39] : memref<1x104x784xf32, #tpu.memory_space<vmem>>, vector<1x104x784xf32>
      tpu.vector_store %arg6[%c0_37, %c0_38, %c0_39], %52 {strides = array<i32>} : memref<1x104x784xf32, #tpu.memory_space<vmem>>, vector<1x104x784xf32>,
    } else {
    }
    return
  }
  func.func @transform_0(%arg0: i32) -> (i32, i32, i32) {
    %c0_i32 = arith.constant 0 : i32
    %c0_i32_0 = arith.constant 0 : i32
    %c0_i32_1 = arith.constant 0 : i32
    return %arg0, %c0_i32, %c0_i32_0 : i32, i32, i32
  }
  func.func @transform_1(%arg0: i32) -> (i32, i32, i32) {
    %c0_i32 = arith.constant 0 : i32
    %c0_i32_0 = arith.constant 0 : i32
    %c0_i32_1 = arith.constant 0 : i32
    return %arg0, %c0_i32, %c0_i32_0 : i32, i32, i32
  }
  func.func @transform_2(%arg0: i32) -> (i32, i32) {
    %c0_i32 = arith.constant 0 : i32
    %c0_i32_0 = arith.constant 0 : i32
    %c0_i32_1 = arith.constant 0 : i32
    return %c0_i32, %c0_i32_0 : i32, i32
  }
  func.func @transform_3(%arg0: i32) -> (i32, i32) {
    %c0_i32 = arith.constant 0 : i32
    %c0_i32_0 = arith.constant 0 : i32
    %c0_i32_1 = arith.constant 0 : i32
    return %c0_i32, %c0_i32_0 : i32, i32
  }
  func.func @transform_4(%arg0: i32) -> (i32, i32) {
    %c0_i32 = arith.constant 0 : i32
    %c0_i32_0 = arith.constant 0 : i32
    %c0_i32_1 = arith.constant 0 : i32
    return %c0_i32, %c0_i32_0 : i32, i32
  }
  func.func @transform_5(%arg0: i32) -> (i32, i32, i32) {
    %c0_i32 = arith.constant 0 : i32
    %c0_i32_0 = arith.constant 0 : i32
    %c0_i32_1 = arith.constant 0 : i32
    %c0_i32_2 = arith.constant 0 : i32
    return %c0_i32, %c0_i32_0, %c0_i32_1 : i32, i32, i32
  }
}

</mosaic_0001>

<bundles_post_ra>
// kernel: fused_add_relu_conv1x1_bn.1
= control target key start
LH: loop header
LB: loop body
LE: loop exit
PB: predicated region body
PF: predicated region fallthrough
CT: control target
= control target key end

     0   :  { %vm428_vm0 = vcmask 850944   ;;  %vm869_vm1 = vcmask 130048   ;;  %vm24_vm2 = vcmask 7168   ;;  %s4741_s0 = inlined_call_operand.vmem [shape: f32[1,104,784], index: 0, kind: input, shape index: {}]   ;;  %s4742_s1 = inlined_call_operand.vmem [shape: f32[1,104,784], index: 1, kind: input, shape index: {}]   ;;  %s4743_s2 = inlined_call_operand.vmem [shape: f32[104,104], index: 2, kind: input, shape index: {}]   ;;  %s4744_s5 = inlined_call_operand.vmem [shape: f32[1,104,784], index: 5, kind: output, shape index: {}]   ;;  %s4745_s3 = inlined_call_operand.vmem [shape: f32[104,1], index: 3, kind: input, shape index: {}]   ;;  %s4746_s4 = inlined_call_operand.vmem [shape: f32[104,1], index: 4, kind: input, shape index: {}]  }
   0x1   :  { %v135_v0 = vld [vmem:[%s4741_s0 + $0x2a0] sm:$0xff]  ;;  %v137_v2 = vld [vmem:[%s4741_s0 + $0x2b0] sm:$0xff]  ;;  %v136_v5 = vld [vmem:[%s4741_s0 + $0x2a8] sm:$0xff] }
   0x2   :  { %v226_v1 = vld [vmem:[%s4742_s1 + $0x2a0] sm:$0xff]  ;;  %v228_v4 = vld [vmem:[%s4742_s1 + $0x2b0] sm:$0xff]  ;;  %v227_v6 = vld [vmem:[%s4742_s1 + $0x2a8] sm:$0xff] }
   0x3   :  { %v317_v3 = vadd.f32 %v226_v1, %v135_v0  ;;  %v319_v7 = vadd.f32 %v228_v4, %v137_v2  ;;  %v2357_v8 = vadd.f32 %v227_v6, %v136_v5  ;;  %v128_v9 = vld [vmem:[%s4741_s0 + $0x268] sm:$0xff]  ;;  %v130_v11 = vld [vmem:[%s4741_s0 + $0x278] sm:$0xff]  ;;  %v129_v15 = vld [vmem:[%s4741_s0 + $0x270] sm:$0xff] }
   0x4   :  { %v219_v10 = vld [vmem:[%s4742_s1 + $0x268] sm:$0xff]  ;;  %v221_v14 = vld [vmem:[%s4742_s1 + $0x278] sm:$0xff]  ;;  %v220_v16 = vld [vmem:[%s4742_s1 + $0x270] sm:$0xff] }
   0x5   :  { %v408_v12 = vmax.f32 %v317_v3, 0.0  ;;  %v310_v13 = vadd.f32 %v219_v10, %v128_v9  ;;  %v410_v17 = vmax.f32 %v319_v7, 0.0  ;;  %v409_v18 = vmax.f32 %v2357_v8, 0.0  ;;  %v121_v21 = vld [vmem:[%s4741_s0 + $0x230] sm:$0xff]  ;;  %v123_v23 = vld [vmem:[%s4741_s0 + $0x240] sm:$0xff]  ;;  %v122_v27 = vld [vmem:[%s4741_s0 + $0x238] sm:$0xff] }
   0x6   :  { %v312_v19 = vadd.f32 %v221_v14, %v130_v11  ;;  %v2378_v20 = vadd.f32 %v220_v16, %v129_v15  ;;  %v212_v22 = vld [vmem:[%s4742_s1 + $0x230] sm:$0xff]  ;;  %v214_v26 = vld [vmem:[%s4742_s1 + $0x240] sm:$0xff]  ;;  %v213_v28 = vld [vmem:[%s4742_s1 + $0x238] sm:$0xff] }
   0x7   :  { %471 = vmatpush.msra.mxu0 %v408_v12  ;;  %2237 = vmatpush.msra.mxu3 %v408_v12  ;;  %v401_v24 = vmax.f32 %v310_v13, 0.0  ;;  %v303_v25 = vadd.f32 %v212_v22, %v121_v21  ;;  %v305_v31 = vadd.f32 %v214_v26, %v123_v23  ;;  %v2401_v32 = vadd.f32 %v213_v28, %v122_v27  ;;  %v114_v33 = vld [vmem:[%s4741_s0 + $0x1f8] sm:$0xff]  ;;  %v116_v35 = vld [vmem:[%s4741_s0 + $0x208] sm:$0xff]  ;;  %v115_v39 = vld [vmem:[%s4741_s0 + $0x200] sm:$0xff] }
   0x8   :  { %583 = vmatpush.msra.mxu2 %v410_v17  ;;  %2250 = vmatpush.msra.mxu1 %v409_v18  ;;  %v403_v29 = vmax.f32 %v312_v19, 0.0  ;;  %v402_v30 = vmax.f32 %v2378_v20, 0.0  ;;  %v205_v34 = vld [vmem:[%s4742_s1 + $0x1f8] sm:$0xff]  ;;  %v207_v38 = vld [vmem:[%s4742_s1 + $0x208] sm:$0xff]  ;;  %v206_v40 = vld [vmem:[%s4742_s1 + $0x200] sm:$0xff] }
   0x9   :  { %472 = vmatpush.msra.mxu0 %v401_v24  ;;  %2238 = vmatpush.msra.mxu3 %v401_v24  ;;  %v394_v36 = vmax.f32 %v303_v25, 0.0  ;;  %v296_v37 = vadd.f32 %v205_v34, %v114_v33  ;;  %v396_v41 = vmax.f32 %v305_v31, 0.0  ;;  %v395_v42 = vmax.f32 %v2401_v32, 0.0  ;;  %v107_v45 = vld [vmem:[%s4741_s0 + $0x1c0] sm:$0xff]  ;;  %v109_v47 = vld [vmem:[%s4741_s0 + $0x1d0] sm:$0xff]  ;;  %v108_v51 = vld [vmem:[%s4741_s0 + $0x1c8] sm:$0xff] }
   0xa   :  { %584 = vmatpush.msra.mxu2 %v403_v29  ;;  %2251 = vmatpush.msra.mxu1 %v402_v30  ;;  %v298_v43 = vadd.f32 %v207_v38, %v116_v35  ;;  %v2424_v44 = vadd.f32 %v206_v40, %v115_v39  ;;  %v198_v46 = vld [vmem:[%s4742_s1 + $0x1c0] sm:$0xff]  ;;  %v200_v50 = vld [vmem:[%s4742_s1 + $0x1d0] sm:$0xff]  ;;  %v199_v52 = vld [vmem:[%s4742_s1 + $0x1c8] sm:$0xff] }
   0xb   :  { %473 = vmatpush.msra.mxu0 %v394_v36  ;;  %2239 = vmatpush.msra.mxu3 %v394_v36  ;;  %v387_v48 = vmax.f32 %v296_v37, 0.0  ;;  %v289_v49 = vadd.f32 %v198_v46, %v107_v45  ;;  %v291_v55 = vadd.f32 %v200_v50, %v109_v47  ;;  %v2447_v56 = vadd.f32 %v199_v52, %v108_v51  ;;  %v100_v57 = vld [vmem:[%s4741_s0 + $0x188] sm:$0xff]  ;;  %v102_v59 = vld [vmem:[%s4741_s0 + $0x198] sm:$0xff]  ;;  %v101_v63 = vld [vmem:[%s4741_s0 + $0x190] sm:$0xff] }
   0xc   :  { %585 = vmatpush.msra.mxu2 %v396_v41  ;;  %2252 = vmatpush.msra.mxu1 %v395_v42  ;;  %v389_v53 = vmax.f32 %v298_v43, 0.0  ;;  %v388_v54 = vmax.f32 %v2424_v44, 0.0  ;;  %v191_v58 = vld [vmem:[%s4742_s1 + $0x188] sm:$0xff]  ;;  %v193_v62 = vld [vmem:[%s4742_s1 + $0x198] sm:$0xff]  ;;  %v192_v0 = vld [vmem:[%s4742_s1 + $0x190] sm:$0xff] }
   0xd   :  { %474 = vmatpush.msra.mxu0 %v387_v48  ;;  %2240 = vmatpush.msra.mxu3 %v387_v48  ;;  %v380_v60 = vmax.f32 %v289_v49, 0.0  ;;  %v282_v61 = vadd.f32 %v191_v58, %v100_v57  ;;  %v382_v1 = vmax.f32 %v291_v55, 0.0  ;;  %v381_v2 = vmax.f32 %v2447_v56, 0.0  ;;  %v93_v5 = vld [vmem:[%s4741_s0 + $0x150] sm:$0xff]  ;;  %v95_v7 = vld [vmem:[%s4741_s0 + $0x160] sm:$0xff]  ;;  %v94_v12 = vld [vmem:[%s4741_s0 + $0x158] sm:$0xff] }
   0xe   :  { %586 = vmatpush.msra.mxu2 %v389_v53  ;;  %2253 = vmatpush.msra.mxu1 %v388_v54  ;;  %v284_v3 = vadd.f32 %v193_v62, %v102_v59  ;;  %v2470_v4 = vadd.f32 %v192_v0, %v101_v63  ;;  %v184_v6 = vld [vmem:[%s4742_s1 + $0x150] sm:$0xff]  ;;  %v186_v11 = vld [vmem:[%s4742_s1 + $0x160] sm:$0xff]  ;;  %v185_v13 = vld [vmem:[%s4742_s1 + $0x158] sm:$0xff] }
   0xf   :  { %475 = vmatpush.msra.mxu0 %v380_v60  ;;  %2241 = vmatpush.msra.mxu3 %v380_v60  ;;  %v373_v9 = vmax.f32 %v282_v61, 0.0  ;;  %v275_v10 = vadd.f32 %v184_v6, %v93_v5  ;;  %v277_v16 = vadd.f32 %v186_v11, %v95_v7  ;;  %v2493_v17 = vadd.f32 %v185_v13, %v94_v12  ;;  %v86_v19 = vld [vmem:[%s4741_s0 + $0x118] sm:$0xff]  ;;  %v88_v22 = vld [vmem:[%s4741_s0 + $0x128] sm:$0xff]  ;;  %v87_v26 = vld [vmem:[%s4741_s0 + $0x120] sm:$0xff] }
  0x10   :  { %587 = vmatpush.msra.mxu2 %v382_v1  ;;  %2254 = vmatpush.msra.mxu1 %v381_v2  ;;  %v375_v14 = vmax.f32 %v284_v3, 0.0  ;;  %v374_v15 = vmax.f32 %v2470_v4, 0.0  ;;  %v177_v21 = vld [vmem:[%s4742_s1 + $0x118] sm:$0xff]  ;;  %v179_v25 = vld [vmem:[%s4742_s1 + $0x128] sm:$0xff]  ;;  %v178_v27 = vld [vmem:[%s4742_s1 + $0x120] sm:$0xff] }
  0x11   :  { %476 = vmatpush.msra.mxu0 %v373_v9  ;;  %2242 = vmatpush.msra.mxu3 %v373_v9  ;;  %v366_v23 = vmax.f32 %v275_v10, 0.0  ;;  %v268_v24 = vadd.f32 %v177_v21, %v86_v19  ;;  %v368_v28 = vmax.f32 %v277_v16, 0.0  ;;  %v367_v29 = vmax.f32 %v2493_v17, 0.0  ;;  %v79_v34 = vld [vmem:[%s4741_s0 + $0xe0] sm:$0xff]  ;;  %v81_v36 = vld [vmem:[%s4741_s0 + $0xf0] sm:$0xff]  ;;  %v80_v40 = vld [vmem:[%s4741_s0 + $0xe8] sm:$0xff] }
  0x12   :  { %588 = vmatpush.msra.mxu2 %v375_v14  ;;  %2255 = vmatpush.msra.mxu1 %v374_v15  ;;  %v270_v31 = vadd.f32 %v179_v25, %v88_v22  ;;  %v2516_v33 = vadd.f32 %v178_v27, %v87_v26  ;;  %v170_v35 = vld [vmem:[%s4742_s1 + $0xe0] sm:$0xff]  ;;  %v172_v39 = vld [vmem:[%s4742_s1 + $0xf0] sm:$0xff]  ;;  %v171_v41 = vld [vmem:[%s4742_s1 + $0xe8] sm:$0xff] }
  0x13   :  { %477 = vmatpush.msra.mxu0 %v366_v23  ;;  %2243 = vmatpush.msra.mxu3 %v366_v23  ;;  %v359_v37 = vmax.f32 %v268_v24, 0.0  ;;  %v261_v38 = vadd.f32 %v170_v35, %v79_v34  ;;  %v263_v46 = vadd.f32 %v172_v39, %v81_v36  ;;  %v2539_v47 = vadd.f32 %v171_v41, %v80_v40  ;;  %v72_v48 = vld [vmem:[%s4741_s0 + $0xa8] sm:$0xff]  ;;  %v74_v50 = vld [vmem:[%s4741_s0 + $0xb8] sm:$0xff]  ;;  %v73_v55 = vld [vmem:[%s4741_s0 + $0xb0] sm:$0xff] }
  0x14   :  { %589 = vmatpush.msra.mxu2 %v368_v28  ;;  %2256 = vmatpush.msra.mxu1 %v367_v29  ;;  %v361_v43 = vmax.f32 %v270_v31, 0.0  ;;  %v360_v45 = vmax.f32 %v2516_v33, 0.0  ;;  %v163_v49 = vld [vmem:[%s4742_s1 + $0xa8] sm:$0xff]  ;;  %v165_v53 = vld [vmem:[%s4742_s1 + $0xb8] sm:$0xff]  ;;  %v164_v57 = vld [vmem:[%s4742_s1 + $0xb0] sm:$0xff] }
  0x15   :  { %478 = vmatpush.msra.mxu0 %v359_v37  ;;  %2244 = vmatpush.msra.mxu3 %v359_v37  ;;  %v352_v51 = vmax.f32 %v261_v38, 0.0  ;;  %v254_v52 = vadd.f32 %v163_v49, %v72_v48  ;;  %v354_v58 = vmax.f32 %v263_v46, 0.0  ;;  %v353_v59 = vmax.f32 %v2539_v47, 0.0  ;;  %v65_v62 = vld [vmem:[%s4741_s0 + $0x70] sm:$0xff]  ;;  %v67_v0 = vld [vmem:[%s4741_s0 + $0x80] sm:$0xff]  ;;  %v66_v6 = vld [vmem:[%s4741_s0 + $0x78] sm:$0xff] }
  0x16   :  { %590 = vmatpush.msra.mxu2 %v361_v43  ;;  %2257 = vmatpush.msra.mxu1 %v360_v45  ;;  %v256_v60 = vadd.f32 %v165_v53, %v74_v50  ;;  %v2562_v61 = vadd.f32 %v164_v57, %v73_v55  ;;  %v156_v63 = vld [vmem:[%s4742_s1 + $0x70] sm:$0xff]  ;;  %v158_v5 = vld [vmem:[%s4742_s1 + $0x80] sm:$0xff]  ;;  %v157_v7 = vld [vmem:[%s4742_s1 + $0x78] sm:$0xff] }
  0x17   :  { %479 = vmatpush.msra.mxu0 %v352_v51  ;;  %2245 = vmatpush.msra.mxu3 %v352_v51  ;;  %v345_v1 = vmax.f32 %v254_v52, 0.0  ;;  %v247_v3 = vadd.f32 %v156_v63, %v65_v62  ;;  %v249_v11 = vadd.f32 %v158_v5, %v67_v0  ;;  %v2585_v12 = vadd.f32 %v157_v7, %v66_v6  ;;  %v58_v13 = vld [vmem:[%s4741_s0 + $0x38] sm:$0xff]  ;;  %v60_v16 = vld [vmem:[%s4741_s0 + $0x48] sm:$0xff]  ;;  %v59_v23 = vld [vmem:[%s4741_s0 + $0x40] sm:$0xff] }
  0x18   :  { %591 = vmatpush.msra.mxu2 %v354_v58  ;;  %2258 = vmatpush.msra.mxu1 %v353_v59  ;;  %v347_v9 = vmax.f32 %v256_v60, 0.0  ;;  %v346_v10 = vmax.f32 %v2562_v61, 0.0  ;;  %v149_v14 = vld [vmem:[%s4742_s1 + $0x38] sm:$0xff]  ;;  %v151_v22 = vld [vmem:[%s4742_s1 + $0x48] sm:$0xff]  ;;  %v150_v24 = vld [vmem:[%s4742_s1 + $0x40] sm:$0xff] }
  0x19   :  { %480 = vmatpush.msra.mxu0 %v345_v1  ;;  %2246 = vmatpush.msra.mxu3 %v345_v1  ;;  %v338_v19 = vmax.f32 %v247_v3, 0.0  ;;  %v240_v21 = vadd.f32 %v149_v14, %v58_v13  ;;  %v340_v25 = vmax.f32 %v249_v11, 0.0  ;;  %v339_v26 = vmax.f32 %v2585_v12, 0.0  ;;  %v51_v31 = vld [vmem:[%s4741_s0] sm:$0xff]  ;;  %v53_v35 = vld [vmem:[%s4741_s0 + $0x10] sm:$0xff]  ;;  %v52_v46 = vld [vmem:[%s4741_s0 + $0x8] sm:$0xff] }
  0x1a   :  { %592 = vmatpush.msra.mxu2 %v347_v9  ;;  %2259 = vmatpush.msra.mxu1 %v346_v10  ;;  %v242_v27 = vadd.f32 %v151_v22, %v60_v16  ;;  %v2608_v28 = vadd.f32 %v150_v24, %v59_v23  ;;  %v142_v34 = vld [vmem:[%s4742_s1] sm:$0xff]  ;;  %v144_v38 = vld [vmem:[%s4742_s1 + $0x10] sm:$0xff]  ;;  %v143_v48 = vld [vmem:[%s4742_s1 + $0x8] sm:$0xff] }
  0x1b   :  { %481 = vmatpush.msra.mxu0 %v338_v19  ;;  %2247 = vmatpush.msra.mxu3 %v338_v19  ;;  %v331_v36 = vmax.f32 %v240_v21, 0.0  ;;  %v233_v37 = vadd.f32 %v142_v34, %v51_v31  ;;  %v2625_v39 = vld [vmem:[%s4743_s2] sm:$0xff]  ;;  %v235_v43 = vadd.f32 %v144_v38, %v53_v35  ;;  %v141_v49 = vld [vmem:[%s4741_s0 + $0x2d0] sm:$0xff]  ;;  %v2644_v52 = vadd.f32 %v143_v48, %v52_v46  ;;  %v138_v55 = vld [vmem:[%s4741_s0 + $0x2b8] sm:$0xff] }
  0x1c   :  { %593 = vmatpush.msra.mxu2 %v340_v25  ;;  %2260 = vmatpush.msra.mxu1 %v339_v26  ;;  %v333_v40 = vmax.f32 %v242_v27, 0.0  ;;  %v332_v41 = vmax.f32 %v2608_v28, 0.0  ;;  %v2642_v51 = vld [vmem:[%s4743_s2 + $0x20] sm:$0xff]  ;;  %v232_v53 = vld [vmem:[%s4742_s1 + $0x2d0] sm:$0xff]  ;;  %v229_v60 = vld [vmem:[%s4742_s1 + $0x2b8] sm:$0xff] }
  0x1d   :  { %482 = vmatpush.msra.mxu0 %v331_v36  ;;  %2248 = vmatpush.msra.mxu3 %v331_v36  ;;  %v324_v50 = vmax.f32 %v233_v37, 0.0  ;;  %v326_v57 = vmax.f32 %v235_v43, 0.0  ;;  %v2654_v58 = vadd.f32 %v232_v53, %v141_v49  ;;  %v140_v62 = vld [vmem:[%s4741_s0 + $0x2c8] sm:$0xff]  ;;  %v325_v0 = vmax.f32 %v2644_v52, 0.0  ;;  %v2669_v1 = vld [vmem:[%s4743_s2 + $0x18] sm:$0xff]  ;;  %v131_v11 = vld [vmem:[%s4741_s0 + $0x280] sm:$0xff] }
  0x1e   :  { %594 = vmatpush.msra.mxu2 %v333_v40  ;;  %2261 = vmatpush.msra.mxu1 %v332_v41  ;;  %v231_v63 = vld [vmem:[%s4742_s1 + $0x2c8] sm:$0xff]  ;;  %v320_v3 = vadd.f32 %v229_v60, %v138_v55  ;;  %v134_v6 = vld [vmem:[%s4741_s0 + $0x298] sm:$0xff]  ;;  %v222_v13 = vld [vmem:[%s4742_s1 + $0x280] sm:$0xff] }
  0x1f   :  { %483 = vmatpush.msra.mxu0 %v324_v50  ;;  %2249 = vmatpush.msra.mxu3 %v324_v50  ;;  %v322_v5 = vadd.f32 %v231_v63, %v140_v62  ;;  %v414_v7 = vmax.f32 %v2654_v58, 0.0  ;;  %v225_v9 = vld [vmem:[%s4742_s1 + $0x298] sm:$0xff]  ;;  %v313_v21 = vadd.f32 %v222_v13, %v131_v11  ;;  %v133_v22 = vld [vmem:[%s4741_s0 + $0x290] sm:$0xff]  ;;  %v124_v24 = vld [vmem:[%s4741_s0 + $0x248] sm:$0xff] }
  0x20   :  { %595 = vmatpush.msra.mxu2 %v326_v57  ;;  %2146 = vmatmul.msk.f32.vlgmr.msra.gmra.mxu0 %vm428_vm0, %v2625_v39  ;;  %v411_v14 = vmax.f32 %v320_v3, 0.0  ;;  %v2690_v19 = vadd.f32 %v225_v9, %v134_v6  ;;  %v224_v23 = vld [vmem:[%s4742_s1 + $0x290] sm:$0xff]  ;;  %v215_v27 = vld [vmem:[%s4742_s1 + $0x248] sm:$0xff]  ;;  %v127_v37 = vld [vmem:[%s4741_s0 + $0x260] sm:$0xff] }
  0x21   :  { %2150 = vmatmul.msk.f32.vlgmr.msra.gmra.mxu3 %vm428_vm0, %v2642_v51  ;;  %2262 = vmatpush.msra.mxu1 %v325_v0  ;;  %v413_v16 = vmax.f32 %v322_v5, 0.0  ;;  %v315_v25 = vadd.f32 %v224_v23, %v133_v22  ;;  %v2713_v31 = vld [vmem:[%s4743_s2 + $0x8] sm:$0xff]  ;;  %v404_v35 = vmax.f32 %v313_v21, 0.0  ;;  %v306_v36 = vadd.f32 %v215_v27, %v124_v24  ;;  %v218_v38 = vld [vmem:[%s4742_s1 + $0x260] sm:$0xff]  ;;  %v126_v40 = vld [vmem:[%s4741_s0 + $0x258] sm:$0xff] }
  0x22   :  { %2172 = vmatmul.msk.f32.vlgmr.msra.gmra.mxu2 %vm428_vm0, %v2625_v39  ;;  %2162 = vmatmul.msk.f32.vlgmr.msra.gmra.mxu1 %vm428_vm0, %v2669_v1  ;;  %v407_v34 = vmax.f32 %v2690_v19, 0.0  ;;  %v2727_v46 = vadd.f32 %v218_v38, %v127_v37  ;;  %v217_v48 = vld [vmem:[%s4742_s1 + $0x258] sm:$0xff]  ;;  %v117_v49 = vld [vmem:[%s4741_s0 + $0x210] sm:$0xff]  ;;  %v2741_v8 = vld [vmem:[%s4743_s2 + $0x28] sm:$0xff] }
  0x23   :  { %2263 = vmatpush.msrb.mxu2 %v414_v7  ;;  %639 = vmatpush.msrb.mxu3 %v411_v14  ;;  %v406_v43 = vmax.f32 %v315_v25, 0.0  ;;  %v208_v50 = vld [vmem:[%s4742_s1 + $0x210] sm:$0xff]  ;;  %v308_v53 = vadd.f32 %v217_v48, %v126_v40  ;;  %v119_v57 = vld [vmem:[%s4741_s0 + $0x220] sm:$0xff]  ;;  %v120_v3 = vld [vmem:[%s4741_s0 + $0x228] sm:$0xff] }
  0x24   :  { %751 = vmatpush.msrb.mxu1 %v413_v16  ;;  %527 = vmatpush.msrb.mxu0 %v409_v18  ;;  %v397_v18 = vmax.f32 %v306_v36, 0.0  ;;  %v299_v55 = vadd.f32 %v208_v50, %v117_v49  ;;  %v210_v60 = vld [vmem:[%s4742_s1 + $0x220] sm:$0xff]  ;;  %v400_v62 = vmax.f32 %v2727_v46, 0.0  ;;  %v211_v5 = vld [vmem:[%s4742_s1 + $0x228] sm:$0xff]  ;;  %v110_v6 = vld [vmem:[%s4741_s0 + $0x1d8] sm:$0xff] }
  0x25   :  { %2264 = vmatpush.msrb.mxu2 %v407_v34  ;;  %640 = vmatpush.msrb.mxu3 %v404_v35  ;;  %v301_v63 = vadd.f32 %v210_v60, %v119_v57  ;;  %v399_v9 = vmax.f32 %v308_v53, 0.0  ;;  %v2763_v20 = vadd.f32 %v211_v5, %v120_v3  ;;  %v112_v11 = vld [vmem:[%s4741_s0 + $0x1e8] sm:$0xff]  ;;  %v103_v22 = vld [vmem:[%s4741_s0 + $0x1a0] sm:$0xff]  ;;  %v113_v35 = vld [vmem:[%s4741_s0 + $0x1f0] sm:$0xff] }
  0x26   :  { %528 = vmatpush.msrb.mxu0 %v402_v30  ;;  %752 = vmatpush.msrb.mxu1 %v406_v43  ;;  %v201_v30 = vld [vmem:[%s4742_s1 + $0x1d8] sm:$0xff]  ;;  %v203_v13 = vld [vmem:[%s4742_s1 + $0x1e8] sm:$0xff]  ;;  %v390_v14 = vmax.f32 %v299_v55, 0.0  ;;  %v194_v23 = vld [vmem:[%s4742_s1 + $0x1a0] sm:$0xff] }
  0x27   :  { %641 = vmatpush.msrb.mxu3 %v397_v18  ;;  %2265 = vmatpush.msrb.mxu2 %v400_v62  ;;  %v292_v16 = vadd.f32 %v201_v30, %v110_v6  ;;  %v294_v21 = vadd.f32 %v203_v13, %v112_v11  ;;  %v392_v24 = vmax.f32 %v301_v63, 0.0  ;;  %v393_v25 = vmax.f32 %v2763_v20, 0.0  ;;  %v204_v32 = vld [vmem:[%s4742_s1 + $0x1f0] sm:$0xff]  ;;  %v96_v44 = vld [vmem:[%s4741_s0 + $0x168] sm:$0xff]  ;;  %v106_v53 = vld [vmem:[%s4741_s0 + $0x1b8] sm:$0xff] }
  0x28   :  { %2147 = vmatmul.msk.f32.gmra.mxu0 %vm428_vm0, %v2713_v31  ;;  %v285_v27 = vadd.f32 %v194_v23, %v103_v22  ;;  %753 = vmatpush.msrb.mxu1 %v399_v9  ;;  %v2801_v37 = vadd.f32 %v204_v32, %v113_v35  ;;  %v105_v38 = vld [vmem:[%s4741_s0 + $0x1b0] sm:$0xff]  ;;  %v98_v63 = vld [vmem:[%s4741_s0 + $0x178] sm:$0xff]  ;;  %v139_v17 = vld [vmem:[%s4741_s0 + $0x2c0] sm:$0xff] }
  0x29   :  { %2151 = vmatmul.msk.f32.gmra.mxu3 %vm428_vm0, %v2741_v8  ;;  %529 = vmatpush.msrb.mxu0 %v395_v42  ;;  %v383_v36 = vmax.f32 %v292_v16, 0.0  ;;  %v385_v42 = vmax.f32 %v294_v21, 0.0  ;;  %v196_v43 = vld [vmem:[%s4742_s1 + $0x1b0] sm:$0xff]  ;;  %v189_v5 = vld [vmem:[%s4742_s1 + $0x178] sm:$0xff]  ;;  %v99_v13 = vld [vmem:[%s4741_s0 + $0x180] sm:$0xff] }
  0x2a   :  { %2173 = vmatmul.msk.f32.gmra.mxu2 %vm428_vm0, %v2713_v31  ;;  %2163 = vmatmul.msk.f32.gmra.mxu1 %vm428_vm0, %v2642_v51  ;;  %v376_v40 = vmax.f32 %v285_v27, 0.0  ;;  %v2822_v48 = vld [vmem:[%s4743_s2 + $0x10] sm:$0xff]  ;;  %v287_v49 = vadd.f32 %v196_v43, %v105_v38  ;;  %v386_v56 = vmax.f32 %v2801_v37, 0.0  ;;  %v280_v9 = vadd.f32 %v189_v5, %v98_v63  ;;  %v82_v11 = vld [vmem:[%s4741_s0 + $0xf8] sm:$0xff]  ;;  %v91_v23 = vld [vmem:[%s4741_s0 + $0x140] sm:$0xff] }
  0x2b   :  { %530 = vmatpush.msrb.mxu0 %v388_v54  ;;  %642 = vmatpush.msrb.mxu3 %v390_v14  ;;  %v187_v54 = vld [vmem:[%s4742_s1 + $0x168] sm:$0xff]  ;;  %v2827_v18 = vld [vmem:[%s4743_s2 + $0x30] sm:$0xff]  ;;  %v190_v14 = vld [vmem:[%s4742_s1 + $0x180] sm:$0xff] }
  0x2c   :  { %2266 = vmatpush.msrb.mxu2 %v393_v25  ;;  %754 = vmatpush.msrb.mxu1 %v392_v24  ;;  %v278_v50 = vadd.f32 %v187_v54, %v96_v44  ;;  %v378_v55 = vmax.f32 %v287_v49, 0.0  ;;  %v89_v4 = vld [vmem:[%s4741_s0 + $0x130] sm:$0xff]  ;;  %v371_v33 = vmax.f32 %v280_v9, 0.0  ;;  %v2890_v16 = vld [vmem:[%s4743_s2 + $0x38] sm:$0xff]  ;;  %v2894_v22 = vadd.f32 %v190_v14, %v99_v13  ;;  %v132_v47 = vld [vmem:[%s4741_s0 + $0x288] sm:$0xff] }
  0x2d   :  { %531 = vmatpush.msrb.mxu0 %v381_v2  ;;  %643 = vmatpush.msrb.mxu3 %v383_v36  ;;  %v197_v2 = vld [vmem:[%s4742_s1 + $0x1b8] sm:$0xff]  ;;  %v182_v27 = vld [vmem:[%s4742_s1 + $0x140] sm:$0xff]  ;;  %v125_v38 = vld [vmem:[%s4741_s0 + $0x250] sm:$0xff] }
  0x2e   :  { %755 = vmatpush.msrb.mxu1 %v385_v42  ;;  %v369_v57 = vmax.f32 %v278_v50, 0.0  ;;  %v2840_v60 = vadd.f32 %v197_v2, %v106_v53  ;;  %2267 = vmatpush.msrb.mxu2 %v386_v56  ;;  %v273_v36 = vadd.f32 %v182_v27, %v91_v23  ;;  %v75_v32 = vld [vmem:[%s4741_s0 + $0xc0] sm:$0xff]  ;;  %v216_v61 = vld [vmem:[%s4742_s1 + $0x250] sm:$0xff]  ;;  %v209_v54 = vld [vmem:[%s4742_s1 + $0x218] sm:$0xff] }
  0x2f   :  { %532 = vmatpush.msrb.mxu0 %v374_v15  ;;  %644 = vmatpush.msrb.mxu3 %v376_v40  ;;  %v180_v15 = vld [vmem:[%s4742_s1 + $0x130] sm:$0xff]  ;;  %v166_v42 = vld [vmem:[%s4742_s1 + $0xc0] sm:$0xff]  ;;  %v372_v40 = vmax.f32 %v2894_v22, 0.0  ;;  %v84_v50 = vld [vmem:[%s4741_s0 + $0x108] sm:$0xff] }
  0x30   :  { %2148 = vmatmul.msk.f32.gmra.mxu0 %vm428_vm0, %v2822_v48  ;;  %v271_v3 = vadd.f32 %v180_v15, %v89_v4  ;;  %v379_v6 = vmax.f32 %v2840_v60, 0.0  ;;  %756 = vmatpush.msrb.mxu1 %v378_v55  ;;  %v257_v43 = vadd.f32 %v166_v42, %v75_v32  ;;  %v364_v49 = vmax.f32 %v273_v36, 0.0  ;;  %v175_v53 = vld [vmem:[%s4742_s1 + $0x108] sm:$0xff]  ;;  %v77_v5 = vld [vmem:[%s4741_s0 + $0xd0] sm:$0xff]  ;;  %v111_v28 = vld [vmem:[%s4741_s0 + $0x1e0] sm:$0xff] }
  0x31   :  { %2152 = vmatmul.msk.f32.gmra.mxu3 %vm428_vm0, %v2827_v18  ;;  %533 = vmatpush.msrb.mxu0 %v367_v29  ;;  %v230_v29 = vld [vmem:[%s4742_s1 + $0x2c0] sm:$0xff]  ;;  %v266_v2 = vadd.f32 %v175_v53, %v84_v50  ;;  %v92_v55 = vld [vmem:[%s4741_s0 + $0x148] sm:$0xff]  ;;  %v307_v15 = vadd.f32 %v216_v61, %v125_v38  ;;  %v168_v9 = vld [vmem:[%s4742_s1 + $0xd0] sm:$0xff] }
  0x32   :  { %2174 = vmatmul.msk.f32.gmra.mxu2 %vm428_vm0, %v2822_v48  ;;  %2164 = vmatmul.msk.f32.gmra.mxu1 %vm428_vm0, %v2741_v8  ;;  %v362_v30 = vmax.f32 %v271_v3, 0.0  ;;  %v321_v24 = vadd.f32 %v230_v29, %v139_v17  ;;  %v68_v4 = vld [vmem:[%s4741_s0 + $0x88] sm:$0xff]  ;;  %v2981_v13 = vld [vmem:[%s4743_s2 + $0x40] sm:$0xff]  ;;  %v90_v36 = vld [vmem:[%s4741_s0 + $0x138] sm:$0xff] }
  0x33   :  { %534 = vmatpush.msrb.mxu0 %v360_v45  ;;  %645 = vmatpush.msrb.mxu3 %v369_v57  ;;  %v173_v45 = vld [vmem:[%s4742_s1 + $0xf8] sm:$0xff]  ;;  %v183_v57 = vld [vmem:[%s4742_s1 + $0x148] sm:$0xff]  ;;  %v357_v17 = vmax.f32 %v266_v2, 0.0  ;;  %v83_v42 = vld [vmem:[%s4741_s0 + $0x100] sm:$0xff] }
  0x34   :  { %2268 = vmatpush.msrb.mxu2 %v379_v6  ;;  %v264_v21 = vadd.f32 %v173_v45, %v82_v11  ;;  %757 = vmatpush.msrb.mxu1 %v371_v33  ;;  %v412_v12 = vmax.f32 %v321_v24, 0.0  ;;  %v2956_v63 = vadd.f32 %v183_v57, %v92_v55  ;;  %v159_v3 = vld [vmem:[%s4742_s1 + $0x88] sm:$0xff]  ;;  %v181_v32 = vld [vmem:[%s4742_s1 + $0x138] sm:$0xff]  ;;  %v61_v38 = vld [vmem:[%s4741_s0 + $0x50] sm:$0xff] }
  0x35   :  { %535 = vmatpush.msrb.mxu0 %v353_v59  ;;  %v223_v59 = vld [vmem:[%s4742_s1 + $0x288] sm:$0xff]  ;;  %646 = vmatpush.msrb.mxu3 %v362_v30  ;;  %v250_v29 = vadd.f32 %v159_v3, %v68_v4  ;;  %v259_v30 = vadd.f32 %v168_v9, %v77_v5  ;;  %v152_v61 = vld [vmem:[%s4742_s1 + $0x50] sm:$0xff]  ;;  %v70_v50 = vld [vmem:[%s4741_s0 + $0x98] sm:$0xff] }
  0x36   :  { %v355_v35 = vmax.f32 %v264_v21, 0.0  ;;  %v314_v44 = vadd.f32 %v223_v59, %v132_v47  ;;  %2269 = vmatpush.msrb.mxu2 %v372_v40  ;;  %758 = vmatpush.msrb.mxu1 %v364_v49  ;;  %v365_v45 = vmax.f32 %v2956_v63, 0.0  ;;  %v104_v14 = vld [vmem:[%s4741_s0 + $0x1a8] sm:$0xff]  ;;  %v398_v21 = vmax.f32 %v307_v15, 0.0  ;;  %v97_v47 = vld [vmem:[%s4741_s0 + $0x170] sm:$0xff]  ;;  %v161_v53 = vld [vmem:[%s4742_s1 + $0x98] sm:$0xff] }
  0x37   :  { %536 = vmatpush.msrb.mxu0 %v346_v10  ;;  %v118_v10 = vld [vmem:[%s4741_s0 + $0x218] sm:$0xff]  ;;  %v195_v52 = vld [vmem:[%s4742_s1 + $0x1a8] sm:$0xff]  ;;  %v350_v24 = vmax.f32 %v259_v30, 0.0  ;;  %v188_v59 = vld [vmem:[%s4742_s1 + $0x170] sm:$0xff]  ;;  %v252_v2 = vadd.f32 %v161_v53, %v70_v50  ;;  %v272_v15 = vadd.f32 %v181_v32, %v90_v36 }
  0x38   :  { %2149 = vmatmul.msk.f32.gmra.mxu0 %vm428_vm0, %v2669_v1  ;;  %647 = vmatpush.msrb.mxu3 %v355_v35  ;;  %v405_v11 = vmax.f32 %v314_v44, 0.0  ;;  %v300_v33 = vadd.f32 %v209_v54, %v118_v10  ;;  %v286_v35 = vadd.f32 %v195_v52, %v104_v14  ;;  %v85_v10 = vld [vmem:[%s4741_s0 + $0x110] sm:$0xff]  ;;  %v279_v44 = vadd.f32 %v188_v59, %v97_v47  ;;  %v54_v55 = vld [vmem:[%s4741_s0 + $0x18] sm:$0xff]  ;;  %v3046_v9 = vld [vmem:[%s4743_s2 + $0x48] sm:$0xff] }
  0x39   :  { %2153 = vmatmul.msk.f32.gmra.mxu3 %vm428_vm0, %v2890_v16  ;;  %537 = vmatpush.msrb.mxu0 %v339_v26  ;;  %v348_v26 = vmax.f32 %v257_v43, 0.0  ;;  %v243_v54 = vadd.f32 %v152_v61, %v61_v38  ;;  %v176_v49 = vld [vmem:[%s4742_s1 + $0x110] sm:$0xff]  ;;  %v145_v57 = vld [vmem:[%s4742_s1 + $0x18] sm:$0xff]  ;;  %v56_v38 = vld [vmem:[%s4741_s0 + $0x28] sm:$0xff] }
  0x3a   :  { %2175 = vmatmul.msk.f32.gmra.mxu2 %vm428_vm0, %v2669_v1  ;;  %2165 = vmatmul.msk.f32.gmra.mxu1 %vm428_vm0, %v2827_v18  ;;  %v391_v27 = vmax.f32 %v300_v33, 0.0  ;;  %v377_v4 = vmax.f32 %v286_v35, 0.0  ;;  %v236_v5 = vadd.f32 %v145_v57, %v54_v55  ;;  %v69_v33 = vld [vmem:[%s4741_s0 + $0x90] sm:$0xff]  ;;  %v78_v47 = vld [vmem:[%s4741_s0 + $0xd8] sm:$0xff]  ;;  %v147_v61 = vld [vmem:[%s4742_s1 + $0x28] sm:$0xff] }
  0x3b   :  { %538 = vmatpush.msrb.mxu0 %v332_v41  ;;  %v202_v41 = vld [vmem:[%s4742_s1 + $0x1e0] sm:$0xff]  ;;  %648 = vmatpush.msrb.mxu3 %v348_v26  ;;  %v3035_v26 = vadd.f32 %v176_v49, %v85_v10  ;;  %v334_v3 = vmax.f32 %v243_v54, 0.0  ;;  %v160_v14 = vld [vmem:[%s4742_s1 + $0x90] sm:$0xff]  ;;  %v169_v59 = vld [vmem:[%s4742_s1 + $0xd8] sm:$0xff]  ;;  %v238_v54 = vadd.f32 %v147_v61, %v56_v38 }
  0x3c   :  { %759 = vmatpush.msrb.mxu1 %v357_v17  ;;  %v293_v23 = vadd.f32 %v202_v41, %v111_v28  ;;  %2270 = vmatpush.msrb.mxu2 %v365_v45  ;;  %v76_v28 = vld [vmem:[%s4741_s0 + $0xc8] sm:$0xff]  ;;  %v327_v52 = vmax.f32 %v236_v5, 0.0  ;;  %v251_v36 = vadd.f32 %v160_v14, %v69_v33  ;;  %v3086_v32 = vadd.f32 %v169_v59, %v78_v47  ;;  %v55_v10 = vld [vmem:[%s4741_s0 + $0x20] sm:$0xff]  ;;  %v57_v19 = vld [vmem:[%s4741_s0 + $0x30] sm:$0xff] }
  0x3d   :  { %539 = vmatpush.msrb.mxu0 %v325_v0  ;;  %v341_v0 = vmax.f32 %v250_v29, 0.0  ;;  %v167_v41 = vld [vmem:[%s4742_s1 + $0xc8] sm:$0xff]  ;;  %v358_v17 = vmax.f32 %v3035_v26, 0.0  ;;  %v370_v29 = vmax.f32 %v279_v44, 0.0  ;;  %v162_v5 = vld [vmem:[%s4742_s1 + $0xa0] sm:$0xff] }
  0x3e   :  { %v384_v43 = vmax.f32 %v293_v23, 0.0  ;;  %760 = vmatpush.msrb.mxu1 %v350_v24  ;;  %v62_v23 = vld [vmem:[%s4741_s0 + $0x58] sm:$0xff]  ;;  %v351_v53 = vmax.f32 %v3086_v32, 0.0  ;;  %v342_v55 = vmax.f32 %v251_v36, 0.0  ;;  %v155_v33 = vld [vmem:[%s4742_s1 + $0x68] sm:$0xff] }
  0x3f   :  { %695 = vmatpush.msra.mxu0 %v412_v12  ;;  %649 = vmatpush.msrb.mxu3 %v341_v0  ;;  %v174_v12 = vld [vmem:[%s4742_s1 + $0x100] sm:$0xff]  ;;  %v363_v0 = vmax.f32 %v272_v15, 0.0  ;;  %v153_v24 = vld [vmem:[%s4742_s1 + $0x58] sm:$0xff] }
  0x40   :  { %2159 = vmatmul.msk.f32.vlgmr.msrb.gmra.mxu0 %vm428_vm0, %v2625_v39  ;;  %v265_v30 = vadd.f32 %v174_v12, %v83_v42  ;;  %2271 = vmatpush.msrb.mxu2 %v358_v17  ;;  %v154_v42 = vld [vmem:[%s4742_s1 + $0x60] sm:$0xff]  ;;  %v244_v50 = vadd.f32 %v153_v24, %v62_v23  ;;  %v3107_v12 = vld [vmem:[%s4743_s2 + $0x50] sm:$0xff] }
  0x41   :  { %2154 = vmatmul.msk.f32.gmra.mxu3 %vm428_vm0, %v2981_v13  ;;  %696 = vmatpush.msra.mxu0 %v405_v11  ;;  %v343_v11 = vmax.f32 %v252_v2, 0.0 }
  0x42   :  { %2176 = vmatmul.msk.f32.gmra.mxu2 %vm428_vm0, %v2642_v51  ;;  %2166 = vmatmul.msk.f32.gmra.mxu1 %vm428_vm0, %v2890_v16  ;;  %v356_v35 = vmax.f32 %v265_v30, 0.0  ;;  %v335_v15 = vmax.f32 %v244_v50, 0.0  ;;  %v3126_v30 = vld [vmem:[%s4743_s2 + $0x58] sm:$0xff] }
  0x43   :  { %697 = vmatpush.msra.mxu0 %v398_v21  ;;  %650 = vmatpush.msrb.mxu3 %v334_v3  ;;  %v258_v21 = vadd.f32 %v167_v41, %v76_v28  ;;  %v71_v3 = vld [vmem:[%s4741_s0 + $0xa0] sm:$0xff] }
  0x44   :  { %761 = vmatpush.msrb.mxu1 %v343_v11  ;;  %2272 = vmatpush.msrb.mxu2 %v351_v53  ;;  %v253_v41 = vadd.f32 %v162_v5, %v71_v3  ;;  %v64_v11 = vld [vmem:[%s4741_s0 + $0x68] sm:$0xff] }
  0x45   :  { %698 = vmatpush.msra.mxu0 %v391_v27  ;;  %v63_v27 = vld [vmem:[%s4741_s0 + $0x60] sm:$0xff]  ;;  %651 = vmatpush.msrb.mxu3 %v327_v52  ;;  %v349_v49 = vmax.f32 %v258_v21, 0.0  ;;  %v246_v14 = vadd.f32 %v155_v33, %v64_v11 }
  0x46   :  { %v245_v44 = vadd.f32 %v154_v42, %v63_v27 }
  0x47   :  { %699 = vmatpush.msra.mxu0 %v384_v43  ;;  %v146_v43 = vld [vmem:[%s4742_s1 + $0x20] sm:$0xff]  ;;  %v337_v58 = vmax.f32 %v246_v14, 0.0 }
  0x48   :  { %2160 = vmatmul.msk.f32.gmra.mxu0 %vm428_vm0, %v2713_v31  ;;  %v336_v2 = vmax.f32 %v245_v44, 0.0  ;;  %v237_v57 = vadd.f32 %v146_v43, %v55_v10 }
  0x49   :  { %2155 = vmatmul.msk.f32.gmra.mxu3 %vm428_vm0, %v3046_v9  ;;  %700 = vmatpush.msra.mxu0 %v377_v4  ;;  %v329_v4 = vmax.f32 %v238_v54, 0.0 }
  0x4a   :  { %2177 = vmatmul.msk.f32.gmra.mxu2 %vm428_vm0, %v2741_v8  ;;  %2167 = vmatmul.msk.f32.gmra.mxu1 %vm428_vm0, %v2981_v13  ;;  %v328_v28 = vmax.f32 %v237_v57, 0.0 }
  0x4b   :  { %701 = vmatpush.msra.mxu0 %v370_v29  ;;  %762 = vmatpush.msrb.mxu1 %v336_v2  ;;  %v344_v29 = vmax.f32 %v253_v41, 0.0 }
  0x4d   :  { %702 = vmatpush.msra.mxu0 %v363_v0  ;;  %763 = vmatpush.msrb.mxu1 %v329_v4 }
  0x4e   :  { %2273 = vmatpush.msrb.mxu2 %v344_v29 }
  0x4f   :  { %703 = vmatpush.msra.mxu0 %v356_v35 }
  0x50   :  { %2161 = vmatmul.msk.f32.gmra.mxu0 %vm428_vm0, %v2822_v48  ;;  %2274 = vmatpush.msrb.mxu2 %v337_v58 }
  0x51   :  { %2156 = vmatmul.msk.f32.gmra.mxu3 %vm428_vm0, %v3107_v12  ;;  %704 = vmatpush.msra.mxu0 %v349_v49 }
  0x52   :  { %2178 = vmatmul.msk.f32.gmra.mxu2 %vm428_vm0, %v2827_v18  ;;  %2168 = vmatmul.msk.f32.gmra.mxu1 %vm428_vm0, %v3046_v9 }
  0x53   :  { %705 = vmatpush.msra.mxu0 %v342_v55 }
  0x55   :  { %706 = vmatpush.msra.mxu0 %v335_v15 }
  0x57   :  { %707 = vmatpush.msra.mxu0 %v328_v28 }
  0x58   :  { %2198 = vmatmul.msk.f32.vlgmr.msra.gmra.mxu0 %vm428_vm0, %v2625_v39 }
  0x59   :  { %2157 = vmatmul.msk.f32.gmra.mxu3 %vm428_vm0, %v3126_v30  ;;  %807 = vmatpush.msrb.mxu0 %v414_v7  ;;  %v3151_v7 = vld [vmem:[%s4743_s2 + $0x60] sm:$0xff] }
  0x5a   :  { %2179 = vmatmul.msk.f32.gmra.mxu2 %vm428_vm0, %v2890_v16  ;;  %2169 = vmatmul.msk.f32.gmra.mxu1 %vm428_vm0, %v3107_v12 }
  0x5b   :  { %808 = vmatpush.msrb.mxu0 %v407_v34  ;;  %v148_v34 = vld [vmem:[%s4742_s1 + $0x30] sm:$0xff] }
  0x5c   :  { %v239_v46 = vadd.f32 %v148_v34, %v57_v19 }
  0x5d   :  { %809 = vmatpush.msrb.mxu0 %v400_v62 }
  0x5e   :  { %v330_v62 = vmax.f32 %v239_v46, 0.0 }
  0x5f   :  { %810 = vmatpush.msrb.mxu0 %v393_v25 }
  0x60   :  { %2199 = vmatmul.msk.f32.gmra.mxu0 %vm428_vm0, %v2713_v31  ;;  %2275 = vmatpush.msrb.mxu2 %v330_v62 }
  0x61   :  { %2158 = vmatmul.msk.f32.gmra.mxu3 %vm428_vm0, %v3151_v7  ;;  %811 = vmatpush.msrb.mxu0 %v386_v56 }
  0x62   :  { %2180 = vmatmul.msk.f32.gmra.mxu2 %vm428_vm0, %v2981_v13  ;;  %2170 = vmatmul.msk.f32.gmra.mxu1 %vm428_vm0, %v3126_v30 }
  0x63   :  { %812 = vmatpush.msrb.mxu0 %v379_v6 }
  0x65   :  { %813 = vmatpush.msrb.mxu0 %v372_v40 }
  0x67   :  { %814 = vmatpush.msrb.mxu0 %v365_v45 }
  0x68   :  { %2200 = vmatmul.msk.f32.gmra.mxu0 %vm428_vm0, %v2822_v48 }
  0x69   :  { %2185 = vmatmul.msk.f32.vlgmr.msrb.gmra.mxu3 %vm428_vm0, %v2625_v39  ;;  %815 = vmatpush.msrb.mxu0 %v358_v17 }
  0x6a   :  { %2181 = vmatmul.msk.f32.gmra.mxu2 %vm428_vm0, %v3046_v9  ;;  %2171 = vmatmul.msk.f32.gmra.mxu1 %vm428_vm0, %v3151_v7 }
  0x6b   :  { %816 = vmatpush.msrb.mxu0 %v351_v53 }
  0x6d   :  { %817 = vmatpush.msrb.mxu0 %v344_v29 }
  0x6f   :  { %818 = vmatpush.msrb.mxu0 %v337_v58 }
  0x70   :  { %2201 = vmatmul.msk.f32.gmra.mxu0 %vm428_vm0, %v2669_v1 }
  0x71   :  { %2186 = vmatmul.msk.f32.gmra.mxu3 %vm428_vm0, %v2713_v31  ;;  %819 = vmatpush.msrb.mxu0 %v330_v62 }
  0x72   :  { %2182 = vmatmul.msk.f32.gmra.mxu2 %vm428_vm0, %v3107_v12  ;;  %2211 = vmatmul.msk.f32.vlgmr.msrb.gmra.mxu1 %vm428_vm0, %v2625_v39 }
  0x78   :  { %2202 = vmatmul.msk.f32.gmra.mxu0 %vm428_vm0, %v2642_v51 }
  0x79   :  { %2187 = vmatmul.msk.f32.gmra.mxu3 %vm428_vm0, %v2822_v48 }
  0x7a   :  { %2183 = vmatmul.msk.f32.gmra.mxu2 %vm428_vm0, %v3126_v30  ;;  %2212 = vmatmul.msk.f32.gmra.mxu1 %vm428_vm0, %v2713_v31 }
  0x80   :  { %2203 = vmatmul.msk.f32.gmra.mxu0 %vm428_vm0, %v2741_v8 }
  0x81   :  { %2188 = vmatmul.msk.f32.gmra.mxu3 %vm428_vm0, %v2669_v1 }
  0x82   :  { %2184 = vmatmul.msk.f32.gmra.mxu2 %vm428_vm0, %v3151_v7  ;;  %2213 = vmatmul.msk.f32.gmra.mxu1 %vm428_vm0, %v2822_v48 }
  0x88   :  { %2204 = vmatmul.msk.f32.gmra.mxu0 %vm428_vm0, %v2827_v18 }
  0x89   :  { %2189 = vmatmul.msk.f32.gmra.mxu3 %vm428_vm0, %v2642_v51 }
  0x8a   :  { %2227 = vmatmul.msk.f32.vlgmr.msrb.gmra.mxu2 %vm428_vm0, %v2669_v1  ;;  %2214 = vmatmul.msk.f32.gmra.mxu1 %vm428_vm0, %v2669_v1 }
  0x90   :  { %2205 = vmatmul.msk.f32.gmra.mxu0 %vm428_vm0, %v2890_v16 }
  0x91   :  { %2190 = vmatmul.msk.f32.gmra.mxu3 %vm428_vm0, %v2741_v8 }
  0x92   :  { %2228 = vmatmul.msk.f32.gmra.mxu2 %vm428_vm0, %v2642_v51  ;;  %2215 = vmatmul.msk.f32.gmra.mxu1 %vm428_vm0, %v2642_v51 }
  0x98   :  { %2206 = vmatmul.msk.f32.gmra.mxu0 %vm428_vm0, %v2981_v13 }
  0x99   :  { %2191 = vmatmul.msk.f32.gmra.mxu3 %vm428_vm0, %v2827_v18 }
  0x9a   :  { %2229 = vmatmul.msk.f32.gmra.mxu2 %vm428_vm0, %v2741_v8  ;;  %2216 = vmatmul.msk.f32.gmra.mxu1 %vm428_vm0, %v2741_v8 }
  0x9d   :  { %v3235_v1 = vpop.f32.mrf.mxu0 }
  0x9e   :  { %863 = vst [vmem:[%s4744_s5] sm:$0xff] %v3235_v1  ;;  %v1125_v61 = vmul.f32 %v3235_v1, %v3235_v1 }
  0x9f   :  { %v550_v51 = vpop.f32.mrf.mxu1 }
  0xa0   :  { %886 = vst [vmem:[%s4744_s5 + $0xb0] sm:$0xff] %v550_v51  ;;  %2207 = vmatmul.msk.f32.gmra.mxu0 %vm428_vm0, %v3046_v9  ;;  %v1147_v24 = vmul.f32 %v550_v51, %v550_v51 }
  0xa1   :  { %2192 = vmatmul.msk.f32.gmra.mxu3 %vm428_vm0, %v2890_v16 }
  0xa2   :  { %2230 = vmatmul.msk.f32.gmra.mxu2 %vm428_vm0, %v2827_v18  ;;  %2217 = vmatmul.msk.f32.gmra.mxu1 %vm428_vm0, %v2827_v18 }
  0xa4   :  { %v497_v8 = vpop.f32.mrf.mxu3 }
  0xa5   :  { %892 = vst [vmem:[%s4744_s5 + $0xe0] sm:$0xff] %v497_v8  ;;  %v3255_v20 = vpop.f32.mrf.mxu2  ;;  %v3257_v25 = vpop.f32.mrf.mxu0  ;;  %v1153_v37 = vmul.f32 %v497_v8, %v497_v8 }
  0xa6   :  { %865 = vst [vmem:[%s4744_s5 + $0x10] sm:$0xff] %v3255_v20  ;;  %v1127_v53 = vmul.f32 %v3255_v20, %v3255_v20  ;;  %v1132_v29 = vmul.f32 %v3257_v25, %v3257_v25 }
  0xa7   :  { %871 = vst [vmem:[%s4744_s5 + $0x38] sm:$0xff] %v3257_v25  ;;  %v553_v18 = vpop.f32.mrf.mxu1 }
  0xa8   :  { %893 = vst [vmem:[%s4744_s5 + $0xe8] sm:$0xff] %v553_v18  ;;  %v3270_v56 = vadd.f32 %v553_v18, %v497_v8  ;;  %v1154_v60 = vmul.f32 %v553_v18, %v553_v18  ;;  %2208 = vmatmul.msk.f32.gmra.mxu0 %vm428_vm0, %v3107_v12 }
  0xa9   :  { %2193 = vmatmul.msk.f32.gmra.mxu3 %vm428_vm0, %v2981_v13 }
  0xaa   :  { %v3276_v6 = vadd.f32 %v1154_v60, %v1153_v37  ;;  %2231 = vmatmul.msk.f32.gmra.mxu2 %vm428_vm0, %v2890_v16  ;;  %2218 = vmatmul.msk.f32.gmra.mxu1 %vm428_vm0, %v2890_v16 }
  0xac   :  { %v500_v22 = vpop.f32.mrf.mxu3 }
  0xad   :  { %899 = vst [vmem:[%s4744_s5 + $0x118] sm:$0xff] %v500_v22  ;;  %v3285_v40 = vpop.f32.mrf.mxu2  ;;  %v3287_v63 = vpop.f32.mrf.mxu0  ;;  %v1160_v45 = vmul.f32 %v500_v22, %v500_v22 }
  0xae   :  { %873 = vst [vmem:[%s4744_s5 + $0x48] sm:$0xff] %v3285_v40  ;;  %v1134_v34 = vmul.f32 %v3285_v40, %v3285_v40 }
  0xaf   :  { %878 = vst [vmem:[%s4744_s5 + $0x70] sm:$0xff] %v3287_v63  ;;  %v556_v16 = vpop.f32.mrf.mxu1 }
  0xb0   :  { %900 = vst [vmem:[%s4744_s5 + $0x120] sm:$0xff] %v556_v16  ;;  %v3300_v26 = vadd.f32 %v556_v16, %v500_v22  ;;  %v1161_v17 = vmul.f32 %v556_v16, %v556_v16  ;;  %2209 = vmatmul.msk.f32.gmra.mxu0 %vm428_vm0, %v3126_v30 }
  0xb1   :  { %2194 = vmatmul.msk.f32.gmra.mxu3 %vm428_vm0, %v3046_v9 }
  0xb2   :  { %v3306_v52 = vadd.f32 %v1161_v17, %v1160_v45  ;;  %2232 = vmatmul.msk.f32.gmra.mxu2 %vm428_vm0, %v2981_v13  ;;  %2219 = vmatmul.msk.f32.gmra.mxu1 %vm428_vm0, %v2981_v13 }
  0xb4   :  { %v503_v0 = vpop.f32.mrf.mxu3 }
  0xb5   :  { %906 = vst [vmem:[%s4744_s5 + $0x150] sm:$0xff] %v503_v0  ;;  %v3315_v21 = vpop.f32.mrf.mxu2  ;;  %v494_v23 = vpop.f32.mrf.mxu0  ;;  %v1167_v47 = vmul.f32 %v503_v0, %v503_v0 }
  0xb6   :  { %880 = vst [vmem:[%s4744_s5 + $0x80] sm:$0xff] %v3315_v21  ;;  %v995_v59 = vadd.f32 %v550_v51, %v494_v23  ;;  %v1146_v27 = vmul.f32 %v494_v23, %v494_v23  ;;  %v1141_v16 = vmul.f32 %v3315_v21, %v3315_v21 }
  0xb7   :  { %885 = vst [vmem:[%s4744_s5 + $0xa8] sm:$0xff] %v494_v23  ;;  %v559_v13 = vpop.f32.mrf.mxu1 }
  0xb8   :  { %v1243_v35 = vadd.f32 %v1147_v24, %v1146_v27  ;;  %907 = vst [vmem:[%s4744_s5 + $0x158] sm:$0xff] %v559_v13  ;;  %v3327_v36 = vadd.f32 %v559_v13, %v503_v0  ;;  %v1168_v32 = vmul.f32 %v559_v13, %v559_v13  ;;  %2210 = vmatmul.msk.f32.gmra.mxu0 %vm428_vm0, %v3151_v7 }
  0xb9   :  { %2195 = vmatmul.msk.f32.gmra.mxu3 %vm428_vm0, %v3107_v12 }
  0xba   :  { %v3333_v42 = vadd.f32 %v1168_v32, %v1167_v47  ;;  %2233 = vmatmul.msk.f32.gmra.mxu2 %vm428_vm0, %v3046_v9  ;;  %2220 = vmatmul.msk.f32.gmra.mxu1 %vm428_vm0, %v3046_v9 }
  0xbc   :  { %v506_v38 = vpop.f32.mrf.mxu3 }
  0xbd   :  { %913 = vst [vmem:[%s4744_s5 + $0x188] sm:$0xff] %v506_v38  ;;  %v1174_v10 = vmul.f32 %v506_v38, %v506_v38  ;;  %v606_v43 = vpop.f32.mrf.mxu2  ;;  %v541_v44 = vpop.f32.mrf.mxu0 }
  0xbe   :  { %887 = vst [vmem:[%s4744_s5 + $0xb8] sm:$0xff] %v606_v43  ;;  %v3347_v54 = vadd.f32 %v995_v59, %v606_v43  ;;  %v1148_v49 = vmul.f32 %v606_v43, %v606_v43  ;;  %v968_v9 = vadd.f32 %v541_v44, %v3235_v1  ;;  %v1126_v50 = vmul.f32 %v541_v44, %v541_v44 }
  0xbf   :  { %864 = vst [vmem:[%s4744_s5 + $0x8] sm:$0xff] %v541_v44  ;;  %v562_v2 = vpop.f32.mrf.mxu1 }
  0xc0   :  { %v3355_v55 = vadd.f32 %v1243_v35, %v1148_v49  ;;  %v1216_v57 = vadd.f32 %v1126_v50, %v1125_v61  ;;  %914 = vst [vmem:[%s4744_s5 + $0x190] sm:$0xff] %v562_v2  ;;  %v3360_v4 = vadd.f32 %v562_v2, %v506_v38  ;;  %v1175_v15 = vmul.f32 %v562_v2, %v562_v2 }
  0xc1   :  { %2196 = vmatmul.msk.f32.gmra.mxu3 %vm428_vm0, %v3126_v30  ;;  %2224 = vmatmul.msk.f32.vlgmr.msrb.gmra.mxu0 %vm428_vm0, %v2625_v39  ;;  %v3367_v3 = vadd.f32 %v968_v9, %v3255_v20 }
  0xc2   :  { %v3369_v5 = vadd.f32 %v1175_v15, %v1174_v10  ;;  %2234 = vmatmul.msk.f32.gmra.mxu2 %vm428_vm0, %v3107_v12  ;;  %2221 = vmatmul.msk.f32.gmra.mxu1 %vm428_vm0, %v3107_v12  ;;  %v3375_v28 = vadd.f32 %v1216_v57, %v1127_v53 }
  0xc4   :  { %v509_v41 = vpop.f32.mrf.mxu3 }
  0xc5   :  { %920 = vst [vmem:[%s4744_s5 + $0x1c0] sm:$0xff] %v509_v41  ;;  %v1181_v39 = vmul.f32 %v509_v41, %v509_v41  ;;  %v609_v11 = vpop.f32.mrf.mxu2  ;;  %v544_v33 = vpop.f32.mrf.mxu0 }
  0xc6   :  { %894 = vst [vmem:[%s4744_s5 + $0xf0] sm:$0xff] %v609_v11  ;;  %v3386_v14 = vadd.f32 %v3270_v56, %v609_v11  ;;  %v1155_v12 = vmul.f32 %v609_v11, %v609_v11  ;;  %v977_v58 = vadd.f32 %v544_v33, %v3257_v25  ;;  %v1133_v19 = vmul.f32 %v544_v33, %v544_v33 }
  0xc7   :  { %872 = vst [vmem:[%s4744_s5 + $0x40] sm:$0xff] %v544_v33  ;;  %v565_v46 = vpop.f32.mrf.mxu1  ;;  %v1139_v56 = vmul.f32 %v3287_v63, %v3287_v63 }
  0xc8   :  { %v3395_v62 = vadd.f32 %v3276_v6, %v1155_v12  ;;  %v1225_v1 = vadd.f32 %v1133_v19, %v1132_v29  ;;  %921 = vst [vmem:[%s4744_s5 + $0x1c8] sm:$0xff] %v565_v46  ;;  %v3400_v51 = vadd.f32 %v565_v46, %v509_v41  ;;  %v1182_v8 = vmul.f32 %v565_v46, %v565_v46 }
  0xc9   :  { %2197 = vmatmul.msk.f32.gmra.mxu3 %vm428_vm0, %v3151_v7  ;;  %2225 = vmatmul.msk.f32.gmra.mxu0 %vm428_vm0, %v2713_v31  ;;  %v3407_v20 = vadd.f32 %v977_v58, %v3285_v40 }
  0xca   :  { %v3409_v25 = vadd.f32 %v1182_v8, %v1181_v39  ;;  %2235 = vmatmul.msk.f32.gmra.mxu2 %vm428_vm0, %v3126_v30  ;;  %2222 = vmatmul.msk.f32.gmra.mxu1 %vm428_vm0, %v3126_v30  ;;  %v3415_v37 = vadd.f32 %v1225_v1, %v1134_v34 }
  0xcc   :  { %v512_v18 = vpop.f32.mrf.mxu3 }
  0xcd   :  { %927 = vst [vmem:[%s4744_s5 + $0x1f8] sm:$0xff] %v512_v18  ;;  %v1188_v31 = vmul.f32 %v512_v18, %v512_v18  ;;  %v612_v60 = vpop.f32.mrf.mxu2  ;;  %v547_v6 = vpop.f32.mrf.mxu0 }
  0xce   :  { %901 = vst [vmem:[%s4744_s5 + $0x128] sm:$0xff] %v612_v60  ;;  %v3426_v22 = vadd.f32 %v3300_v26, %v612_v60  ;;  %v1162_v30 = vmul.f32 %v612_v60, %v612_v60  ;;  %v986_v40 = vadd.f32 %v547_v6, %v3287_v63  ;;  %v1140_v45 = vmul.f32 %v547_v6, %v547_v6 }
  0xcf   :  { %879 = vst [vmem:[%s4744_s5 + $0x78] sm:$0xff] %v547_v6  ;;  %v568_v17 = vpop.f32.mrf.mxu1 }
  0xd0   :  { %v3435_v0 = vadd.f32 %v3306_v52, %v1162_v30  ;;  %v1234_v23 = vadd.f32 %v1140_v45, %v1139_v56  ;;  %928 = vst [vmem:[%s4744_s5 + $0x200] sm:$0xff] %v568_v17  ;;  %v1049_v26 = vadd.f32 %v568_v17, %v512_v18  ;;  %v1189_v24 = vmul.f32 %v568_v17, %v568_v17 }
  0xd1   :  { %2226 = vmatmul.msk.f32.gmra.mxu0 %vm428_vm0, %v2822_v48  ;;  %v3443_v63 = vadd.f32 %v986_v40, %v3315_v21 }
  0xd2   :  { %v3445_v47 = vadd.f32 %v1189_v24, %v1188_v31  ;;  %2236 = vmatmul.msk.f32.gmra.mxu2 %vm428_vm0, %v3151_v7  ;;  %2223 = vmatmul.msk.f32.gmra.mxu1 %vm428_vm0, %v3151_v7  ;;  %v3451_v52 = vadd.f32 %v1234_v23, %v1141_v16 }
  0xd4   :  { %v515_v59 = vpop.f32.mrf.mxu3 }
  0xd5   :  { %934 = vst [vmem:[%s4744_s5 + $0x230] sm:$0xff] %v515_v59  ;;  %v615_v27 = vpop.f32.mrf.mxu2  ;;  %v709_v48 = vpop.f32.mrf.mxu0  ;;  %v1195_v13 = vmul.f32 %v515_v59, %v515_v59 }
  0xd6   :  { %908 = vst [vmem:[%s4744_s5 + $0x160] sm:$0xff] %v615_v27  ;;  %v3460_v21 = vadd.f32 %v3327_v36, %v615_v27  ;;  %v1169_v35 = vmul.f32 %v615_v27, %v615_v27  ;;  %v1129_v31 = vmul.f32 %v709_v48, %v709_v48 }
  0xd7   :  { %867 = vst [vmem:[%s4744_s5 + $0x20] sm:$0xff] %v709_v48  ;;  %v571_v7 = vpop.f32.mrf.mxu1 }
  0xd8   :  { %v3466_v32 = vadd.f32 %v3333_v42, %v1169_v35  ;;  %935 = vst [vmem:[%s4744_s5 + $0x238] sm:$0xff] %v571_v7  ;;  %v1058_v38 = vadd.f32 %v571_v7, %v515_v59  ;;  %v1196_v61 = vmul.f32 %v571_v7, %v571_v7 }
  0xda   :  { %v3471_v10 = vadd.f32 %v1196_v61, %v1195_v13 }
  0xdc   :  { %v518_v43 = vpop.f32.mrf.mxu3 }
  0xdd   :  { %941 = vst [vmem:[%s4744_s5 + $0x268] sm:$0xff] %v518_v43  ;;  %v618_v36 = vpop.f32.mrf.mxu2  ;;  %v712_v44 = vpop.f32.mrf.mxu0  ;;  %v1202_v49 = vmul.f32 %v518_v43, %v518_v43 }
  0xde   :  { %915 = vst [vmem:[%s4744_s5 + $0x198] sm:$0xff] %v618_v36  ;;  %v3480_v42 = vadd.f32 %v3360_v4, %v618_v36  ;;  %v1176_v9 = vmul.f32 %v618_v36, %v618_v36 }
  0xdf   :  { %875 = vst [vmem:[%s4744_s5 + $0x58] sm:$0xff] %v712_v44  ;;  %v574_v50 = vpop.f32.mrf.mxu1 }
  0xe0   :  { %v3486_v53 = vadd.f32 %v3369_v5, %v1176_v9  ;;  %942 = vst [vmem:[%s4744_s5 + $0x270] sm:$0xff] %v574_v50  ;;  %v3491_v2 = vadd.f32 %v574_v50, %v518_v43  ;;  %v1203_v57 = vmul.f32 %v574_v50, %v574_v50 }
  0xe2   :  { %v3493_v15 = vadd.f32 %v1203_v57, %v1202_v49 }
  0xe4   :  { %v521_v4 = vpop.f32.mrf.mxu3 }
  0xe5   :  { %948 = vst [vmem:[%s4744_s5 + $0x2a0] sm:$0xff] %v521_v4  ;;  %v621_v41 = vpop.f32.mrf.mxu2  ;;  %v3498_v29 = vpop.f32.mrf.mxu0  ;;  %v1209_v39 = vmul.f32 %v521_v4, %v521_v4 }
  0xe6   :  { %922 = vst [vmem:[%s4744_s5 + $0x1d0] sm:$0xff] %v621_v41  ;;  %v3504_v5 = vadd.f32 %v3400_v51, %v621_v41  ;;  %v1183_v11 = vmul.f32 %v621_v41, %v621_v41 }
  0xe7   :  { %882 = vst [vmem:[%s4744_s5 + $0x90] sm:$0xff] %v3498_v29  ;;  %v577_v33 = vpop.f32.mrf.mxu1 }
  0xe8   :  { %v3511_v12 = vadd.f32 %v3409_v25, %v1183_v11  ;;  %949 = vst [vmem:[%s4744_s5 + $0x2a8] sm:$0xff] %v577_v33  ;;  %v3516_v58 = vadd.f32 %v577_v33, %v521_v4  ;;  %v1210_v19 = vmul.f32 %v577_v33, %v577_v33  ;;  %v1143_v4 = vmul.f32 %v3498_v29, %v3498_v29 }
  0xea   :  { %v3518_v34 = vadd.f32 %v1210_v19, %v1209_v39 }
  0xec   :  { %v653_v46 = vpop.f32.mrf.mxu3 }
  0xed   :  { %v624_v1 = vpop.f32.mrf.mxu2  ;;  %866 = vst [vmem:[%s4744_s5 + $0x18] sm:$0xff] %v653_v46  ;;  %v970_v51 = vadd.f32 %v3367_v3, %v653_v46  ;;  %v1128_v8 = vmul.f32 %v653_v46, %v653_v46  ;;  %v3524_v25 = vpop.f32.mrf.mxu0 }
  0xee   :  { %929 = vst [vmem:[%s4744_s5 + $0x208] sm:$0xff] %v624_v1  ;;  %v3529_v18 = vadd.f32 %v1049_v26, %v624_v1  ;;  %v1190_v56 = vmul.f32 %v624_v1, %v624_v1 }
  0xef   :  { %v1218_v60 = vadd.f32 %v3375_v28, %v1128_v8  ;;  %889 = vst [vmem:[%s4744_s5 + $0xc8] sm:$0xff] %v3524_v25  ;;  %v765_v6 = vpop.f32.mrf.mxu1  ;;  %v971_v3 = vadd.f32 %v970_v51, %v709_v48  ;;  %v1136_v48 = vmul.f32 %v712_v44, %v712_v44 }
  0xf0   :  { %v3537_v30 = vadd.f32 %v3445_v47, %v1190_v56  ;;  %868 = vst [vmem:[%s4744_s5 + $0x28] sm:$0xff] %v765_v6  ;;  %v1130_v40 = vmul.f32 %v765_v6, %v765_v6 }
  0xf1   :  { %v1219_v45 = vadd.f32 %v1218_v60, %v1129_v31  ;;  %v3542_v16 = vadd.f32 %v971_v3, %v765_v6 }
  0xf3   :  { %v3544_v17 = vadd.f32 %v1219_v45, %v1130_v40 }
  0xf4   :  { %v656_v28 = vpop.f32.mrf.mxu3 }
  0xf5   :  { %v627_v23 = vpop.f32.mrf.mxu2  ;;  %874 = vst [vmem:[%s4744_s5 + $0x50] sm:$0xff] %v656_v28  ;;  %v979_v26 = vadd.f32 %v3407_v20, %v656_v28  ;;  %v1135_v24 = vmul.f32 %v656_v28, %v656_v28  ;;  %v3550_v47 = vpop.f32.mrf.mxu0 }
  0xf6   :  { %936 = vst [vmem:[%s4744_s5 + $0x240] sm:$0xff] %v627_v23  ;;  %v3555_v59 = vadd.f32 %v1058_v38, %v627_v23  ;;  %v1197_v27 = vmul.f32 %v627_v23, %v627_v23 }
  0xf7   :  { %v1227_v13 = vadd.f32 %v3415_v37, %v1135_v24  ;;  %896 = vst [vmem:[%s4744_s5 + $0x100] sm:$0xff] %v3550_v47  ;;  %v768_v35 = vpop.f32.mrf.mxu1  ;;  %v980_v20 = vadd.f32 %v979_v26, %v712_v44 }
  0xf8   :  { %v3563_v7 = vadd.f32 %v3471_v10, %v1197_v27  ;;  %876 = vst [vmem:[%s4744_s5 + $0x60] sm:$0xff] %v768_v35  ;;  %v1137_v38 = vmul.f32 %v768_v35, %v768_v35 }
  0xf9   :  { %v1228_v61 = vadd.f32 %v1227_v13, %v1136_v48  ;;  %v3568_v43 = vadd.f32 %v980_v20, %v768_v35 }
  0xfb   :  { %v3570_v36 = vadd.f32 %v1228_v61, %v1137_v38 }
  0xfc   :  { %v659_v37 = vpop.f32.mrf.mxu3 }
  0xfd   :  { %v630_v49 = vpop.f32.mrf.mxu2  ;;  %881 = vst [vmem:[%s4744_s5 + $0x88] sm:$0xff] %v659_v37  ;;  %v988_v44 = vadd.f32 %v3443_v63, %v659_v37  ;;  %v1142_v10 = vmul.f32 %v659_v37, %v659_v37  ;;  %v3576_v9 = vpop.f32.mrf.mxu0 }
  0xfe   :  { %943 = vst [vmem:[%s4744_s5 + $0x278] sm:$0xff] %v630_v49  ;;  %v3582_v50 = vadd.f32 %v3491_v2, %v630_v49  ;;  %v1204_v57 = vmul.f32 %v630_v49, %v630_v49 }
  0xff   :  { %v1236_v41 = vadd.f32 %v3451_v52, %v1142_v10  ;;  %903 = vst [vmem:[%s4744_s5 + $0x138] sm:$0xff] %v3576_v9  ;;  %v771_v63 = vpop.f32.mrf.mxu1  ;;  %v989_v39 = vadd.f32 %v988_v44, %v3498_v29 }
 0x100   :  { %v3593_v11 = vadd.f32 %v3493_v15, %v1204_v57  ;;  %883 = vst [vmem:[%s4744_s5 + $0x98] sm:$0xff] %v771_v63  ;;  %v1144_v2 = vmul.f32 %v771_v63, %v771_v63 }
 0x101   :  { %v3598_v33 = vadd.f32 %v989_v39, %v771_v63  ;;  %v1237_v19 = vadd.f32 %v1236_v41, %v1143_v4 }
 0x103   :  { %v3600_v52 = vadd.f32 %v1237_v19, %v1144_v2  ;;  %v1164_v2 = vmul.f32 %v3576_v9, %v3576_v9 }
 0x104   :  { %v662_v46 = vpop.f32.mrf.mxu3 }
 0x105   :  { %v633_v1 = vpop.f32.mrf.mxu2  ;;  %888 = vst [vmem:[%s4744_s5 + $0xc0] sm:$0xff] %v662_v46  ;;  %v997_v29 = vadd.f32 %v3347_v54, %v662_v46  ;;  %v3606_v15 = vpop.f32.mrf.mxu0  ;;  %v1149_v54 = vmul.f32 %v662_v46, %v662_v46 }
 0x106   :  { %950 = vst [vmem:[%s4744_s5 + $0x2b0] sm:$0xff] %v633_v1  ;;  %v3612_v51 = vadd.f32 %v3516_v58, %v633_v1  ;;  %v1211_v8 = vmul.f32 %v633_v1, %v633_v1 }
 0x107   :  { %910 = vst [vmem:[%s4744_s5 + $0x170] sm:$0xff] %v3606_v15  ;;  %v774_v56 = vpop.f32.mrf.mxu1  ;;  %v998_v60 = vadd.f32 %v997_v29, %v3524_v25  ;;  %v1245_v6 = vadd.f32 %v3355_v55, %v1149_v54  ;;  %v1150_v55 = vmul.f32 %v3524_v25, %v3524_v25 }
 0x108   :  { %v3619_v31 = vadd.f32 %v3518_v34, %v1211_v8  ;;  %890 = vst [vmem:[%s4744_s5 + $0xd0] sm:$0xff] %v774_v56  ;;  %v1151_v24 = vmul.f32 %v774_v56, %v774_v56 }
 0x109   :  { %v999_v45 = vadd.f32 %v998_v60, %v774_v56  ;;  %v1246_v48 = vadd.f32 %v1245_v6, %v1150_v55 }
 0x10b   :  { %v1247_v49 = vadd.f32 %v1246_v48, %v1151_v24 }
 0x10c   :  { %v665_v58 = vpop.f32.mrf.mxu3 }
 0x10d   :  { %895 = vst [vmem:[%s4744_s5 + $0xf8] sm:$0xff] %v665_v58  ;;  %v1006_v3 = vadd.f32 %v3386_v14, %v665_v58  ;;  %v830_v40 = vpop.f32.mrf.mxu2  ;;  %v3630_v34 = vpop.f32.mrf.mxu0  ;;  %v1156_v27 = vmul.f32 %v665_v58, %v665_v58 }
 0x10e   :  { %891 = vst.msk [vmem:[%s4744_s5 + $0xd8] sm:$0xff] %vm869_vm1, %v830_v40  ;;  %v1000_v28 = vsel %vm869_vm1, %v830_v40, 0.0  ;;  %v1152_v26 = vmul.f32 %v830_v40, %v830_v40 }
 0x10f   :  { %917 = vst [vmem:[%s4744_s5 + $0x1a8] sm:$0xff] %v3630_v34  ;;  %v777_v14 = vpop.f32.mrf.mxu1  ;;  %v1001_v23 = vadd.f32 %v1000_v28, %v999_v45  ;;  %v1007_v13 = vadd.f32 %v1006_v3, %v3550_v47  ;;  %v1254_v20 = vadd.f32 %v3395_v62, %v1156_v27  ;;  %v1157_v62 = vmul.f32 %v3550_v47, %v3550_v47 }
 0x110   :  { %897 = vst [vmem:[%s4744_s5 + $0x108] sm:$0xff] %v777_v14  ;;  %v1248_v25 = vsel %vm869_vm1, %v1152_v26, 0.0  ;;  %v1158_v19 = vmul.f32 %v777_v14, %v777_v14 }
 0x111   :  { %1002 = vadd.xlane.f32.xlu1 %v1001_v23  ;;  %v1008_v44 = vadd.f32 %v1007_v13, %v777_v14  ;;  %v1249_v41 = vadd.f32 %v1248_v25, %v1247_v49 }
 0x114   :  { %v668_v35 = vpop.f32.mrf.mxu3 }
 0x115   :  { %902 = vst [vmem:[%s4744_s5 + $0x130] sm:$0xff] %v668_v35  ;;  %v1163_v38 = vmul.f32 %v668_v35, %v668_v35  ;;  %v833_v61 = vpop.f32.mrf.mxu2  ;;  %v3652_v37 = vpop.f32.mrf.mxu0  ;;  %v1015_v1 = vadd.f32 %v3426_v22, %v668_v35 }
 0x116   :  { %898 = vst.msk [vmem:[%s4744_s5 + $0x110] sm:$0xff] %vm869_vm1, %v833_v61  ;;  %v1009_v10 = vsel %vm869_vm1, %v833_v61, 0.0  ;;  %v1159_v39 = vmul.f32 %v833_v61, %v833_v61 }
 0x117   :  { %v1263_v57 = vadd.f32 %v3435_v0, %v1163_v38  ;;  %924 = vst [vmem:[%s4744_s5 + $0x1e0] sm:$0xff] %v3652_v37  ;;  %v780_v4 = vpop.f32.mrf.mxu1  ;;  %v1010_v63 = vadd.f32 %v1009_v10, %v1008_v44  ;;  %v1255_v0 = vadd.f32 %v1254_v20, %v1157_v62  ;;  %v1016_v14 = vadd.f32 %v1015_v1, %v3576_v9 }
 0x118   :  { %904 = vst [vmem:[%s4744_s5 + $0x140] sm:$0xff] %v780_v4  ;;  %v1165_v47 = vmul.f32 %v780_v4, %v780_v4  ;;  %v1257_v8 = vsel %vm869_vm1, %v1159_v39, 0.0 }
 0x119   :  { %1250 = vadd.xlane.f32.xlu1 %v1249_v41  ;;  %1011 = vadd.xlane.f32.xlu2 %v1010_v63  ;;  %v1264_v46 = vadd.f32 %v1263_v57, %v1164_v2  ;;  %v1256_v58 = vadd.f32 %v1255_v0, %v1158_v19  ;;  %v1017_v13 = vadd.f32 %v1016_v14, %v780_v4 }
 0x11a   :  { %v1178_v4 = vmul.f32 %v3630_v34, %v3630_v34 }
 0x11b   :  { %v1258_v45 = vadd.f32 %v1257_v8, %v1256_v58  ;;  %v1265_v28 = vadd.f32 %v1264_v46, %v1165_v47 }
 0x11c   :  { %v671_v29 = vpop.f32.mrf.mxu3 }
 0x11d   :  { %909 = vst [vmem:[%s4744_s5 + $0x168] sm:$0xff] %v671_v29  ;;  %v1170_v56 = vmul.f32 %v671_v29, %v671_v29  ;;  %v836_v54 = vpop.f32.mrf.mxu2  ;;  %v3676_v60 = vpop.f32.mrf.mxu0  ;;  %v1024_v22 = vadd.f32 %v3460_v21, %v671_v29  ;;  %v1171_v21 = vmul.f32 %v3606_v15, %v3606_v15 }
 0x11e   :  { %905 = vst.msk [vmem:[%s4744_s5 + $0x148] sm:$0xff] %vm869_vm1, %v836_v54  ;;  %v1166_v6 = vmul.f32 %v836_v54, %v836_v54  ;;  %v1018_v26 = vsel %vm869_vm1, %v836_v54, 0.0 }
 0x11f   :  { %v1272_v3 = vadd.f32 %v3466_v32, %v1170_v56  ;;  %931 = vst [vmem:[%s4744_s5 + $0x218] sm:$0xff] %v3676_v60  ;;  %v783_v40 = vpop.f32.mrf.mxu1  ;;  %v1025_v27 = vadd.f32 %v1024_v22, %v3606_v15  ;;  %v1019_v38 = vadd.f32 %v1018_v26, %v1017_v13  ;;  %v1192_v13 = vmul.f32 %v3676_v60, %v3676_v60 }
 0x120   :  { %911 = vst [vmem:[%s4744_s5 + $0x178] sm:$0xff] %v783_v40  ;;  %v1266_v55 = vsel %vm869_vm1, %v1166_v6, 0.0  ;;  %v1172_v23 = vmul.f32 %v783_v40, %v783_v40  ;;  %v1185_v6 = vmul.f32 %v3652_v37, %v3652_v37 }
 0x121   :  { %1259 = vadd.xlane.f32.xlu2 %v1258_v45  ;;  %v1267_v32 = vadd.f32 %v1266_v55, %v1265_v28  ;;  %v1273_v24 = vadd.f32 %v1272_v3, %v1171_v21  ;;  %v1026_v62 = vadd.f32 %v1025_v27, %v783_v40 }
 0x123   :  { %1268 = vadd.xlane.f32.xlu0 %v1267_v32  ;;  %v1274_v10 = vadd.f32 %v1273_v24, %v1172_v23 }
 0x124   :  { %v674_v48 = vpop.f32.mrf.mxu3 }
 0x125   :  { %916 = vst [vmem:[%s4744_s5 + $0x1a0] sm:$0xff] %v674_v48  ;;  %v1177_v35 = vmul.f32 %v674_v48, %v674_v48  ;;  %v839_v9 = vpop.f32.mrf.mxu2  ;;  %v3700_v25 = vpop.f32.mrf.mxu0  ;;  %v1033_v15 = vadd.f32 %v3480_v42, %v674_v48 }
 0x126   :  { %912 = vst.msk [vmem:[%s4744_s5 + $0x180] sm:$0xff] %vm869_vm1, %v839_v9  ;;  %v1173_v20 = vmul.f32 %v839_v9, %v839_v9  ;;  %v1027_v61 = vsel %vm869_vm1, %v839_v9, 0.0 }
 0x127   :  { %v1281_v49 = vadd.f32 %v3486_v53, %v1177_v35  ;;  %938 = vst [vmem:[%s4744_s5 + $0x250] sm:$0xff] %v3700_v25  ;;  %v786_v44 = vpop.f32.mrf.mxu1  ;;  %v1028_v53 = vadd.f32 %v1027_v61, %v1026_v62  ;;  %v1034_v39 = vadd.f32 %v1033_v15, %v3630_v34 }
 0x128   :  { %918 = vst [vmem:[%s4744_s5 + $0x1b0] sm:$0xff] %v786_v44  ;;  %v1275_v57 = vsel %vm869_vm1, %v1173_v20, 0.0  ;;  %v1179_v41 = vmul.f32 %v786_v44, %v786_v44 }
 0x129   :  { %1020 = vadd.xlane.f32.xlu2 %v1019_v38  ;;  %v1276_v42 = vadd.f32 %v1275_v57, %v1274_v10  ;;  %v1282_v63 = vadd.f32 %v1281_v49, %v1178_v4  ;;  %v1035_v54 = vadd.f32 %v1034_v39, %v786_v44 }
 0x12b   :  { %1277 = vadd.xlane.f32.xlu1 %v1276_v42  ;;  %1029 = vadd.xlane.f32.xlu0 %v1028_v53  ;;  %v1283_v56 = vadd.f32 %v1282_v63, %v1179_v41  ;;  %v1199_v53 = vmul.f32 %v3700_v25, %v3700_v25 }
 0x12c   :  { %v677_v2 = vpop.f32.mrf.mxu3 }
 0x12d   :  { %923 = vst [vmem:[%s4744_s5 + $0x1d8] sm:$0xff] %v677_v2  ;;  %v1184_v19 = vmul.f32 %v677_v2, %v677_v2  ;;  %v842_v0 = vpop.f32.mrf.mxu2  ;;  %v3723_v47 = vpop.f32.mrf.mxu0  ;;  %v1042_v29 = vadd.f32 %v3504_v5, %v677_v2 }
 0x12e   :  { %919 = vst.msk [vmem:[%s4744_s5 + $0x1b8] sm:$0xff] %vm869_vm1, %v842_v0  ;;  %v1180_v46 = vmul.f32 %v842_v0, %v842_v0  ;;  %v1036_v1 = vsel %vm869_vm1, %v842_v0, 0.0 }
 0x12f   :  { %v1290_v34 = vadd.f32 %v3511_v12, %v1184_v19  ;;  %945 = vst [vmem:[%s4744_s5 + $0x288] sm:$0xff] %v3723_v47  ;;  %v789_v8 = vpop.f32.mrf.mxu1  ;;  %v1037_v22 = vadd.f32 %v1036_v1, %v1035_v54  ;;  %v1043_v40 = vadd.f32 %v1042_v29, %v3652_v37 }
 0x130   :  { %925 = vst [vmem:[%s4744_s5 + $0x1e8] sm:$0xff] %v789_v8  ;;  %v1284_v58 = vsel %vm869_vm1, %v1180_v46, 0.0  ;;  %v1186_v12 = vmul.f32 %v789_v8, %v789_v8 }
 0x131   :  { %v1285_v5 = vadd.f32 %v1284_v58, %v1283_v56  ;;  %v1291_v3 = vadd.f32 %v1290_v34, %v1185_v6  ;;  %v1044_v27 = vadd.f32 %v1043_v40, %v789_v8 }
 0x133   :  { %1286 = vadd.xlane.f32.xlu2 %v1285_v5  ;;  %1038 = vadd.xlane.f32.xlu1 %v1037_v22  ;;  %v1292_v24 = vadd.f32 %v1291_v3, %v1186_v12 }
 0x134   :  { %v680_v45 = vpop.f32.mrf.mxu3 }
 0x135   :  { %930 = vst [vmem:[%s4744_s5 + $0x210] sm:$0xff] %v680_v45  ;;  %v1191_v28 = vmul.f32 %v680_v45, %v680_v45  ;;  %v845_v55 = vpop.f32.mrf.mxu2  ;;  %v3746_v14 = vpop.f32.mrf.mxu0  ;;  %v1051_v23 = vadd.f32 %v3529_v18, %v680_v45 }
 0x136   :  { %926 = vst.msk [vmem:[%s4744_s5 + $0x1f0] sm:$0xff] %vm869_vm1, %v845_v55  ;;  %v1187_v21 = vmul.f32 %v845_v55, %v845_v55  ;;  %v1045_v32 = vsel %vm869_vm1, %v845_v55, 0.0 }
 0x137   :  { %v1299_v37 = vadd.f32 %v3537_v30, %v1191_v28  ;;  %952 = vst [vmem:[%s4744_s5 + $0x2c0] sm:$0xff] %v3746_v14  ;;  %v792_v26 = vpop.f32.mrf.mxu1  ;;  %v1046_v35 = vadd.f32 %v1045_v32, %v1044_v27  ;;  %v1052_v20 = vadd.f32 %v1051_v23, %v3676_v60 }
 0x138   :  { %932 = vst [vmem:[%s4744_s5 + $0x220] sm:$0xff] %v792_v26  ;;  %v1293_v48 = vsel %vm869_vm1, %v1187_v21, 0.0  ;;  %v1193_v30 = vmul.f32 %v792_v26, %v792_v26 }
 0x139   :  { %v1294_v18 = vadd.f32 %v1293_v48, %v1292_v24  ;;  %v1300_v9 = vadd.f32 %v1299_v37, %v1192_v13  ;;  %v1053_v4 = vadd.f32 %v1052_v20, %v792_v26  ;;  %v2307_v26 = vmov 0.0  }
 0x13a   :  { %28 = vst.msk [vmem:[#allocation2 + $0x18] sm:$0xff] %vm24_vm2, %v2307_v26  ;;  %v1206_v24 = vmul.f32 %v3723_v47, %v3723_v47 }
 0x13b   :  { %1295 = vadd.xlane.f32.xlu0 %v1294_v18  ;;  %1047 = vadd.xlane.f32.xlu2 %v1046_v35  ;;  %v1301_v57 = vadd.f32 %v1300_v9, %v1193_v30  ;;  %25 = vst.msk [vmem:[#allocation2] sm:$0xff] %vm24_vm2, %v2307_v26 }
 0x13c   :  { %v683_v38 = vpop.f32.mrf.mxu3  ;;  %26 = vst.msk [vmem:[#allocation2 + $0x8] sm:$0xff] %vm24_vm2, %v2307_v26 }
 0x13d   :  { %937 = vst [vmem:[%s4744_s5 + $0x248] sm:$0xff] %v683_v38  ;;  %v1198_v61 = vmul.f32 %v683_v38, %v683_v38  ;;  %v848_v15 = vpop.f32.mrf.mxu2  ;;  %v1060_v34 = vadd.f32 %v3555_v59, %v683_v38 }
 0x13e   :  { %933 = vst.msk [vmem:[%s4744_s5 + $0x228] sm:$0xff] %vm869_vm1, %v848_v15  ;;  %v1194_v49 = vmul.f32 %v848_v15, %v848_v15  ;;  %v821_v44 = vpop.f32.mrf.mxu0  ;;  %v1054_v10 = vsel %vm869_vm1, %v848_v15, 0.0 }
 0x13f   :  { %v1308_v62 = vadd.f32 %v3563_v7, %v1198_v61  ;;  %870 = vst.msk [vmem:[%s4744_s5 + $0x30] sm:$0xff] %vm869_vm1, %v821_v44  ;;  %v795_v60 = vpop.f32.mrf.mxu1  ;;  %v1055_v63 = vadd.f32 %v1054_v10, %v1053_v4  ;;  %v1131_v7 = vmul.f32 %v821_v44, %v821_v44  ;;  %v973_v54 = vsel %vm869_vm1, %v821_v44, 0.0 }
 0x140   :  { %939 = vst [vmem:[%s4744_s5 + $0x258] sm:$0xff] %v795_v60  ;;  %v1302_v42 = vsel %vm869_vm1, %v1194_v49, 0.0  ;;  %v1200_v39 = vmul.f32 %v795_v60, %v795_v60  ;;  %v974_v59 = vadd.f32 %v973_v54, %v3542_v16  ;;  %v1061_v12 = vadd.f32 %v1060_v34, %v3700_v25 }
 0x141   :  { %v1303_v41 = vadd.f32 %v1302_v42, %v1301_v57  ;;  %v1309_v2 = vadd.f32 %v1308_v62, %v1199_v53  ;;  %v1221_v29 = vsel %vm869_vm1, %v1131_v7, 0.0  ;;  %27 = vst.msk [vmem:[#allocation2 + $0x10] sm:$0xff] %vm24_vm2, %v2307_v26  ;;  %v1213_v61 = vmul.f32 %v3746_v14, %v3746_v14  ;;  %v958_v7 = vld [vmem:[#allocation2 + $0x18] sm:$0xff] }
 0x142   :  { %v1222_v5 = vadd.f32 %v1221_v29, %v3544_v17  ;;  %v1062_v21 = vadd.f32 %v1061_v12, %v795_v60  ;;  %29 = vst.msk [vmem:[#allocation2 + $0x20] sm:$0xff] %vm24_vm2, %v2307_v26 }
 0x143   :  { %1304 = vadd.xlane.f32.xlu1 %v1303_v41  ;;  %1056 = vadd.xlane.f32.xlu0 %v1055_v63  ;;  %v1310_v56 = vadd.f32 %v1309_v2, %v1200_v39  ;;  %30 = vst.msk [vmem:[#allocation2 + $0x28] sm:$0xff] %vm24_vm2, %v2307_v26 }
 0x144   :  { %v686_v19 = vpop.f32.mrf.mxu3  ;;  %31 = vst.msk [vmem:[#allocation2 + $0x30] sm:$0xff] %vm24_vm2, %v2307_v26 }
 0x145   :  { %944 = vst [vmem:[%s4744_s5 + $0x280] sm:$0xff] %v686_v19  ;;  %v851_v0 = vpop.f32.mrf.mxu2  ;;  %v1205_v3 = vmul.f32 %v686_v19, %v686_v19  ;;  %v1069_v28 = vadd.f32 %v3582_v50, %v686_v19 }
 0x146   :  { %940 = vst.msk [vmem:[%s4744_s5 + $0x260] sm:$0xff] %vm869_vm1, %v851_v0  ;;  %v1201_v46 = vmul.f32 %v851_v0, %v851_v0  ;;  %v824_v1 = vpop.f32.mrf.mxu0  ;;  %v1063_v17 = vsel %vm869_vm1, %v851_v0, 0.0 }
 0x147   :  { %877 = vst.msk [vmem:[%s4744_s5 + $0x68] sm:$0xff] %vm869_vm1, %v824_v1  ;;  %v798_v8 = vpop.f32.mrf.mxu1  ;;  %v1138_v22 = vmul.f32 %v824_v1, %v824_v1  ;;  %v982_v32 = vsel %vm869_vm1, %v824_v1, 0.0  ;;  %v1317_v23 = vadd.f32 %v3593_v11, %v1205_v3  ;;  %v1064_v37 = vadd.f32 %v1063_v17, %v1062_v21 }
 0x148   :  { %946 = vst [vmem:[%s4744_s5 + $0x290] sm:$0xff] %v798_v8  ;;  %v1311_v58 = vsel %vm869_vm1, %v1201_v46, 0.0  ;;  %v983_v27 = vadd.f32 %v982_v32, %v3568_v43  ;;  %v1207_v13 = vmul.f32 %v798_v8, %v798_v8 }
 0x149   :  { %v1312_v6 = vadd.f32 %v1311_v58, %v1310_v56  ;;  %v1230_v25 = vsel %vm869_vm1, %v1138_v22, 0.0  ;;  %v1318_v18 = vadd.f32 %v1317_v23, %v1206_v24  ;;  %32 = vst.msk [vmem:[#allocation2 + $0x38] sm:$0xff] %vm24_vm2, %v2307_v26  ;;  %v959_v0 = vld [vmem:[#allocation2 + $0x20] sm:$0xff]  ;;  %v2308_v56 = vmov 0  }
 0x14a   :  { %v1231_v50 = vadd.f32 %v1230_v25, %v3570_v36  ;;  %v1070_v36 = vadd.f32 %v1069_v28, %v3723_v47  ;;  %33 = vst.msk [vmem:[#allocation2 + $0x40] sm:$0xff] %vm24_vm2, %v2307_v26  ;;  %2278 = vset.pattern.permute.xlu2 %v2308_v56  ;;  %2279 = vset.pattern.permute.xlu1 %v2308_v56  ;;  %v960_v25 = vld [vmem:[#allocation2 + $0x28] sm:$0xff] }
 0x14b   :  { %1313 = vadd.xlane.f32.xlu2 %v1312_v6  ;;  %1223 = vadd.xlane.f32.xlu1 %v1222_v5  ;;  %v1319_v38 = vadd.f32 %v1318_v18, %v1207_v13  ;;  %34 = vst.msk [vmem:[#allocation2 + $0x48] sm:$0xff] %vm24_vm2, %v2307_v26  ;;  %v961_v23 = vld [vmem:[#allocation2 + $0x30] sm:$0xff] }
 0x14c   :  { %975 = vadd.xlane.f32.xlu0 %v974_v59  ;;  %v3806_v40 = vpop.f32.mrf.mxu3  ;;  %v1071_v9 = vadd.f32 %v1070_v36, %v798_v8  ;;  %35 = vst.msk [vmem:[#allocation2 + $0x50] sm:$0xff] %vm24_vm2, %v2307_v26 }
 0x14d   :  { %951 = vst [vmem:[%s4744_s5 + $0x2b8] sm:$0xff] %v3806_v40  ;;  %v854_v45 = vpop.f32.mrf.mxu2  ;;  %v1212_v11 = vmul.f32 %v3806_v40, %v3806_v40  ;;  %v1078_v42 = vadd.f32 %v3612_v51, %v3806_v40  ;;  %2280 = vset.pattern.permute.xlu0 %v2308_v56 }
 0x14e   :  { %947 = vst.msk [vmem:[%s4744_s5 + $0x298] sm:$0xff] %vm869_vm1, %v854_v45  ;;  %v827_v16 = vpop.f32.mrf.mxu0  ;;  %v1208_v48 = vmul.f32 %v854_v45, %v854_v45  ;;  %v1072_v47 = vsel %vm869_vm1, %v854_v45, 0.0 }
 0x14f   :  { %884 = vst.msk [vmem:[%s4744_s5 + $0xa0] sm:$0xff] %vm869_vm1, %v827_v16  ;;  %v3823_v55 = vpop.f32.mrf.mxu1  ;;  %v991_v35 = vsel %vm869_vm1, %v827_v16, 0.0  ;;  %v1326_v30 = vadd.f32 %v3619_v31, %v1212_v11  ;;  %v1073_v15 = vadd.f32 %v1072_v47, %v1071_v9  ;;  %v1145_v10 = vmul.f32 %v827_v16, %v827_v16 }
 0x150   :  { %953 = vst [vmem:[%s4744_s5 + $0x2c8] sm:$0xff] %v3823_v55  ;;  %v1320_v20 = vsel %vm869_vm1, %v1208_v48, 0.0  ;;  %v992_v49 = vadd.f32 %v991_v35, %v3598_v33  ;;  %v1214_v62 = vmul.f32 %v3823_v55, %v3823_v55  ;;  %v1079_v63 = vadd.f32 %v1078_v42, %v3746_v14  ;;  %v962_v47 = vld [vmem:[#allocation2 + $0x38] sm:$0xff] }
 0x151   :  { %v1321_v44 = vadd.f32 %v1320_v20, %v1319_v38  ;;  %v1327_v60 = vadd.f32 %v1326_v30, %v1213_v61  ;;  %36 = vst.msk [vmem:[#allocation2 + $0x58] sm:$0xff] %vm24_vm2, %v2307_v26  ;;  %v1239_v57 = vsel %vm869_vm1, %v1145_v10, 0.0 }
 0x152   :  { %37 = vst.msk [vmem:[#allocation2 + $0x60] sm:$0xff] %vm24_vm2, %v2307_v26  ;;  %v1240_v41 = vadd.f32 %v1239_v57, %v3600_v52  ;;  %v1080_v51 = vadd.f32 %v1079_v63, %v3823_v55 }
 0x153   :  { %1065 = vadd.xlane.f32.xlu1 %v1064_v37  ;;  %1232 = vadd.xlane.f32.xlu2 %v1231_v50  ;;  %v1328_v4 = vadd.f32 %v1327_v60, %v1214_v62  ;;  %38 = vst.msk [vmem:[#allocation3] sm:$0xff] %vm24_vm2, %v2307_v26 }
 0x154   :  { %984 = vadd.xlane.f32.xlu0 %v983_v27  ;;  %39 = vst.msk [vmem:[#allocation3 + $0x8] sm:$0xff] %vm24_vm2, %v2307_v26 }
 0x155   :  { %v857_v43 = vpop.f32.mrf.mxu2  ;;  %40 = vst.msk [vmem:[#allocation3 + $0x10] sm:$0xff] %vm24_vm2, %v2307_v26 }
 0x156   :  { %954 = vst.msk [vmem:[%s4744_s5 + $0x2d0] sm:$0xff] %vm869_vm1, %v857_v43  ;;  %v1215_v31 = vmul.f32 %v857_v43, %v857_v43  ;;  %v1081_v52 = vsel %vm869_vm1, %v857_v43, 0.0 }
 0x157   :  { %41 = vst.msk [vmem:[#allocation3 + $0x18] sm:$0xff] %vm24_vm2, %v2307_v26  ;;  %v1082_v14 = vadd.f32 %v1081_v52, %v1080_v51  ;;  %v963_v52 = vld [vmem:[#allocation2 + $0x40] sm:$0xff] }
 0x158   :  { %v1329_v33 = vsel %vm869_vm1, %v1215_v31, 0.0  ;;  %42 = vst.msk [vmem:[#allocation3 + $0x20] sm:$0xff] %vm24_vm2, %v2307_v26 }
 0x159   :  { %v1330_v53 = vadd.f32 %v1329_v33, %v1328_v4  ;;  %43 = vst.msk [vmem:[#allocation3 + $0x28] sm:$0xff] %vm24_vm2, %v2307_v26 }
 0x15a   :  { %44 = vst.msk [vmem:[#allocation3 + $0x30] sm:$0xff] %vm24_vm2, %v2307_v26 }
 0x15b   :  { %1074 = vadd.xlane.f32.xlu2 %v1073_v15  ;;  %993 = vadd.xlane.f32.xlu1 %v992_v49  ;;  %45 = vst.msk [vmem:[#allocation3 + $0x38] sm:$0xff] %vm24_vm2, %v2307_v26 }
 0x15c   :  { %1322 = vadd.xlane.f32.xlu0 %v1321_v44  ;;  %46 = vst.msk [vmem:[#allocation3 + $0x40] sm:$0xff] %vm24_vm2, %v2307_v26 }
 0x15d   :  { %47 = vst.msk [vmem:[#allocation3 + $0x48] sm:$0xff] %vm24_vm2, %v2307_v26 }
 0x15e   :  { %48 = vst.msk [vmem:[#allocation3 + $0x50] sm:$0xff] %vm24_vm2, %v2307_v26  ;;  %v1115_v19 = vld [vmem:[#allocation3 + $0x18] sm:$0xff] }
 0x15f   :  { %49 = vst.msk [vmem:[#allocation3 + $0x58] sm:$0xff] %vm24_vm2, %v2307_v26  ;;  %v1116_v54 = vld [vmem:[#allocation3 + $0x20] sm:$0xff] }
 0x160   :  { %50 = vst.msk [vmem:[#allocation3 + $0x60] sm:$0xff] %vm24_vm2, %v2307_v26  ;;  %v1117_v5 = vld [vmem:[#allocation3 + $0x28] sm:$0xff] }
 0x161   :  { %v1118_v32 = vld [vmem:[#allocation3 + $0x30] sm:$0xff] }
 0x162   :  { %v1119_v35 = vld [vmem:[#allocation3 + $0x38] sm:$0xff] }
 0x163   :  { %1331 = vadd.xlane.f32.xlu1 %v1330_v53  ;;  %v1120_v63 = vld [vmem:[#allocation3 + $0x40] sm:$0xff] }
 0x164   :  { %1241 = vadd.xlane.f32.xlu0 %v1240_v41 }
 0x16c   :  { %1083 = vadd.xlane.f32.xlu0 %v1082_v14  ;;  %v1586_v14 = vld [vmem:[%s4745_s3 + $0x18] sm:$0xff] }
 0x184   :  { %v1003_v39 = vpop.xlane.xlu1 %1002 }
 0x185   :  { %v1088_v2 = vadd.f32 %v1003_v39, %v958_v7 }
 0x187   :  { %1102 = vst.msk [vmem:[#allocation2 + $0x18] sm:$0xff] %vm24_vm2, %v1088_v2 }
 0x18c   :  { %v1251_v46 = vpop.xlane.xlu1 %1250  ;;  %v1012_v1 = vpop.xlane.xlu2 %1011 }
 0x18d   :  { %v1336_v29 = vadd.f32 %v1251_v46, %v1115_v19  ;;  %v1089_v34 = vadd.f32 %v1012_v1, %v959_v0 }
 0x18e   :  { %v1365_v8 = vld [vmem:[#allocation2 + $0x18] sm:$0xff] }
 0x18f   :  { %1349 = vst.msk [vmem:[#allocation3 + $0x18] sm:$0xff] %vm24_vm2, %v1336_v29  ;;  %v3914_v58 = vmul.f32 0.0012755102, %v1365_v8 }
 0x190   :  { %1103 = vst.msk [vmem:[#allocation2 + $0x20] sm:$0xff] %vm24_vm2, %v1089_v34 }
 0x191   :  { %v1417_v45 = vmul.f32 %v3914_v58, %v3914_v58 }
 0x194   :  { %v1260_v6 = vpop.xlane.xlu2 %1259 }
 0x195   :  { %v1337_v22 = vadd.f32 %v1260_v6, %v1116_v54  ;;  %v1612_v6 = vld [vmem:[%s4746_s4 + $0x18] sm:$0xff] }
 0x196   :  { %v1269_v59 = vpop.xlane.xlu0 %1268  ;;  %v1391_v12 = vld [vmem:[#allocation3 + $0x18] sm:$0xff] }
 0x197   :  { %1350 = vst.msk [vmem:[#allocation3 + $0x20] sm:$0xff] %vm24_vm2, %v1337_v22  ;;  %v1338_v3 = vadd.f32 %v1269_v59, %v1117_v5  ;;  %v1404_v40 = vmul.f32 0.0012755102, %v1391_v12  ;;  %v1366_v16 = vld [vmem:[#allocation2 + $0x20] sm:$0xff] }
 0x198   :  { %v3920_v55 = vmul.f32 0.0012755102, %v1366_v16 }
 0x199   :  { %1351 = vst.msk [vmem:[#allocation3 + $0x28] sm:$0xff] %vm24_vm2, %v1338_v3  ;;  %v1430_v17 = vsub.f32 %v1404_v40, %v1417_v45 }
 0x19a   :  { %v1418_v36 = vmul.f32 %v3920_v55, %v3920_v55 }
 0x19b   :  { %v1443_v28 = vadd.f32 1e-05, %v1430_v17  ;;  %v1121_v17 = vld [vmem:[#allocation3 + $0x48] sm:$0xff] }
 0x19c   :  { %v1021_v21 = vpop.xlane.xlu2 %1020 }
 0x19d   :  { %v1090_v37 = vadd.f32 %v1021_v21, %v960_v25  ;;  %2281 = vrsqrt.f32 %v1443_v28  ;;  %vm1489_vm4 = vweird.f32 %v1443_v28  ;;  %v964_v25 = vld [vmem:[#allocation2 + $0x48] sm:$0xff] }
 0x19e   :  { %v1278_v50 = vpop.xlane.xlu1 %1277  ;;  %v1030_v26 = vpop.xlane.xlu0 %1029  ;;  %v1392_v24 = vld [vmem:[#allocation3 + $0x20] sm:$0xff] }
 0x19f   :  { %1104 = vst.msk [vmem:[#allocation2 + $0x28] sm:$0xff] %vm24_vm2, %v1090_v37  ;;  %v1339_v27 = vadd.f32 %v1278_v50, %v1118_v32  ;;  %v1091_v11 = vadd.f32 %v1030_v26, %v961_v23  ;;  %v1405_v48 = vmul.f32 0.0012755102, %v1392_v24 }
 0x1a0   :  { %v1393_v15 = vld [vmem:[#allocation3 + $0x28] sm:$0xff] }
 0x1a1   :  { %1352 = vst.msk [vmem:[#allocation3 + $0x30] sm:$0xff] %vm24_vm2, %v1339_v27  ;;  %v1431_v13 = vsub.f32 %v1405_v48, %v1418_v36  ;;  %v1406_v62 = vmul.f32 0.0012755102, %v1393_v15 }
 0x1a2   :  { %1105 = vst.msk [vmem:[#allocation2 + $0x30] sm:$0xff] %vm24_vm2, %v1091_v11 }
 0x1a3   :  { %v2282_v18 = vpop.eup %2281  ;;  %v3927_v43 = vadd.f32 1e-05, %v1431_v13 }
 0x1a4   :  { %v1484_v30 = vmul.f32 %v2282_v18, %v1443_v28  ;;  %vm1490_vm3 = vweird.f32 %v2282_v18 }
 0x1a5   :  { %2283 = vrsqrt.f32 %v3927_v43  ;;  %vm1491_vm5 = vmor %vm1489_vm4, %vm1490_vm3  ;;  %vm1499_vm7 = vweird.f32 %v3927_v43 }
 0x1a6   :  { %v1287_v9 = vpop.xlane.xlu2 %1286  ;;  %v1039_v20 = vpop.xlane.xlu1 %1038  ;;  %v1485_v38 = vmul.f32 %v2282_v18, %v1484_v30  ;;  %v1367_v61 = vld [vmem:[#allocation2 + $0x28] sm:$0xff] }
 0x1a7   :  { %v1340_v49 = vadd.f32 %v1287_v9, %v1119_v35  ;;  %v1092_v31 = vadd.f32 %v1039_v20, %v962_v47  ;;  %v3930_v44 = vmul.f32 0.0012755102, %v1367_v61 }
 0x1a8   :  { %v1486_v10 = vmul.f32 0.5, %v1485_v38  ;;  %v1394_v57 = vld [vmem:[#allocation3 + $0x30] sm:$0xff] }
 0x1a9   :  { %1353 = vst.msk [vmem:[#allocation3 + $0x38] sm:$0xff] %vm24_vm2, %v1340_v49  ;;  %v1419_v60 = vmul.f32 %v3930_v44, %v3930_v44  ;;  %v1368_v33 = vld [vmem:[#allocation2 + $0x30] sm:$0xff]  ;;  %v1407_v39 = vmul.f32 0.0012755102, %v1394_v57 }
 0x1aa   :  { %1106 = vst.msk [vmem:[#allocation2 + $0x38] sm:$0xff] %vm24_vm2, %v1092_v31  ;;  %v1487_v4 = vsub.f32 1.5, %v1486_v10  ;;  %v3936_v42 = vmul.f32 0.0012755102, %v1368_v33  ;;  %v1122_v31 = vld [vmem:[#allocation3 + $0x50] sm:$0xff]  ;;  %v1112_v10 = vld [vmem:[#allocation3] sm:$0xff] }
 0x1ab   :  { %v2284_v53 = vpop.eup %2283  ;;  %v1432_v41 = vsub.f32 %v1406_v62, %v1419_v60  ;;  %v955_v33 = vld [vmem:[#allocation2] sm:$0xff] }
 0x1ac   :  { %v1488_v51 = vmul.f32 %v2282_v18, %v1487_v4  ;;  %v1494_v7 = vmul.f32 %v2284_v53, %v3927_v43  ;;  %v1420_v2 = vmul.f32 %v3936_v42, %v3936_v42  ;;  %vm1500_vm6 = vweird.f32 %v2284_v53 }
 0x1ad   :  { %v3944_v19 = vadd.f32 1e-05, %v1432_v41  ;;  %vm1501_vm8 = vmor %vm1499_vm7, %vm1500_vm6 }
 0x1ae   :  { %v1296_v0 = vpop.xlane.xlu0 %1295  ;;  %v1048_v46 = vpop.xlane.xlu2 %1047  ;;  %v1492_v1 = vsel %vm1491_vm5, %v2282_v18, %v1488_v51  ;;  %v1495_v29 = vmul.f32 %v2284_v53, %v1494_v7  ;;  %v1433_v34 = vsub.f32 %v1407_v39, %v1420_v2  ;;  %v1613_v18 = vld [vmem:[%s4746_s4 + $0x20] sm:$0xff] }
 0x1af   :  { %v1341_v8 = vadd.f32 %v1296_v0, %v1120_v63  ;;  %v1093_v56 = vadd.f32 %v1048_v46, %v963_v52  ;;  %v1599_v54 = vmul.f32 %v1586_v14, %v1492_v1  ;;  %2285 = vrsqrt.f32 %v3944_v19  ;;  %v1588_v63 = vld [vmem:[%s4745_s3 + $0x28] sm:$0xff] }
 0x1b0   :  { %v1496_v5 = vmul.f32 0.5, %v1495_v29  ;;  %v3950_v22 = vadd.f32 1e-05, %v1433_v34  ;;  %v1395_v3 = vld [vmem:[#allocation3 + $0x38] sm:$0xff]  ;;  %vm1509_vm10 = vweird.f32 %v3944_v19  ;;  %v1589_v34 = vld [vmem:[%s4745_s3 + $0x30] sm:$0xff] }
 0x1b1   :  { %1354 = vst.msk [vmem:[#allocation3 + $0x40] sm:$0xff] %vm24_vm2, %v1341_v8  ;;  %1756 = vperm.xlu2 %2278, %v1599_v54   ;;  %v1625_v59 = vmul.f32 %v1599_v54, %v3914_v58  ;;  %v1369_v12 = vld [vmem:[#allocation2 + $0x38] sm:$0xff]  ;;  %v1587_v58 = vld [vmem:[%s4745_s3 + $0x20] sm:$0xff]  ;;  %v1408_v21 = vmul.f32 0.0012755102, %v1395_v3  ;;  %v965_v3 = vld [vmem:[#allocation2 + $0x50] sm:$0xff] }
 0x1b2   :  { %1107 = vst.msk [vmem:[#allocation2 + $0x40] sm:$0xff] %vm24_vm2, %v1093_v56  ;;  %v1497_v40 = vsub.f32 1.5, %v1496_v5  ;;  %2287 = vrsqrt.f32 %v3950_v22  ;;  %v3956_v45 = vmul.f32 0.0012755102, %v1369_v12  ;;  %vm1519_vm13 = vweird.f32 %v3950_v22 }
 0x1b3   :  { %v1638_v16 = vsub.f32 %v1612_v6, %v1625_v59  ;;  %v1614_v6 = vld [vmem:[%s4746_s4 + $0x28] sm:$0xff] }
 0x1b4   :  { %v1498_v28 = vmul.f32 %v2284_v53, %v1497_v40  ;;  %v1421_v32 = vmul.f32 %v3956_v45, %v3956_v45  ;;  %v1113_v40 = vld [vmem:[#allocation3 + $0x8] sm:$0xff] }
 0x1b5   :  { %v2286_v23 = vpop.eup %2285  ;;  %1912 = vperm.xlu1 %2279, %v1638_v16  }
 0x1b6   :  { %v1305_v37 = vpop.xlane.xlu1 %1304  ;;  %v1057_v50 = vpop.xlane.xlu0 %1056  ;;  %v1502_v26 = vsel %vm1501_vm8, %v2284_v53, %v1498_v28  ;;  %v1504_v24 = vmul.f32 %v2286_v23, %v3944_v19  ;;  %v1434_v27 = vsub.f32 %v1408_v21, %v1421_v32  ;;  %vm1510_vm9 = vweird.f32 %v2286_v23  ;;  %v956_v28 = vld [vmem:[#allocation2 + $0x8] sm:$0xff] }
 0x1b7   :  { %v1342_v11 = vadd.f32 %v1305_v37, %v1121_v17  ;;  %v1094_v48 = vadd.f32 %v1057_v50, %v964_v25  ;;  %v1600_v36 = vmul.f32 %v1587_v58, %v1502_v26  ;;  %vm1511_vm11 = vmor %vm1509_vm10, %vm1510_vm9  ;;  %v1615_v37 = vld [vmem:[%s4746_s4 + $0x30] sm:$0xff] }
 0x1b8   :  { %v2288_v13 = vpop.eup %2287  ;;  %v1505_v43 = vmul.f32 %v2286_v23, %v1504_v24  ;;  %v3968_v35 = vadd.f32 1e-05, %v1434_v27  ;;  %v1396_v20 = vld [vmem:[#allocation3 + $0x40] sm:$0xff] }
 0x1b9   :  { %1355 = vst.msk [vmem:[#allocation3 + $0x48] sm:$0xff] %vm24_vm2, %v1342_v11  ;;  %1761 = vperm.xlu2 %2278, %v1600_v36   ;;  %v1626_v47 = vmul.f32 %v1600_v36, %v3920_v55  ;;  %v1514_v30 = vmul.f32 %v2288_v13, %v3950_v22  ;;  %v1370_v9 = vld [vmem:[#allocation2 + $0x40] sm:$0xff]  ;;  %v1409_v60 = vmul.f32 0.0012755102, %v1396_v20  ;;  %vm1520_vm12 = vweird.f32 %v2288_v13 }
 0x1ba   :  { %1108 = vst.msk [vmem:[#allocation2 + $0x48] sm:$0xff] %vm24_vm2, %v1094_v48  ;;  %v1506_v38 = vmul.f32 0.5, %v1505_v43  ;;  %2289 = vrsqrt.f32 %v3968_v35  ;;  %v3975_v61 = vmul.f32 0.0012755102, %v1370_v9  ;;  %vm1521_vm14 = vmor %vm1519_vm13, %vm1520_vm12  ;;  %vm1529_vm0 = vweird.f32 %v3968_v35 }
 0x1bb   :  { %v1639_v15 = vsub.f32 %v1613_v18, %v1626_v47  ;;  %v1515_v49 = vmul.f32 %v2288_v13, %v1514_v30 }
 0x1bc   :  { %v1507_v62 = vsub.f32 1.5, %v1506_v38  ;;  %v1422_v55 = vmul.f32 %v3975_v61, %v3975_v61 }
 0x1bd   :  { %1917 = vperm.xlu0 %2280, %v1639_v15   ;;  %v1516_v57 = vmul.f32 0.5, %v1515_v49  ;;  %v966_v15 = vld [vmem:[#allocation2 + $0x58] sm:$0xff]  ;;  %v957_v49 = vld [vmem:[#allocation2 + $0x10] sm:$0xff] }
 0x1be   :  { %v1314_v4 = vpop.xlane.xlu2 %1313  ;;  %v1224_v53 = vpop.xlane.xlu1 %1223  ;;  %v1508_v41 = vmul.f32 %v2286_v23, %v1507_v62  ;;  %v1435_v52 = vsub.f32 %v1409_v60, %v1422_v55  ;;  %v1616_v62 = vld [vmem:[%s4746_s4 + $0x38] sm:$0xff] }
 0x1bf   :  { %v1343_v51 = vadd.f32 %v1314_v4, %v1122_v31  ;;  %v1333_v14 = vadd.f32 %v1224_v53, %v1112_v10  ;;  %v976_v7 = vpop.xlane.xlu0 %975  ;;  %v1517_v39 = vsub.f32 1.5, %v1516_v57  ;;  %v1123_v10 = vld [vmem:[#allocation3 + $0x58] sm:$0xff] }
 0x1c0   :  { %v3984_v2 = vpop.eup %2289  ;;  %v1085_v0 = vadd.f32 %v976_v7, %v955_v33  ;;  %v1512_v46 = vsel %vm1511_vm11, %v2286_v23, %v1508_v41  ;;  %v3986_v1 = vadd.f32 1e-05, %v1435_v52  ;;  %v1397_v54 = vld [vmem:[#allocation3 + $0x48] sm:$0xff] }
 0x1c1   :  { %1356 = vst.msk [vmem:[#allocation3 + $0x50] sm:$0xff] %vm24_vm2, %v1343_v51  ;;  %v1601_v19 = vmul.f32 %v1588_v63, %v1512_v46  ;;  %v1518_v29 = vmul.f32 %v2288_v13, %v1517_v39  ;;  %v1524_v8 = vmul.f32 %v3984_v2, %v3968_v35  ;;  %v1371_v56 = vld [vmem:[#allocation2 + $0x48] sm:$0xff]  ;;  %v1410_v17 = vmul.f32 0.0012755102, %v1397_v54 }
 0x1c2   :  { %1346 = vst.msk [vmem:[#allocation3] sm:$0xff] %vm24_vm2, %v1333_v14  ;;  %2291 = vrsqrt.f32 %v3986_v1  ;;  %v4001_v5 = vmul.f32 0.0012755102, %v1371_v56  ;;  %vm1530_vm15 = vweird.f32 %v3984_v2  ;;  %vm1539_vm5 = vweird.f32 %v3986_v1 }
 0x1c3   :  { %1099 = vst.msk [vmem:[#allocation2] sm:$0xff] %vm24_vm2, %v1085_v0  ;;  %1766 = vperm.xlu1 %2279, %v1601_v19   ;;  %v1627_v22 = vmul.f32 %v1601_v19, %v3930_v44  ;;  %v1522_v59 = vsel %vm1521_vm14, %v2288_v13, %v1518_v29  ;;  %v1525_v12 = vmul.f32 %v3984_v2, %v1524_v8  ;;  %vm1531_vm3 = vmor %vm1529_vm0, %vm1530_vm15 }
 0x1c4   :  { %v1602_v16 = vmul.f32 %v1589_v34, %v1522_v59  ;;  %v1423_v25 = vmul.f32 %v4001_v5, %v4001_v5 }
 0x1c5   :  { %v1640_v58 = vsub.f32 %v1614_v6, %v1627_v22  ;;  %v1526_v21 = vmul.f32 0.5, %v1525_v12  ;;  %v1124_v22 = vld [vmem:[#allocation3 + $0x60] sm:$0xff] }
 0x1c6   :  { %v1066_v32 = vpop.xlane.xlu1 %1065  ;;  %v1233_v23 = vpop.xlane.xlu2 %1232  ;;  %v1628_v44 = vmul.f32 %v1602_v16, %v3936_v42  ;;  %v1436_v50 = vsub.f32 %v1410_v17, %v1423_v25  ;;  %v1590_v42 = vld [vmem:[%s4745_s3 + $0x38] sm:$0xff]  ;;  %v1617_v17 = vld [vmem:[%s4746_s4 + $0x40] sm:$0xff] }
 0x1c7   :  { %v1095_v26 = vadd.f32 %v1066_v32, %v965_v3  ;;  %v1334_v24 = vadd.f32 %v1233_v23, %v1113_v40  ;;  %v985_v27 = vpop.xlane.xlu0 %984  ;;  %1922 = vperm.xlu2 %2278, %v1640_v58   ;;  %v1527_v11 = vsub.f32 1.5, %v1526_v21 }
 0x1c8   :  { %v2292_v48 = vpop.eup %2291  ;;  %v1086_v36 = vadd.f32 %v985_v27, %v956_v28  ;;  %v4013_v13 = vadd.f32 1e-05, %v1436_v50  ;;  %v1641_v18 = vsub.f32 %v1615_v37, %v1628_v44  ;;  %v1398_v34 = vld [vmem:[#allocation3 + $0x50] sm:$0xff] }
 0x1c9   :  { %1109 = vst.msk [vmem:[#allocation2 + $0x50] sm:$0xff] %vm24_vm2, %v1095_v26  ;;  %v1528_v43 = vmul.f32 %v3984_v2, %v1527_v11  ;;  %v1534_v47 = vmul.f32 %v2292_v48, %v3986_v1  ;;  %v1388_v9 = vld [vmem:[#allocation3] sm:$0xff]  ;;  %vm1540_vm4 = vweird.f32 %v2292_v48  ;;  %v1411_v3 = vmul.f32 0.0012755102, %v1398_v34 }
 0x1ca   :  { %1347 = vst.msk [vmem:[#allocation3 + $0x8] sm:$0xff] %vm24_vm2, %v1334_v24  ;;  %2293 = vrsqrt.f32 %v4013_v13  ;;  %v1362_v30 = vld [vmem:[#allocation2] sm:$0xff]  ;;  %v1401_v55 = vmul.f32 0.0012755102, %v1388_v9  ;;  %vm1541_vm6 = vmor %vm1539_vm5, %vm1540_vm4  ;;  %vm1549_vm8 = vweird.f32 %v4013_v13 }
 0x1cb   :  { %1100 = vst.msk [vmem:[#allocation2 + $0x8] sm:$0xff] %vm24_vm2, %v1086_v36  ;;  %1927 = vperm.xlu1 %2279, %v1641_v18   ;;  %v1532_v20 = vsel %vm1531_vm3, %v3984_v2, %v1528_v43  ;;  %v1535_v38 = vmul.f32 %v2292_v48, %v1534_v47  ;;  %v4026_v35 = vmul.f32 0.0012755102, %v1362_v30 }
 0x1cc   :  { %v1603_v31 = vmul.f32 %v1590_v42, %v1532_v20 }
 0x1cd   :  { %v1536_v60 = vmul.f32 0.5, %v1535_v38  ;;  %v1414_v33 = vmul.f32 %v4026_v35, %v4026_v35 }
 0x1ce   :  { %v1075_v57 = vpop.xlane.xlu2 %1074  ;;  %v994_v4 = vpop.xlane.xlu1 %993  ;;  %v1629_v53 = vmul.f32 %v1603_v31, %v3956_v45  ;;  %v1591_v45 = vld [vmem:[%s4745_s3 + $0x40] sm:$0xff] }
 0x1cf   :  { %v1096_v41 = vadd.f32 %v1075_v57, %v966_v15  ;;  %v1323_v63 = vpop.xlane.xlu0 %1322  ;;  %v1087_v52 = vadd.f32 %v994_v4, %v957_v49  ;;  %1771 = vperm.xlu2 %2278, %v1602_v16   ;;  %v1537_v51 = vsub.f32 1.5, %v1536_v60  ;;  %v1427_v14 = vsub.f32 %v1401_v55, %v1414_v33  ;;  %v1114_v16 = vld [vmem:[#allocation3 + $0x10] sm:$0xff]  ;;  %v967_v15 = vld [vmem:[#allocation2 + $0x60] sm:$0xff]  ;;  %v1618_v49 = vld [vmem:[%s4746_s4 + $0x48] sm:$0xff] }
 0x1d0   :  { %v2294_v7 = vpop.eup %2293  ;;  %v1344_v39 = vadd.f32 %v1323_v63, %v1123_v10  ;;  %v1642_v2 = vsub.f32 %v1616_v62, %v1629_v53  ;;  %v1372_v0 = vld [vmem:[#allocation2 + $0x50] sm:$0xff] }
 0x1d1   :  { %1110 = vst.msk [vmem:[#allocation2 + $0x58] sm:$0xff] %vm24_vm2, %v1096_v41  ;;  %v1538_v46 = vmul.f32 %v2292_v48, %v1537_v51  ;;  %v1544_v19 = vmul.f32 %v2294_v7, %v4013_v13  ;;  %v4040_v29 = vadd.f32 1e-05, %v1427_v14  ;;  %v4044_v56 = vmul.f32 0.0012755102, %v1372_v0  ;;  %v1389_v6 = vld [vmem:[#allocation3 + $0x8] sm:$0xff] }
 0x1d2   :  { %1357 = vst.msk [vmem:[#allocation3 + $0x58] sm:$0xff] %vm24_vm2, %v1344_v39  ;;  %1932 = vperm.xlu0 %2280, %v1642_v2   ;;  %v1363_v8 = vld [vmem:[#allocation2 + $0x8] sm:$0xff]  ;;  %v1402_v21 = vmul.f32 0.0012755102, %v1389_v6  ;;  %vm1550_vm7 = vweird.f32 %v2294_v7  ;;  %v1583_v39 = vld [vmem:[%s4745_s3] sm:$0xff] }
 0x1d3   :  { %1101 = vst.msk [vmem:[#allocation2 + $0x10] sm:$0xff] %vm24_vm2, %v1087_v52  ;;  %1776 = vperm.xlu1 %2279, %v1603_v31   ;;  %v1542_v1 = vsel %vm1541_vm6, %v2292_v48, %v1538_v46  ;;  %v1545_v54 = vmul.f32 %v2294_v7, %v1544_v19  ;;  %2295 = vrsqrt.f32 %v4040_v29  ;;  %v4048_v12 = vmul.f32 0.0012755102, %v1363_v8  ;;  %vm1551_vm9 = vmor %vm1549_vm8, %vm1550_vm7 }
 0x1d4   :  { %v1604_v59 = vmul.f32 %v1591_v45, %v1542_v1  ;;  %v1424_v40 = vmul.f32 %v4044_v56, %v4044_v56  ;;  %vm1459_vm11 = vweird.f32 %v4040_v29 }
 0x1d5   :  { %v1546_v25 = vmul.f32 0.5, %v1545_v54  ;;  %v1415_v32 = vmul.f32 %v4048_v12, %v4048_v12  ;;  %v1609_v54 = vld [vmem:[%s4746_s4] sm:$0xff] }
 0x1d6   :  { %v1332_v28 = vpop.xlane.xlu1 %1331  ;;  %v1630_v58 = vmul.f32 %v1604_v59, %v3975_v61  ;;  %v1437_v23 = vsub.f32 %v1411_v3, %v1424_v40  ;;  %v1592_v61 = vld [vmem:[%s4745_s3 + $0x48] sm:$0xff] }
 0x1d7   :  { %v1242_v37 = vpop.xlane.xlu0 %1241  ;;  %v1345_v44 = vadd.f32 %v1332_v28, %v1124_v22  ;;  %v1547_v50 = vsub.f32 1.5, %v1546_v25  ;;  %v1428_v27 = vsub.f32 %v1402_v21, %v1415_v32 }
 0x1d8   :  { %v1335_v26 = vadd.f32 %v1242_v37, %v1114_v16  ;;  %v1643_v24 = vsub.f32 %v1617_v17, %v1630_v58  ;;  %v4058_v11 = vadd.f32 1e-05, %v1437_v23  ;;  %v1373_v48 = vld [vmem:[#allocation2 + $0x58] sm:$0xff]  ;;  %v1584_v23 = vld [vmem:[%s4745_s3 + $0x8] sm:$0xff] }
 0x1d9   :  { %v2296_v36 = vpop.eup %2295  ;;  %1358 = vst.msk [vmem:[#allocation3 + $0x60] sm:$0xff] %vm24_vm2, %v1345_v44  ;;  %v1548_v18 = vmul.f32 %v2294_v7, %v1547_v50  ;;  %v4065_v43 = vmul.f32 0.0012755102, %v1373_v48  ;;  %v4070_v47 = vadd.f32 1e-05, %v1428_v27  ;;  %v1399_v30 = vld [vmem:[#allocation3 + $0x58] sm:$0xff] }
 0x1da   :  { %1348 = vst.msk [vmem:[#allocation3 + $0x10] sm:$0xff] %vm24_vm2, %v1335_v26  ;;  %1937 = vperm.xlu2 %2278, %v1643_v24   ;;  %1781 = vperm.xlu0 %2280, %v1604_v59   ;;  %v1454_v42 = vmul.f32 %v2296_v36, %v4040_v29  ;;  %2297 = vrsqrt.f32 %v4058_v11  ;;  %v1364_v9 = vld [vmem:[#allocation2 + $0x10] sm:$0xff]  ;;  %v1412_v31 = vmul.f32 0.0012755102, %v1399_v30  ;;  %vm1460_vm10 = vweird.f32 %v2296_v36 }
 0x1db   :  { %v1552_v13 = vsel %vm1551_vm9, %v2294_v7, %v1548_v18  ;;  %2299 = vrsqrt.f32 %v4070_v47  ;;  %v1425_v10 = vmul.f32 %v4065_v43, %v4065_v43  ;;  %v4080_v55 = vmul.f32 0.0012755102, %v1364_v9  ;;  %vm1461_vm12 = vmor %vm1459_vm11, %vm1460_vm10  ;;  %v1610_v9 = vld [vmem:[%s4746_s4 + $0x8] sm:$0xff] }
 0x1dc   :  { %v1605_v20 = vmul.f32 %v1592_v61, %v1552_v13  ;;  %v1455_v38 = vmul.f32 %v2296_v36, %v1454_v42  ;;  %vm1469_vm14 = vweird.f32 %v4070_v47  ;;  %vm1559_vm0 = vweird.f32 %v4058_v11 }
 0x1dd   :  { %v1438_v57 = vsub.f32 %v1412_v31, %v1425_v10  ;;  %v1416_v0 = vmul.f32 %v4080_v55, %v4080_v55  ;;  %v1585_v10 = vld [vmem:[%s4745_s3 + $0x10] sm:$0xff] }
 0x1de   :  { %v1631_v62 = vmul.f32 %v1605_v20, %v4001_v5  ;;  %v1456_v60 = vmul.f32 0.5, %v1455_v38 }
 0x1df   :  { %v1084_v33 = vpop.xlane.xlu0 %1083  ;;  %v4086_v14 = vadd.f32 1e-05, %v1438_v57 }
 0x1e0   :  { %v4082_v4 = vpop.eup %2297  ;;  %v1097_v53 = vadd.f32 %v1084_v33, %v967_v15  ;;  %v1644_v41 = vsub.f32 %v1618_v49, %v1631_v62  ;;  %v1457_v63 = vsub.f32 1.5, %v1456_v60  ;;  %v1400_v28 = vld [vmem:[#allocation3 + $0x60] sm:$0xff] }
 0x1e1   :  { %v1554_v52 = vmul.f32 %v4082_v4, %v4058_v11  ;;  %v1390_v51 = vld [vmem:[#allocation3 + $0x10] sm:$0xff]  ;;  %v2300_v7 = vpop.eup %2299  ;;  %2301 = vrsqrt.f32 %v4086_v14  ;;  %vm1560_vm13 = vweird.f32 %v4082_v4  ;;  %v1413_v44 = vmul.f32 0.0012755102, %v1400_v28 }
 0x1e2   :  { %1111 = vst.msk [vmem:[#allocation2 + $0x60] sm:$0xff] %vm24_vm2, %v1097_v53  ;;  %1786 = vperm.xlu2 %2278, %v1605_v20   ;;  %1942 = vperm.xlu1 %2279, %v1644_v41   ;;  %v1458_v5 = vmul.f32 %v2296_v36, %v1457_v63  ;;  %v1403_v2 = vmul.f32 0.0012755102, %v1390_v51  ;;  %v1464_v46 = vmul.f32 %v2300_v7, %v4070_v47  ;;  %vm1470_vm2 = vweird.f32 %v2300_v7  ;;  %vm1561_vm3 = vmor %vm1559_vm0, %vm1560_vm13  ;;  %v1594_v53 = vld [vmem:[%s4745_s3 + $0x58] sm:$0xff]  ;;  %v1611_v41 = vld [vmem:[%s4746_s4 + $0x10] sm:$0xff] }
 0x1e3   :  { %v1555_v45 = vmul.f32 %v4082_v4, %v1554_v52  ;;  %vm1471_vm15 = vmor %vm1469_vm14, %vm1470_vm2  ;;  %vm1569_vm8 = vweird.f32 %v4086_v14 }
 0x1e4   :  { %v1462_v19 = vsel %vm1461_vm12, %v2296_v36, %v1458_v5  ;;  %v1429_v34 = vsub.f32 %v1403_v2, %v1416_v0  ;;  %v1465_v1 = vmul.f32 %v2300_v7, %v1464_v46  ;;  %v1593_v36 = vld [vmem:[%s4745_s3 + $0x50] sm:$0xff]  ;;  %v1595_v2 = vld [vmem:[%s4745_s3 + $0x60] sm:$0xff] }
 0x1e5   :  { %v1596_v8 = vmul.f32 %v1583_v39, %v1462_v19  ;;  %v1556_v29 = vmul.f32 0.5, %v1555_v45  ;;  %v1621_v19 = vld [vmem:[%s4746_s4 + $0x60] sm:$0xff] }
 0x1e6   :  { %v1442_v6 = vadd.f32 1e-05, %v1429_v34  ;;  %v1466_v59 = vmul.f32 0.5, %v1465_v1 }
 0x1e7   :  { %v1622_v22 = vmul.f32 %v1596_v8, %v4026_v35  ;;  %v1557_v3 = vsub.f32 1.5, %v1556_v29  ;;  %v4102_v40 = vpop.eup %2301  ;;  %v1620_v29 = vld [vmem:[%s4746_s4 + $0x58] sm:$0xff] }
 0x1e8   :  { %2303 = vrsqrt.f32 %v1442_v6  ;;  %v1467_v17 = vsub.f32 1.5, %v1466_v59  ;;  %v1564_v21 = vmul.f32 %v4102_v40, %v4086_v14  ;;  %vm1479_vm5 = vweird.f32 %v1442_v6  ;;  %v1670_v59 = vld [vmem:[%s4744_s5 + $0xb0] sm:$0xff] }
 0x1e9   :  { %v1635_v16 = vsub.f32 %v1609_v54, %v1622_v22  ;;  %v1374_v25 = vld [vmem:[#allocation2 + $0x60] sm:$0xff]  ;;  %v1558_v58 = vmul.f32 %v4082_v4, %v1557_v3  ;;  %vm1570_vm6 = vweird.f32 %v4102_v40  ;;  %v1669_v22 = vld [vmem:[%s4744_s5 + $0xa8] sm:$0xff]  ;;  %v1671_v3 = vld [vmem:[%s4744_s5 + $0xb8] sm:$0xff] }
 0x1ea   :  { %1741 = vperm.xlu2 %2278, %v1596_v8   ;;  %v4108_v32 = vmul.f32 0.0012755102, %v1374_v25  ;;  %v1468_v35 = vmul.f32 %v2300_v7, %v1467_v17  ;;  %v1565_v37 = vmul.f32 %v4102_v40, %v1564_v21  ;;  %vm1571_vm9 = vmor %vm1569_vm8, %vm1570_vm6  ;;  %v1673_v25 = vld [vmem:[%s4744_s5 + $0xc8] sm:$0xff] }
 0x1eb   :  { %1897 = vperm.xlu1 %2279, %v1635_v16   ;;  %v1562_v48 = vsel %vm1561_vm3, %v4082_v4, %v1558_v58 }
 0x1ec   :  { %v1426_v50 = vmul.f32 %v4108_v32, %v4108_v32  ;;  %v1472_v26 = vsel %vm1471_vm15, %v2300_v7, %v1468_v35  ;;  %v1566_v42 = vmul.f32 0.5, %v1565_v37  ;;  %v1606_v47 = vmul.f32 %v1593_v36, %v1562_v48 }
 0x1ed   :  { %v1597_v27 = vmul.f32 %v1584_v23, %v1472_v26 }
 0x1ee   :  { %v2304_v24 = vpop.eup %2303  ;;  %v1439_v18 = vsub.f32 %v1413_v44, %v1426_v50  ;;  %v1567_v38 = vsub.f32 1.5, %v1566_v42  ;;  %v1632_v0 = vmul.f32 %v1606_v47, %v4044_v56  ;;  %v1675_v50 = vld [vmem:[%s4744_s5 + $0xd8] sm:$0xff]  ;;  %v1677_v42 = vld [vmem:[%s4744_s5 + $0xe8] sm:$0xff] }
 0x1ef   :  { %v1474_v61 = vmul.f32 %v2304_v24, %v1442_v6  ;;  %1746 = vperm.xlu0 %2280, %v1597_v27   ;;  %v1623_v13 = vmul.f32 %v1597_v27, %v4048_v12  ;;  %vm1480_vm4 = vweird.f32 %v2304_v24 }
 0x1f0   :  { %v1452_v11 = vadd.f32 1e-05, %v1439_v18  ;;  %v1568_v62 = vmul.f32 %v4102_v40, %v1567_v38  ;;  %vm1481_vm7 = vmor %vm1479_vm5, %vm1480_vm4 }
 0x1f1   :  { %v1475_v30 = vmul.f32 %v2304_v24, %v1474_v61  ;;  %v1636_v49 = vsub.f32 %v1610_v9, %v1623_v13  ;;  %v1676_v61 = vld [vmem:[%s4744_s5 + $0xe0] sm:$0xff] }
 0x1f2   :  { %2305 = vrsqrt.f32 %v1452_v11  ;;  %v1572_v4 = vsel %vm1571_vm9, %v4102_v40, %v1568_v62  ;;  %vm1579_vm11 = vweird.f32 %v1452_v11 }
 0x1f3   :  { %1791 = vperm.xlu1 %2279, %v1606_v47   ;;  %v1476_v20 = vmul.f32 0.5, %v1475_v30  ;;  %v1607_v7 = vmul.f32 %v1594_v53, %v1572_v4  ;;  %v1679_v47 = vld [vmem:[%s4744_s5 + $0xf8] sm:$0xff] }
 0x1f5   :  { %v1477_v15 = vsub.f32 1.5, %v1476_v20  ;;  %v1633_v56 = vmul.f32 %v1607_v7, %v4065_v43  ;;  %v1672_v43 = vld [vmem:[%s4744_s5 + $0xc0] sm:$0xff] }
 0x1f6   :  { %v1680_v20 = vld [vmem:[%s4744_s5 + $0x100] sm:$0xff] }
 0x1f7   :  { %v1478_v31 = vmul.f32 %v2304_v24, %v1477_v15  ;;  %1902 = vperm.xlu0 %2280, %v1636_v49   ;;  %v1646_v54 = vsub.f32 %v1620_v29, %v1633_v56 }
 0x1f8   :  { %v2306_v12 = vpop.eup %2305 }
 0x1f9   :  { %v1482_v60 = vsel %vm1481_vm7, %v2304_v24, %v1478_v31  ;;  %v1574_v33 = vmul.f32 %v2306_v12, %v1452_v11  ;;  %vm1580_vm10 = vweird.f32 %v2306_v12  ;;  %v1678_v11 = vld [vmem:[%s4744_s5 + $0xf0] sm:$0xff]  ;;  %v1681_v31 = vld [vmem:[%s4744_s5 + $0x108] sm:$0xff] }
 0x1fa   :  { %v1598_v57 = vmul.f32 %v1585_v10, %v1482_v60  ;;  %vm1581_vm12 = vmor %vm1579_vm11, %vm1580_vm10 }
 0x1fb   :  { %v1575_v63 = vmul.f32 %v2306_v12, %v1574_v33  ;;  %v1682_v33 = vld [vmem:[%s4744_s5 + $0x110] sm:$0xff] }
 0x1fc   :  { %1751 = vperm.xlu1 %2279, %v1598_v57   ;;  %v1624_v52 = vmul.f32 %v1598_v57, %v4080_v55  ;;  %v1619_v55 = vld [vmem:[%s4746_s4 + $0x50] sm:$0xff] }
 0x1fd   :  { %v1576_v51 = vmul.f32 0.5, %v1575_v63  ;;  %v1645_v34 = vsub.f32 %v1619_v55, %v1632_v0  ;;  %v1688_v0 = vld [vmem:[%s4744_s5 + $0x140] sm:$0xff] }
 0x1fe   :  { %v1637_v14 = vsub.f32 %v1611_v41, %v1624_v52 }
 0x1ff   :  { %v1577_v5 = vsub.f32 1.5, %v1576_v51  ;;  %1796 = vperm.xlu0 %2280, %v1607_v7   ;;  %v1683_v51 = vld [vmem:[%s4744_s5 + $0x118] sm:$0xff]  ;;  %v1684_v7 = vld [vmem:[%s4744_s5 + $0x120] sm:$0xff] }
 0x200   :  { %1907 = vperm.xlu2 %2278, %v1637_v14   ;;  %v1685_v14 = vld [vmem:[%s4744_s5 + $0x128] sm:$0xff] }
 0x201   :  { %v1578_v39 = vmul.f32 %v2306_v12, %v1577_v5  ;;  %v1686_v5 = vld [vmem:[%s4744_s5 + $0x130] sm:$0xff] }
 0x203   :  { %v1582_v46 = vsel %vm1581_vm12, %v2306_v12, %v1578_v39 }
 0x204   :  { %v1608_v45 = vmul.f32 %v1595_v2, %v1582_v46  ;;  %v1687_v2 = vld [vmem:[%s4744_s5 + $0x138] sm:$0xff] }
 0x206   :  { %v1634_v8 = vmul.f32 %v1608_v45, %v4108_v32  ;;  %v1674_v32 = vld [vmem:[%s4744_s5 + $0xd0] sm:$0xff] }
 0x207   :  { %1947 = vperm.xlu0 %2280, %v1645_v34   ;;  %v1689_v34 = vld [vmem:[%s4744_s5 + $0x148] sm:$0xff] }
 0x208   :  { %1801 = vperm.xlu2 %2278, %v1608_v45   ;;  %v1647_v1 = vsub.f32 %v1621_v19, %v1634_v8 }
 0x20a   :  { %1957 = vperm.xlu1 %2279, %v1647_v1  }
 0x20b   :  { %v1757_v6 = vpop.permute.xlu2 %1756 }
 0x20c   :  { %v1825_v40 = vmul.f32 %v1757_v6, %v1669_v22  ;;  %v1826_v16 = vmul.f32 %v1757_v6, %v1670_v59  ;;  %v1827_v17 = vmul.f32 %v1757_v6, %v1671_v3  ;;  %v1828_v28 = vmul.f32 %v1757_v6, %v1672_v43  ;;  %v1690_v43 = vld [vmem:[%s4744_s5 + $0x150] sm:$0xff] }
 0x20d   :  { %v1829_v35 = vmul.f32 %v1757_v6, %v1673_v25  ;;  %v1830_v26 = vmul.f32 %v1757_v6, %v1674_v32  ;;  %v1831_v27 = vmul.f32 %v1757_v6, %v1675_v50  ;;  %v1695_v50 = vld [vmem:[%s4744_s5 + $0x178] sm:$0xff] }
 0x210   :  { %1952 = vperm.xlu2 %2278, %v1646_v54  }
 0x213   :  { %v1762_v58 = vpop.permute.xlu2 %1761 }
 0x214   :  { %v1832_v30 = vmul.f32 %v1762_v58, %v1676_v61  ;;  %v1833_v13 = vmul.f32 %v1762_v58, %v1677_v42  ;;  %v1834_v9 = vmul.f32 %v1762_v58, %v1678_v11  ;;  %v1835_v38 = vmul.f32 %v1762_v58, %v1679_v47 }
 0x215   :  { %v1836_v10 = vmul.f32 %v1762_v58, %v1680_v20  ;;  %v1837_v57 = vmul.f32 %v1762_v58, %v1681_v31  ;;  %v1838_v53 = vmul.f32 %v1762_v58, %v1682_v33  ;;  %v1693_v58 = vld [vmem:[%s4744_s5 + $0x168] sm:$0xff]  ;;  %v1698_v20 = vld [vmem:[%s4744_s5 + $0x190] sm:$0xff] }
 0x216   :  { %v1701_v31 = vld [vmem:[%s4744_s5 + $0x1a8] sm:$0xff] }
 0x221   :  { %v1923_v15 = vpop.permute.xlu2 %1922 }
 0x227   :  { %v1913_v21 = vpop.permute.xlu1 %1912 }
 0x228   :  { %v1981_v23 = vadd.f32 %v1913_v21, %v1825_v40  ;;  %v1982_v37 = vadd.f32 %v1913_v21, %v1826_v16  ;;  %v1983_v44 = vadd.f32 %v1913_v21, %v1827_v17  ;;  %v1984_v24 = vadd.f32 %v1913_v21, %v1828_v28  ;;  %v1691_v16 = vld [vmem:[%s4744_s5 + $0x158] sm:$0xff]  ;;  %v1692_v17 = vld [vmem:[%s4744_s5 + $0x160] sm:$0xff] }
 0x229   :  { %v1985_v48 = vadd.f32 %v1913_v21, %v1829_v35  ;;  %v1986_v36 = vadd.f32 %v1913_v21, %v1830_v26  ;;  %v1987_v18 = vadd.f32 %v1913_v21, %v1831_v27  ;;  %v1772_v22 = vpop.permute.xlu2 %1771 }
 0x22a   :  { %2072 = vst [vmem:[%s4744_s5 + $0xa8] sm:$0xff] %v1981_v23  ;;  %v1846_v25 = vmul.f32 %v1772_v22, %v1690_v43  ;;  %v1847_v21 = vmul.f32 %v1772_v22, %v1691_v16  ;;  %v1848_v32 = vmul.f32 %v1772_v22, %v1692_v17  ;;  %v1694_v23 = vld [vmem:[%s4744_s5 + $0x170] sm:$0xff] }
 0x22b   :  { %2073 = vst [vmem:[%s4744_s5 + $0xb0] sm:$0xff] %v1982_v37  ;;  %v1849_v37 = vmul.f32 %v1772_v22, %v1693_v58  ;;  %v1850_v26 = vmul.f32 %v1772_v22, %v1694_v23  ;;  %v1712_v58 = vld [vmem:[%s4744_s5 + $0x200] sm:$0xff] }
 0x22c   :  { %2074 = vst [vmem:[%s4744_s5 + $0xb8] sm:$0xff] %v1983_v44 }
 0x22d   :  { %2075 = vst [vmem:[%s4744_s5 + $0xc0] sm:$0xff] %v1984_v24 }
 0x22e   :  { %2076 = vst [vmem:[%s4744_s5 + $0xc8] sm:$0xff] %v1985_v48  ;;  %v1696_v48 = vld [vmem:[%s4744_s5 + $0x180] sm:$0xff] }
 0x22f   :  { %2077 = vst [vmem:[%s4744_s5 + $0xd0] sm:$0xff] %v1986_v36  ;;  %v1918_v49 = vpop.permute.xlu0 %1917  ;;  %v1851_v36 = vmul.f32 %v1772_v22, %v1695_v50  ;;  %v1852_v61 = vmul.f32 %v1772_v22, %v1696_v48 }
 0x230   :  { %2078 = vst.msk [vmem:[%s4744_s5 + $0xd8] sm:$0xff] %vm869_vm1, %v1987_v18  ;;  %v1988_v62 = vadd.f32 %v1918_v49, %v1832_v30  ;;  %v1989_v12 = vadd.f32 %v1918_v49, %v1833_v13  ;;  %v1990_v60 = vadd.f32 %v1918_v49, %v1834_v9  ;;  %v1991_v4 = vadd.f32 %v1918_v49, %v1835_v38  ;;  %v1697_v9 = vld [vmem:[%s4744_s5 + $0x188] sm:$0xff] }
 0x231   :  { %v1992_v41 = vadd.f32 %v1918_v49, %v1836_v10  ;;  %v1993_v63 = vadd.f32 %v1918_v49, %v1837_v57  ;;  %v1994_v52 = vadd.f32 %v1918_v49, %v1838_v53  ;;  %v1700_v49 = vld [vmem:[%s4744_s5 + $0x1a0] sm:$0xff] }
 0x232   :  { %2079 = vst [vmem:[%s4744_s5 + $0xe0] sm:$0xff] %v1988_v62  ;;  %v1702_v62 = vld [vmem:[%s4744_s5 + $0x1b0] sm:$0xff] }
 0x233   :  { %2080 = vst [vmem:[%s4744_s5 + $0xe8] sm:$0xff] %v1989_v12  ;;  %v1703_v12 = vld [vmem:[%s4744_s5 + $0x1b8] sm:$0xff] }
 0x234   :  { %2081 = vst [vmem:[%s4744_s5 + $0xf0] sm:$0xff] %v1990_v60  ;;  %v1938_v13 = vpop.permute.xlu2 %1937 }
 0x235   :  { %2082 = vst [vmem:[%s4744_s5 + $0xf8] sm:$0xff] %v1991_v4  ;;  %v1767_v39 = vpop.permute.xlu1 %1766 }
 0x236   :  { %2083 = vst [vmem:[%s4744_s5 + $0x100] sm:$0xff] %v1992_v41  ;;  %v1839_v55 = vmul.f32 %v1767_v39, %v1683_v51  ;;  %v1840_v46 = vmul.f32 %v1767_v39, %v1684_v7  ;;  %v1841_v45 = vmul.f32 %v1767_v39, %v1685_v14  ;;  %v1842_v19 = vmul.f32 %v1767_v39, %v1686_v5 }
 0x237   :  { %2084 = vst [vmem:[%s4744_s5 + $0x108] sm:$0xff] %v1993_v63  ;;  %v1843_v8 = vmul.f32 %v1767_v39, %v1687_v2  ;;  %v1844_v1 = vmul.f32 %v1767_v39, %v1688_v0  ;;  %v1845_v56 = vmul.f32 %v1767_v39, %v1689_v34  ;;  %v1704_v39 = vld [vmem:[%s4744_s5 + $0x1c0] sm:$0xff]  ;;  %v1705_v0 = vld [vmem:[%s4744_s5 + $0x1c8] sm:$0xff] }
 0x238   :  { %2085 = vst.msk [vmem:[%s4744_s5 + $0x110] sm:$0xff] %vm869_vm1, %v1994_v52  ;;  %v1995_v29 = vadd.f32 %v1923_v15, %v1839_v55  ;;  %v1996_v54 = vadd.f32 %v1923_v15, %v1840_v46  ;;  %v1997_v6 = vadd.f32 %v1923_v15, %v1841_v45  ;;  %v1998_v59 = vadd.f32 %v1923_v15, %v1842_v19  ;;  %v1706_v55 = vld [vmem:[%s4744_s5 + $0x1d0] sm:$0xff]  ;;  %v1707_v46 = vld [vmem:[%s4744_s5 + $0x1d8] sm:$0xff]  ;;  %v1708_v19 = vld [vmem:[%s4744_s5 + $0x1e0] sm:$0xff] }
 0x239   :  { %v1999_v3 = vadd.f32 %v1923_v15, %v1843_v8  ;;  %v2000_v40 = vadd.f32 %v1923_v15, %v1844_v1  ;;  %v2001_v28 = vadd.f32 %v1923_v15, %v1845_v56  ;;  %v1699_v15 = vld [vmem:[%s4744_s5 + $0x198] sm:$0xff]  ;;  %v1709_v34 = vld [vmem:[%s4744_s5 + $0x1e8] sm:$0xff] }
 0x23a   :  { %2086 = vst [vmem:[%s4744_s5 + $0x118] sm:$0xff] %v1995_v29 }
 0x23b   :  { %2087 = vst [vmem:[%s4744_s5 + $0x120] sm:$0xff] %v1996_v54  ;;  %v1710_v54 = vld [vmem:[%s4744_s5 + $0x1f0] sm:$0xff] }
 0x23c   :  { %2088 = vst [vmem:[%s4744_s5 + $0x128] sm:$0xff] %v1997_v6 }
 0x23d   :  { %2089 = vst [vmem:[%s4744_s5 + $0x130] sm:$0xff] %v1998_v59  ;;  %v1928_v35 = vpop.permute.xlu1 %1927  ;;  %v1787_v59 = vpop.permute.xlu2 %1786 }
 0x23e   :  { %2090 = vst [vmem:[%s4744_s5 + $0x138] sm:$0xff] %v1999_v3  ;;  %v2002_v44 = vadd.f32 %v1928_v35, %v1846_v25  ;;  %v2003_v24 = vadd.f32 %v1928_v35, %v1847_v21  ;;  %v2004_v27 = vadd.f32 %v1928_v35, %v1848_v32  ;;  %v2005_v18 = vadd.f32 %v1928_v35, %v1849_v37  ;;  %v1713_v32 = vld [vmem:[%s4744_s5 + $0x208] sm:$0xff] }
 0x23f   :  { %2091 = vst [vmem:[%s4744_s5 + $0x140] sm:$0xff] %v2000_v40  ;;  %v2006_v42 = vadd.f32 %v1928_v35, %v1850_v26  ;;  %v2007_v11 = vadd.f32 %v1928_v35, %v1851_v36  ;;  %v2008_v47 = vadd.f32 %v1928_v35, %v1852_v61  ;;  %v1868_v23 = vmul.f32 %v1787_v59, %v1712_v58 }
 0x240   :  { %2092 = vst.msk [vmem:[%s4744_s5 + $0x148] sm:$0xff] %vm869_vm1, %v2001_v28  ;;  %v1711_v28 = vld [vmem:[%s4744_s5 + $0x1f8] sm:$0xff]  ;;  %v1869_v50 = vmul.f32 %v1787_v59, %v1713_v32 }
 0x241   :  { %2093 = vst [vmem:[%s4744_s5 + $0x150] sm:$0xff] %v2002_v44  ;;  %v1867_v35 = vmul.f32 %v1787_v59, %v1711_v28  ;;  %v1714_v44 = vld [vmem:[%s4744_s5 + $0x210] sm:$0xff] }
 0x242   :  { %2094 = vst [vmem:[%s4744_s5 + $0x158] sm:$0xff] %v2003_v24  ;;  %v1715_v24 = vld [vmem:[%s4744_s5 + $0x218] sm:$0xff] }
 0x243   :  { %2095 = vst [vmem:[%s4744_s5 + $0x160] sm:$0xff] %v2004_v27  ;;  %v1870_v27 = vmul.f32 %v1787_v59, %v1714_v44  ;;  %v1871_v61 = vmul.f32 %v1787_v59, %v1715_v24  ;;  %v1662_v44 = vld [vmem:[%s4744_s5 + $0x70] sm:$0xff]  ;;  %v1663_v24 = vld [vmem:[%s4744_s5 + $0x78] sm:$0xff] }
 0x244   :  { %2096 = vst [vmem:[%s4744_s5 + $0x168] sm:$0xff] %v2005_v18  ;;  %v1933_v30 = vpop.permute.xlu0 %1932  ;;  %v1716_v18 = vld [vmem:[%s4744_s5 + $0x220] sm:$0xff] }
 0x245   :  { %2097 = vst [vmem:[%s4744_s5 + $0x170] sm:$0xff] %v2006_v42  ;;  %v1777_v38 = vpop.permute.xlu1 %1776 }
 0x246   :  { %2098 = vst [vmem:[%s4744_s5 + $0x178] sm:$0xff] %v2007_v11  ;;  %v1853_v10 = vmul.f32 %v1777_v38, %v1697_v9  ;;  %v1854_v60 = vmul.f32 %v1777_v38, %v1698_v20  ;;  %v1855_v33 = vmul.f32 %v1777_v38, %v1699_v15  ;;  %v1856_v57 = vmul.f32 %v1777_v38, %v1700_v49  ;;  %v1717_v11 = vld [vmem:[%s4744_s5 + $0x228] sm:$0xff]  ;;  %v1742_v20 = vpop.permute.xlu2 %1741  ;;  %v1648_v49 = vld [vmem:[%s4744_s5] sm:$0xff] }
 0x247   :  { %2099 = vst.msk [vmem:[%s4744_s5 + $0x180] sm:$0xff] %vm869_vm1, %v2008_v47  ;;  %v1857_v4 = vmul.f32 %v1777_v38, %v1701_v31  ;;  %v1858_v53 = vmul.f32 %v1777_v38, %v1702_v62  ;;  %v1859_v41 = vmul.f32 %v1777_v38, %v1703_v12  ;;  %v1872_v47 = vmul.f32 %v1787_v59, %v1716_v18  ;;  %v1649_v31 = vld [vmem:[%s4744_s5 + $0x8] sm:$0xff]  ;;  %v1651_v62 = vld [vmem:[%s4744_s5 + $0x18] sm:$0xff]  ;;  %v1666_v18 = vld [vmem:[%s4744_s5 + $0x90] sm:$0xff] }
 0x248   :  { %v2009_v63 = vadd.f32 %v1933_v30, %v1853_v10  ;;  %v2010_v52 = vadd.f32 %v1933_v30, %v1854_v60  ;;  %v2011_v51 = vadd.f32 %v1933_v30, %v1855_v33  ;;  %v2012_v7 = vadd.f32 %v1933_v30, %v1856_v57  ;;  %v1650_v10 = vld [vmem:[%s4744_s5 + $0x10] sm:$0xff]  ;;  %v1652_v57 = vld [vmem:[%s4744_s5 + $0x20] sm:$0xff] }
 0x249   :  { %v2013_v14 = vadd.f32 %v1933_v30, %v1857_v4  ;;  %v2014_v5 = vadd.f32 %v1933_v30, %v1858_v53  ;;  %v2015_v2 = vadd.f32 %v1933_v30, %v1859_v41  ;;  %v1804_v12 = vmul.f32 %v1742_v20, %v1648_v49  ;;  %v1653_v41 = vld [vmem:[%s4744_s5 + $0x28] sm:$0xff] }
 0x24a   :  { %2100 = vst [vmem:[%s4744_s5 + $0x188] sm:$0xff] %v2009_v63  ;;  %v1805_v60 = vmul.f32 %v1742_v20, %v1649_v31  ;;  %v1806_v33 = vmul.f32 %v1742_v20, %v1650_v10  ;;  %v1807_v4 = vmul.f32 %v1742_v20, %v1651_v62  ;;  %v1808_v63 = vmul.f32 %v1742_v20, %v1652_v57  ;;  %v1725_v10 = vld [vmem:[%s4744_s5 + $0x268] sm:$0xff] }
 0x24b   :  { %2101 = vst [vmem:[%s4744_s5 + $0x190] sm:$0xff] %v2010_v52 }
 0x24c   :  { %2102 = vst [vmem:[%s4744_s5 + $0x198] sm:$0xff] %v2011_v51  ;;  %v1782_v45 = vpop.permute.xlu0 %1781 }
 0x24d   :  { %2103 = vst [vmem:[%s4744_s5 + $0x1a0] sm:$0xff] %v2012_v7  ;;  %v1860_v8 = vmul.f32 %v1782_v45, %v1704_v39  ;;  %v1861_v1 = vmul.f32 %v1782_v45, %v1705_v0  ;;  %v1862_v56 = vmul.f32 %v1782_v45, %v1706_v55  ;;  %v1863_v29 = vmul.f32 %v1782_v45, %v1707_v46 }
 0x24e   :  { %2104 = vst [vmem:[%s4744_s5 + $0x1a8] sm:$0xff] %v2013_v14  ;;  %v1864_v6 = vmul.f32 %v1782_v45, %v1708_v19  ;;  %v1865_v22 = vmul.f32 %v1782_v45, %v1709_v34  ;;  %v1866_v3 = vmul.f32 %v1782_v45, %v1710_v54  ;;  %v1654_v14 = vld [vmem:[%s4744_s5 + $0x30] sm:$0xff] }
 0x24f   :  { %2105 = vst [vmem:[%s4744_s5 + $0x1b0] sm:$0xff] %v2014_v5  ;;  %v2016_v43 = vadd.f32 %v1938_v13, %v1860_v8  ;;  %v2017_v40 = vadd.f32 %v1938_v13, %v1861_v1  ;;  %v2018_v16 = vadd.f32 %v1938_v13, %v1862_v56  ;;  %v2019_v17 = vadd.f32 %v1938_v13, %v1863_v29  ;;  %v1655_v8 = vld [vmem:[%s4744_s5 + $0x38] sm:$0xff]  ;;  %v1656_v1 = vld [vmem:[%s4744_s5 + $0x40] sm:$0xff]  ;;  %v1657_v56 = vld [vmem:[%s4744_s5 + $0x48] sm:$0xff] }
 0x250   :  { %2106 = vst.msk [vmem:[%s4744_s5 + $0x1b8] sm:$0xff] %vm869_vm1, %v2015_v2  ;;  %v2020_v25 = vadd.f32 %v1938_v13, %v1864_v6  ;;  %v2021_v21 = vadd.f32 %v1938_v13, %v1865_v22  ;;  %v2022_v37 = vadd.f32 %v1938_v13, %v1866_v3  ;;  %v1873_v13 = vmul.f32 %v1787_v59, %v1717_v11  ;;  %v1658_v29 = vld [vmem:[%s4744_s5 + $0x50] sm:$0xff]  ;;  %v1659_v59 = vld [vmem:[%s4744_s5 + $0x58] sm:$0xff] }
 0x251   :  { %2107 = vst [vmem:[%s4744_s5 + $0x1c0] sm:$0xff] %v2016_v43  ;;  %v1809_v5 = vmul.f32 %v1742_v20, %v1653_v41  ;;  %v1810_v2 = vmul.f32 %v1742_v20, %v1654_v14  ;;  %v1729_v14 = vld [vmem:[%s4744_s5 + $0x288] sm:$0xff] }
 0x252   :  { %2108 = vst [vmem:[%s4744_s5 + $0x1c8] sm:$0xff] %v2017_v40  ;;  %v1660_v40 = vld [vmem:[%s4744_s5 + $0x60] sm:$0xff] }
 0x253   :  { %2109 = vst [vmem:[%s4744_s5 + $0x1d0] sm:$0xff] %v2018_v16  ;;  %v1661_v16 = vld [vmem:[%s4744_s5 + $0x68] sm:$0xff] }
 0x254   :  { %2110 = vst [vmem:[%s4744_s5 + $0x1d8] sm:$0xff] %v2019_v17  ;;  %v1943_v26 = vpop.permute.xlu1 %1942 }
 0x255   :  { %2111 = vst [vmem:[%s4744_s5 + $0x1e0] sm:$0xff] %v2020_v25  ;;  %v2023_v48 = vadd.f32 %v1943_v26, %v1867_v35  ;;  %v2024_v36 = vadd.f32 %v1943_v26, %v1868_v23  ;;  %v2025_v42 = vadd.f32 %v1943_v26, %v1869_v50  ;;  %v2026_v30 = vadd.f32 %v1943_v26, %v1870_v27  ;;  %v1664_v27 = vld [vmem:[%s4744_s5 + $0x80] sm:$0xff] }
 0x256   :  { %2112 = vst [vmem:[%s4744_s5 + $0x1e8] sm:$0xff] %v2021_v21  ;;  %v2027_v9 = vadd.f32 %v1943_v26, %v1871_v61  ;;  %v2028_v38 = vadd.f32 %v1943_v26, %v1872_v47  ;;  %v2029_v15 = vadd.f32 %v1943_v26, %v1873_v13 }
 0x257   :  { %2113 = vst.msk [vmem:[%s4744_s5 + $0x1f0] sm:$0xff] %vm869_vm1, %v2022_v37 }
 0x258   :  { %2114 = vst [vmem:[%s4744_s5 + $0x1f8] sm:$0xff] %v2023_v48  ;;  %v1665_v48 = vld [vmem:[%s4744_s5 + $0x88] sm:$0xff] }
 0x259   :  { %2115 = vst [vmem:[%s4744_s5 + $0x200] sm:$0xff] %v2024_v36 }
 0x25a   :  { %2116 = vst [vmem:[%s4744_s5 + $0x208] sm:$0xff] %v2025_v42  ;;  %v4483_v46 = vpop.permute.xlu2 %1907 }
 0x25b   :  { %2117 = vst [vmem:[%s4744_s5 + $0x210] sm:$0xff] %v2026_v30  ;;  %v1667_v30 = vld [vmem:[%s4744_s5 + $0x98] sm:$0xff] }
 0x25c   :  { %2118 = vst [vmem:[%s4744_s5 + $0x218] sm:$0xff] %v2027_v9  ;;  %v1668_v9 = vld [vmem:[%s4744_s5 + $0xa0] sm:$0xff] }
 0x25d   :  { %2119 = vst [vmem:[%s4744_s5 + $0x220] sm:$0xff] %v2028_v38  ;;  %v1898_v53 = vpop.permute.xlu1 %1897 }
 0x25e   :  { %2120 = vst.msk [vmem:[%s4744_s5 + $0x228] sm:$0xff] %vm869_vm1, %v2029_v15  ;;  %v1960_v52 = vadd.f32 %v1898_v53, %v1804_v12  ;;  %v1961_v51 = vadd.f32 %v1898_v53, %v1805_v60  ;;  %v1962_v7 = vadd.f32 %v1898_v53, %v1806_v33  ;;  %v1963_v39 = vadd.f32 %v1898_v53, %v1807_v4  ;;  %v1726_v60 = vld [vmem:[%s4744_s5 + $0x270] sm:$0xff]  ;;  %v1727_v4 = vld [vmem:[%s4744_s5 + $0x278] sm:$0xff] }
 0x25f   :  { %v1964_v0 = vadd.f32 %v1898_v53, %v1808_v63  ;;  %v1965_v55 = vadd.f32 %v1898_v53, %v1809_v5  ;;  %v1966_v45 = vadd.f32 %v1898_v53, %v1810_v2  ;;  %v1728_v63 = vld [vmem:[%s4744_s5 + $0x280] sm:$0xff] }
 0x260   :  { %2051 = vst [vmem:[%s4744_s5] sm:$0xff] %v1960_v52 }
 0x261   :  { %2052 = vst [vmem:[%s4744_s5 + $0x8] sm:$0xff] %v1961_v51  ;;  %v1747_v19 = vpop.permute.xlu0 %1746 }
 0x262   :  { %2053 = vst [vmem:[%s4744_s5 + $0x10] sm:$0xff] %v1962_v7  ;;  %v1811_v54 = vmul.f32 %v1747_v19, %v1655_v8  ;;  %v1812_v6 = vmul.f32 %v1747_v19, %v1656_v1  ;;  %v1813_v22 = vmul.f32 %v1747_v19, %v1657_v56  ;;  %v1814_v3 = vmul.f32 %v1747_v19, %v1658_v29  ;;  %v4524_v35 = vpop.permute.xlu2 %1801  ;;  %v1718_v29 = vld [vmem:[%s4744_s5 + $0x230] sm:$0xff] }
 0x263   :  { %2054 = vst [vmem:[%s4744_s5 + $0x18] sm:$0xff] %v1963_v39  ;;  %v1815_v17 = vmul.f32 %v1747_v19, %v1659_v59  ;;  %v1816_v21 = vmul.f32 %v1747_v19, %v1660_v40  ;;  %v1817_v32 = vmul.f32 %v1747_v19, %v1661_v16  ;;  %v1730_v39 = vld [vmem:[%s4744_s5 + $0x290] sm:$0xff]  ;;  %v1721_v16 = vld [vmem:[%s4744_s5 + $0x248] sm:$0xff] }
 0x264   :  { %2055 = vst [vmem:[%s4744_s5 + $0x20] sm:$0xff] %v1964_v0 }
 0x265   :  { %2056 = vst [vmem:[%s4744_s5 + $0x28] sm:$0xff] %v1965_v55  ;;  %v4501_v34 = vpop.permute.xlu1 %1791  ;;  %v1731_v55 = vld [vmem:[%s4744_s5 + $0x298] sm:$0xff] }
 0x266   :  { %2057 = vst.msk [vmem:[%s4744_s5 + $0x30] sm:$0xff] %vm869_vm1, %v1966_v45  ;;  %v1874_v59 = vmul.f32 %v4501_v34, %v1718_v29 }
 0x269   :  { %v1903_v43 = vpop.permute.xlu0 %1902 }
 0x26a   :  { %v1967_v25 = vadd.f32 %v1903_v43, %v1811_v54  ;;  %v1968_v28 = vadd.f32 %v1903_v43, %v1812_v6  ;;  %v1969_v58 = vadd.f32 %v1903_v43, %v1813_v22  ;;  %v1970_v23 = vadd.f32 %v1903_v43, %v1814_v3  ;;  %v1953_v51 = vpop.permute.xlu2 %1952  ;;  %v1719_v22 = vld [vmem:[%s4744_s5 + $0x238] sm:$0xff] }
 0x26b   :  { %v1971_v37 = vadd.f32 %v1903_v43, %v1815_v17  ;;  %v1972_v50 = vadd.f32 %v1903_v43, %v1816_v21  ;;  %v1973_v26 = vadd.f32 %v1903_v43, %v1817_v32  ;;  %v1720_v43 = vld [vmem:[%s4744_s5 + $0x240] sm:$0xff]  ;;  %v1875_v40 = vmul.f32 %v4501_v34, %v1719_v22  ;;  %v1723_v32 = vld [vmem:[%s4744_s5 + $0x258] sm:$0xff] }
 0x26c   :  { %2058 = vst [vmem:[%s4744_s5 + $0x38] sm:$0xff] %v1967_v25  ;;  %v1876_v17 = vmul.f32 %v4501_v34, %v1720_v43 }
 0x26d   :  { %2059 = vst [vmem:[%s4744_s5 + $0x40] sm:$0xff] %v1968_v28  ;;  %v1722_v28 = vld [vmem:[%s4744_s5 + $0x250] sm:$0xff] }
 0x26e   :  { %v1752_v36 = vpop.permute.xlu1 %1751  ;;  %2060 = vst [vmem:[%s4744_s5 + $0x48] sm:$0xff] %v1969_v58  ;;  %v1877_v58 = vmul.f32 %v4501_v34, %v1721_v16 }
 0x26f   :  { %v1818_v61 = vmul.f32 %v1752_v36, %v1662_v44  ;;  %v1819_v42 = vmul.f32 %v1752_v36, %v1663_v24  ;;  %v1820_v11 = vmul.f32 %v1752_v36, %v1664_v27  ;;  %v1821_v47 = vmul.f32 %v1752_v36, %v1665_v48  ;;  %2061 = vst [vmem:[%s4744_s5 + $0x50] sm:$0xff] %v1970_v23  ;;  %v1724_v44 = vld [vmem:[%s4744_s5 + $0x260] sm:$0xff] }
 0x270   :  { %v1822_v13 = vmul.f32 %v1752_v36, %v1666_v18  ;;  %2062 = vst [vmem:[%s4744_s5 + $0x58] sm:$0xff] %v1971_v37  ;;  %v1823_v20 = vmul.f32 %v1752_v36, %v1667_v30  ;;  %v1824_v49 = vmul.f32 %v1752_v36, %v1668_v9  ;;  %v1878_v23 = vmul.f32 %v4501_v34, %v1722_v28  ;;  %v1732_v48 = vld [vmem:[%s4744_s5 + $0x2a0] sm:$0xff]  ;;  %v1735_v30 = vld [vmem:[%s4744_s5 + $0x2b8] sm:$0xff] }
 0x271   :  { %v1974_v38 = vadd.f32 %v4483_v46, %v1818_v61  ;;  %v1975_v15 = vadd.f32 %v4483_v46, %v1819_v42  ;;  %2063 = vst [vmem:[%s4744_s5 + $0x60] sm:$0xff] %v1972_v50  ;;  %v1976_v31 = vadd.f32 %v4483_v46, %v1820_v11  ;;  %v1797_v62 = vpop.permute.xlu0 %1796  ;;  %v1977_v12 = vadd.f32 %v4483_v46, %v1821_v47  ;;  %v1733_v61 = vld [vmem:[%s4744_s5 + $0x2a8] sm:$0xff]  ;;  %v1734_v11 = vld [vmem:[%s4744_s5 + $0x2b0] sm:$0xff] }
 0x272   :  { %2064 = vst.msk [vmem:[%s4744_s5 + $0x68] sm:$0xff] %vm869_vm1, %v1973_v26  ;;  %v1881_v33 = vmul.f32 %v1797_v62, %v1725_v10  ;;  %v1978_v57 = vadd.f32 %v4483_v46, %v1822_v13  ;;  %v1882_v53 = vmul.f32 %v1797_v62, %v1726_v60  ;;  %v1979_v41 = vadd.f32 %v4483_v46, %v1823_v20  ;;  %v1736_v20 = vld [vmem:[%s4744_s5 + $0x2c0] sm:$0xff] }
 0x273   :  { %2065 = vst [vmem:[%s4744_s5 + $0x70] sm:$0xff] %v1974_v38  ;;  %v1883_v52 = vmul.f32 %v1797_v62, %v1727_v4  ;;  %v1980_v7 = vadd.f32 %v4483_v46, %v1824_v49  ;;  %v1884_v5 = vmul.f32 %v1797_v62, %v1728_v63  ;;  %v1885_v2 = vmul.f32 %v1797_v62, %v1729_v14  ;;  %v1737_v49 = vld [vmem:[%s4744_s5 + $0x2c8] sm:$0xff] }
 0x274   :  { %2066 = vst [vmem:[%s4744_s5 + $0x78] sm:$0xff] %v1975_v15  ;;  %v2037_v0 = vadd.f32 %v1953_v51, %v1881_v33  ;;  %v1886_v46 = vmul.f32 %v1797_v62, %v1730_v39  ;;  %v2038_v45 = vadd.f32 %v1953_v51, %v1882_v53  ;;  %v1887_v19 = vmul.f32 %v1797_v62, %v1731_v55  ;;  %v1738_v62 = vld [vmem:[%s4744_s5 + $0x2d0] sm:$0xff] }
 0x275   :  { %2067 = vst [vmem:[%s4744_s5 + $0x80] sm:$0xff] %v1976_v31  ;;  %v2039_v8 = vadd.f32 %v1953_v51, %v1883_v52  ;;  %v2040_v1 = vadd.f32 %v1953_v51, %v1884_v5  ;;  %v2041_v56 = vadd.f32 %v1953_v51, %v1885_v2  ;;  %v1879_v50 = vmul.f32 %v4501_v34, %v1723_v32 }
 0x276   :  { %2068 = vst [vmem:[%s4744_s5 + $0x88] sm:$0xff] %v1977_v12  ;;  %v2042_v6 = vadd.f32 %v1953_v51, %v1886_v46  ;;  %v2043_v3 = vadd.f32 %v1953_v51, %v1887_v19  ;;  %v1880_v24 = vmul.f32 %v4501_v34, %v1724_v44  ;;  %v1888_v34 = vmul.f32 %v4524_v35, %v1732_v48 }
 0x277   :  { %2069 = vst [vmem:[%s4744_s5 + $0x90] sm:$0xff] %v1978_v57  ;;  %v1889_v47 = vmul.f32 %v4524_v35, %v1733_v61  ;;  %v1890_v13 = vmul.f32 %v4524_v35, %v1734_v11  ;;  %v1891_v38 = vmul.f32 %v4524_v35, %v1735_v30  ;;  %v1892_v31 = vmul.f32 %v4524_v35, %v1736_v20 }
 0x278   :  { %2070 = vst [vmem:[%s4744_s5 + $0x98] sm:$0xff] %v1979_v41  ;;  %v1893_v12 = vmul.f32 %v4524_v35, %v1737_v49  ;;  %v1894_v33 = vmul.f32 %v4524_v35, %v1738_v62 }
 0x279   :  { %2071 = vst.msk [vmem:[%s4744_s5 + $0xa0] sm:$0xff] %vm869_vm1, %v1980_v7  ;;  %v1948_v54 = vpop.permute.xlu0 %1947 }
 0x27a   :  { %2128 = vst [vmem:[%s4744_s5 + $0x268] sm:$0xff] %v2037_v0  ;;  %v2030_v25 = vadd.f32 %v1948_v54, %v1874_v59  ;;  %v2031_v21 = vadd.f32 %v1948_v54, %v1875_v40  ;;  %v2032_v37 = vadd.f32 %v1948_v54, %v1876_v17  ;;  %v2033_v26 = vadd.f32 %v1948_v54, %v1877_v58 }
 0x27b   :  { %2129 = vst [vmem:[%s4744_s5 + $0x270] sm:$0xff] %v2038_v45  ;;  %v2034_v27 = vadd.f32 %v1948_v54, %v1878_v23  ;;  %v2035_v18 = vadd.f32 %v1948_v54, %v1879_v50  ;;  %v2036_v42 = vadd.f32 %v1948_v54, %v1880_v24 }
 0x27c   :  { %2130 = vst [vmem:[%s4744_s5 + $0x278] sm:$0xff] %v2039_v8  ;;  %v1958_v36 = vpop.permute.xlu1 %1957 }
 0x27d   :  { %2131 = vst [vmem:[%s4744_s5 + $0x280] sm:$0xff] %v2040_v1  ;;  %v2044_v9 = vadd.f32 %v1958_v36, %v1888_v34  ;;  %v2045_v15 = vadd.f32 %v1958_v36, %v1889_v47  ;;  %v2046_v10 = vadd.f32 %v1958_v36, %v1890_v13  ;;  %v2047_v60 = vadd.f32 %v1958_v36, %v1891_v38 }
 0x27e   :  { %2132 = vst [vmem:[%s4744_s5 + $0x288] sm:$0xff] %v2041_v56  ;;  %v2048_v57 = vadd.f32 %v1958_v36, %v1892_v31  ;;  %v2049_v4 = vadd.f32 %v1958_v36, %v1893_v12  ;;  %v2050_v53 = vadd.f32 %v1958_v36, %v1894_v33 }
 0x27f   :  { %2133 = vst [vmem:[%s4744_s5 + $0x290] sm:$0xff] %v2042_v6 }
 0x280   :  { %2134 = vst.msk [vmem:[%s4744_s5 + $0x298] sm:$0xff] %vm869_vm1, %v2043_v3 }
 0x281   :  { %2121 = vst [vmem:[%s4744_s5 + $0x230] sm:$0xff] %v2030_v25 }
 0x282   :  { %2122 = vst [vmem:[%s4744_s5 + $0x238] sm:$0xff] %v2031_v21 }
 0x283   :  { %2123 = vst [vmem:[%s4744_s5 + $0x240] sm:$0xff] %v2032_v37 }
 0x284   :  { %2124 = vst [vmem:[%s4744_s5 + $0x248] sm:$0xff] %v2033_v26 }
 0x285   :  { %2125 = vst [vmem:[%s4744_s5 + $0x250] sm:$0xff] %v2034_v27 }
 0x286   :  { %2126 = vst [vmem:[%s4744_s5 + $0x258] sm:$0xff] %v2035_v18 }
 0x287   :  { %2127 = vst.msk [vmem:[%s4744_s5 + $0x260] sm:$0xff] %vm869_vm1, %v2036_v42 }
 0x288   :  { %2135 = vst [vmem:[%s4744_s5 + $0x2a0] sm:$0xff] %v2044_v9 }
 0x289   :  { %2136 = vst [vmem:[%s4744_s5 + $0x2a8] sm:$0xff] %v2045_v15 }
 0x28a   :  { %2137 = vst [vmem:[%s4744_s5 + $0x2b0] sm:$0xff] %v2046_v10 }
 0x28b   :  { %2138 = vst [vmem:[%s4744_s5 + $0x2b8] sm:$0xff] %v2047_v60 }
 0x28c   :  { %2139 = vst [vmem:[%s4744_s5 + $0x2c0] sm:$0xff] %v2048_v57 }
 0x28d   :  { %2140 = vst [vmem:[%s4744_s5 + $0x2c8] sm:$0xff] %v2049_v4 }
 0x28e   :  { %2141 = vst.msk [vmem:[%s4744_s5 + $0x2d0] sm:$0xff] %vm869_vm1, %v2050_v53 }

</bundles_post_ra>
